<compile_context>
chip_gen: v6e
topology: v6e:2x2x1
jax: 0.10.0
libtpu: 0.0.40
codegen_flags: <defaults>
</compile_context>

<pallas_src>
import functools

import jax
import jax.numpy as jnp
from jax.experimental import pallas as pl
from jax.experimental.pallas import tpu as pltpu


def _maxpool_same(x, K):
    """KxK, stride-1, same-padding max pool over an (H, W, C) array.

    Separable row/column passes.  Inputs are non-negative (post-ReLU), so zero
    padding is equivalent to the implicit -inf padding of nn.MaxPool2d.
    """
    H, W, C = x.shape
    pad = K // 2

    # --- pool along H (axis 0 is a major, untiled dim: cheap concat) --------
    zr = jnp.zeros((pad, W, C), x.dtype)
    xp = jnp.concatenate([zr, x, zr], axis=0)                  # (H + 2p, W, C)
    y = xp[0:H]
    for d in range(1, K):
        y = jnp.maximum(y, xp[d:d + H])

    # --- pool along W (axis 1 = sublane). Pad with an 8-wide zero block so
    #     the concat seams land on sublane-aligned (multiple-of-8) offsets. ---
    PW = 8
    zc = jnp.zeros((H, PW, C), x.dtype)
    yp = jnp.concatenate([zc, y, zc], axis=1)                  # (H, W + 16, C)
    base = PW - pad
    z = yp[:, base:base + W]
    for d in range(1, K):
        z = jnp.maximum(z, yp[:, base + d:base + d + W])
    return z


def _make_simsppf_kernel(H, W, K):
    def kernel(x_ref, w1_ref, b1_ref, w2_ref, b2_ref, o_ref):
        cin = x_ref.shape[-1]
        c_ = w1_ref.shape[-1]
        cout = o_ref.shape[-1]

        # ---- cv1: 1x1 conv (BN scale folded into w1) + bias + ReLU ---------
        x2 = x_ref[0].reshape(H * W, cin).astype(jnp.bfloat16)
        a = jnp.dot(x2, w1_ref[...], preferred_element_type=jnp.float32)
        a = jnp.maximum(a + b1_ref[...], 0.0)                  # (H*W, c_), f32

        # ---- SPPF: three chained KxK same-pad max pools, all VMEM-resident -
        a3 = a.reshape(H, W, c_)
        y1 = _maxpool_same(a3, K)
        y2 = _maxpool_same(y1, K)
        y3 = _maxpool_same(y2, K)

        # ---- concat on channels (lane dim) -> lane-dense 4*c_ operand ------
        cat = jnp.concatenate([a3, y1, y2, y3], axis=-1)       # (H, W, 4*c_)
        cat2 = cat.reshape(H * W, 4 * c_).astype(jnp.bfloat16)

        # ---- cv2: 1x1 conv (BN folded) + bias + ReLU ------------------------
        o = jnp.dot(cat2, w2_ref[...], preferred_element_type=jnp.float32)
        o = jnp.maximum(o + b2_ref[...], 0.0)
        o_ref[0] = o.reshape(H, W, cout).astype(o_ref.dtype)

    return kernel


def simsppf_forward_nhwc(x_nhwc, params, *, kernel_size=5):
    N, H, W, Cin = x_nhwc.shape
    w1, b1 = params["w1"], params["b1"]
    w2, b2 = params["w2"], params["b2"]
    c_ = w1.shape[-1]
    cout = w2.shape[-1]

    kernel = _make_simsppf_kernel(H, W, kernel_size)
    return pl.pallas_call(
        kernel,
        out_shape=jax.ShapeDtypeStruct((N, H, W, cout), x_nhwc.dtype),
        grid_spec=pltpu.PrefetchScalarGridSpec(
            num_scalar_prefetch=0,
            grid=(N,),                                    # one sample per step
            in_specs=[
                pl.BlockSpec((1, H, W, Cin), lambda n: (n, 0, 0, 0)),
                pl.BlockSpec((Cin, c_), lambda n: (0, 0)),
                pl.BlockSpec((1, c_), lambda n: (0, 0)),
                pl.BlockSpec((4 * c_, cout), lambda n: (0, 0)),
                pl.BlockSpec((1, cout), lambda n: (0, 0)),
            ],
            out_specs=pl.BlockSpec((1, H, W, cout), lambda n: (n, 0, 0, 0)),
        ),
        compiler_params=pltpu.CompilerParams(
            dimension_semantics=("parallel",),            # shard batch on v7x TCs
        ),
    )(x_nhwc, w1, b1, w2, b2)


@functools.partial(jax.jit, static_argnames=("kernel_size",))
def simsppf_forward(x_nchw, params, kernel_size=5):
    x = jnp.transpose(x_nchw, (0, 2, 3, 1))               # NCHW -> NHWC
    out = simsppf_forward_nhwc(x, params, kernel_size=kernel_size)
    return jnp.transpose(out, (0, 3, 1, 2))               # NHWC -> NCHW


# ----------------------------- parameter setup ------------------------------
# TODO(synk): training-mode BatchNorm (running-stat updates) is not modeled;
#             BN is folded in eval mode, matching module.eval() semantics.


def _init_simconv_1x1(key, cin, cout, eps=1e-5):
    k1, k2, k3, k4, k5 = jax.random.split(key, 5)
    w = jax.random.normal(k1, (cin, cout), jnp.float32) / jnp.sqrt(cin)
    gamma = 1.0 + 0.1 * jax.random.normal(k2, (cout,), jnp.float32)
    beta = 0.1 * jax.random.normal(k3, (cout,), jnp.float32)
    mean = 0.05 * jax.random.normal(k4, (cout,), jnp.float32)
    var = 1.0 + 0.1 * jax.random.uniform(k5, (cout,), jnp.float32)
    scale = gamma / jnp.sqrt(var + eps)
    w_folded = (w * scale[None, :]).astype(jnp.bfloat16)   # matmul-ready, MXU dtype
    b_folded = (beta - mean * scale).reshape(1, cout)      # stays f32
    return w_folded, b_folded


def init_simsppf_params(key, in_channels, out_channels):
    c_ = in_channels // 2
    k1, k2 = jax.random.split(key)
    w1, b1 = _init_simconv_1x1(k1, in_channels, c_)        # cv1: Cin -> Cin//2
    w2, b2 = _init_simconv_1x1(k2, 4 * c_, out_channels)   # cv2: 4*c_ -> Cout
    return {"w1": w1, "b1": b1, "w2": w2, "b2": b2}


# ------------------------- pure-JAX reference check --------------------------


def simsppf_reference(x_nchw, params, kernel_size=5):
    x = jnp.transpose(x_nchw, (0, 2, 3, 1))
    w1, b1 = params["w1"], params["b1"]
    w2, b2 = params["w2"], params["b2"]

    a = jnp.einsum("nhwc,cd->nhwd", x.astype(jnp.bfloat16), w1,
                   preferred_element_type=jnp.float32)
    a = jnp.maximum(a + b1[0], 0.0)

    def pool(v):
        return jax.lax.reduce_window(
            v, -jnp.inf, jax.lax.max,
            window_dimensions=(1, kernel_size, kernel_size, 1),
            window_strides=(1, 1, 1, 1), padding="SAME")

    y1 = pool(a)
    y2 = pool(y1)
    y3 = pool(y2)
    cat = jnp.concatenate([a, y1, y2, y3], axis=-1)
    o = jnp.einsum("nhwc,cd->nhwd", cat.astype(jnp.bfloat16), w2,
                   preferred_element_type=jnp.float32)
    o = jnp.maximum(o + b2[0], 0.0)
    return jnp.transpose(o, (0, 3, 1, 2))


if __name__ == "__main__":
    key = jax.random.PRNGKey(0)
    k_x, k_p = jax.random.split(key)

    # c_ = 32, concat = 128 channels (full lane width), H*W = 256 matmul rows.
    N, C, H, W = 2, 64, 16, 16
    Cout = 64
    x = jax.random.normal(k_x, (N, C, H, W), jnp.float32)
    params = init_simsppf_params(k_p, C, Cout)

    out = simsppf_forward(x, params)
    out = jax.block_until_ready(out)
    assert out.shape == (N, Cout, H, W), out.shape
    assert bool(jnp.all(jnp.isfinite(out)))

    ref = simsppf_reference(x, params)
    rel_err = jnp.max(jnp.abs(out - ref)) / (jnp.max(jnp.abs(ref)) + 1e-6)
    assert float(rel_err) < 1e-2, f"mismatch vs reference: rel err {float(rel_err)}"

    print("KERNEL_OK")
</pallas_src>

<mosaic_0001>
module attributes {stable_mosaic.version = 11 : i64} {
  func.func @kernel(%arg0: i32, %arg1: memref<1x16x16x64xf32, #tpu.memory_space<vmem>>, %arg2: memref<64x32xbf16, #tpu.memory_space<vmem>>, %arg3: memref<1x32xf32, #tpu.memory_space<vmem>>, %arg4: memref<128x64xbf16, #tpu.memory_space<vmem>>, %arg5: memref<1x64xf32, #tpu.memory_space<vmem>>, %arg6: memref<1x16x16x64xf32, #tpu.memory_space<vmem>>) attributes {dimension_semantics = [#tpu.dimension_semantics<parallel>], iteration_bounds = array<i64: 2>, scalar_prefetch = 0 : i64, scratch_operands = 0 : i64, tpu.core_type = #tpu.core_type<tc>, window_params = [{transform_indices = @transform_0, window_bounds = array<i64: 1, 16, 16, 64>}, {pipeline_mode = #tpu.pipeline_mode<synchronous>, transform_indices = @transform_1, window_bounds = array<i64: 64, 32>}, {pipeline_mode = #tpu.pipeline_mode<synchronous>, transform_indices = @transform_2, window_bounds = array<i64: 1, 32>}, {pipeline_mode = #tpu.pipeline_mode<synchronous>, transform_indices = @transform_3, window_bounds = array<i64: 128, 64>}, {pipeline_mode = #tpu.pipeline_mode<synchronous>, transform_indices = @transform_4, window_bounds = array<i64: 1, 64>}, {transform_indices = @transform_5, window_bounds = array<i64: 1, 16, 16, 64>}]} {
    %c0 = arith.constant 0 : index
    %c0_0 = arith.constant 0 : index
    %c0_1 = arith.constant 0 : index
    %c0_2 = arith.constant 0 : index
    %0 = vector.load %arg1[%c0, %c0_0, %c0_1, %c0_2] : memref<1x16x16x64xf32, #tpu.memory_space<vmem>>, vector<1x16x16x64xf32>
    %1 = vector.shape_cast %0 : vector<1x16x16x64xf32> to vector<16x16x64xf32>
    %2 = vector.shape_cast %1 : vector<16x16x64xf32> to vector<256x64xf32>
    %3 = arith.truncf %2 : vector<256x64xf32> to vector<256x64xbf16>
    %c0_3 = arith.constant 0 : index
    %c0_4 = arith.constant 0 : index
    %4 = vector.load %arg2[%c0_3, %c0_4] : memref<64x32xbf16, #tpu.memory_space<vmem>>, vector<64x32xbf16>
    %cst = arith.constant dense<0.000000e+00> : vector<256x32xf32>
    %5 = tpu.matmul %3, %4, %cst {dimension_numbers = #tpu.dot_dimension_numbers<[1], [0], [0], [1], [0, 0, 1, 1], [], []>} : vector<256x64xbf16>, vector<64x32xbf16>, vector<256x32xf32> -> vector<256x32xf32>
    %c0_5 = arith.constant 0 : index
    %c0_6 = arith.constant 0 : index
    %6 = vector.load %arg3[%c0_5, %c0_6] : memref<1x32xf32, #tpu.memory_space<vmem>>, vector<1x32xf32>
    %7 = vector.broadcast %6 : vector<1x32xf32> to vector<256x32xf32>
    %8 = arith.addf %5, %7 : vector<256x32xf32>
    %cst_7 = arith.constant 0.000000e+00 : f32
    %9 = vector.broadcast %cst_7 : f32 to vector<256x32xf32>
    %10 = arith.maximumf %8, %9 : vector<256x32xf32>
    %11 = vector.shape_cast %10 : vector<256x32xf32> to vector<16x16x32xf32>
    %cst_8 = arith.constant 0.000000e+00 : f32
    %12 = vector.broadcast %cst_8 : f32 to vector<2x16x32xf32>
    %13 = tpu.concatenate %12, %11, %12 in 0 : vector<2x16x32xf32>, vector<16x16x32xf32>, vector<2x16x32xf32> -> vector<20x16x32xf32>
    %14 = vector.extract_strided_slice %13 {offsets = [0, 0, 0], sizes = [16, 16, 32], strides = [1, 1, 1]} : vector<20x16x32xf32> to vector<16x16x32xf32>
    %15 = vector.extract_strided_slice %13 {offsets = [1, 0, 0], sizes = [16, 16, 32], strides = [1, 1, 1]} : vector<20x16x32xf32> to vector<16x16x32xf32>
    %16 = arith.maximumf %14, %15 : vector<16x16x32xf32>
    %17 = vector.extract_strided_slice %13 {offsets = [2, 0, 0], sizes = [16, 16, 32], strides = [1, 1, 1]} : vector<20x16x32xf32> to vector<16x16x32xf32>
    %18 = arith.maximumf %16, %17 : vector<16x16x32xf32>
    %19 = vector.extract_strided_slice %13 {offsets = [3, 0, 0], sizes = [16, 16, 32], strides = [1, 1, 1]} : vector<20x16x32xf32> to vector<16x16x32xf32>
    %20 = arith.maximumf %18, %19 : vector<16x16x32xf32>
    %21 = vector.extract_strided_slice %13 {offsets = [4, 0, 0], sizes = [16, 16, 32], strides = [1, 1, 1]} : vector<20x16x32xf32> to vector<16x16x32xf32>
    %22 = arith.maximumf %20, %21 : vector<16x16x32xf32>
    %cst_9 = arith.constant 0.000000e+00 : f32
    %23 = vector.broadcast %cst_9 : f32 to vector<16x8x32xf32>
    %24 = tpu.concatenate %23, %22, %23 in 1 : vector<16x8x32xf32>, vector<16x16x32xf32>, vector<16x8x32xf32> -> vector<16x32x32xf32>
    %25 = vector.extract_strided_slice %24 {offsets = [0, 6, 0], sizes = [16, 16, 32], strides = [1, 1, 1]} : vector<16x32x32xf32> to vector<16x16x32xf32>
    %26 = vector.extract_strided_slice %24 {offsets = [0, 7, 0], sizes = [16, 16, 32], strides = [1, 1, 1]} : vector<16x32x32xf32> to vector<16x16x32xf32>
    %27 = arith.maximumf %25, %26 : vector<16x16x32xf32>
    %28 = vector.extract_strided_slice %24 {offsets = [0, 8, 0], sizes = [16, 16, 32], strides = [1, 1, 1]} : vector<16x32x32xf32> to vector<16x16x32xf32>
    %29 = arith.maximumf %27, %28 : vector<16x16x32xf32>
    %30 = vector.extract_strided_slice %24 {offsets = [0, 9, 0], sizes = [16, 16, 32], strides = [1, 1, 1]} : vector<16x32x32xf32> to vector<16x16x32xf32>
    %31 = arith.maximumf %29, %30 : vector<16x16x32xf32>
    %32 = vector.extract_strided_slice %24 {offsets = [0, 10, 0], sizes = [16, 16, 32], strides = [1, 1, 1]} : vector<16x32x32xf32> to vector<16x16x32xf32>
    %33 = arith.maximumf %31, %32 : vector<16x16x32xf32>
    %cst_10 = arith.constant 0.000000e+00 : f32
    %34 = vector.broadcast %cst_10 : f32 to vector<2x16x32xf32>
    %35 = tpu.concatenate %34, %33, %34 in 0 : vector<2x16x32xf32>, vector<16x16x32xf32>, vector<2x16x32xf32> -> vector<20x16x32xf32>
    %36 = vector.extract_strided_slice %35 {offsets = [0, 0, 0], sizes = [16, 16, 32], strides = [1, 1, 1]} : vector<20x16x32xf32> to vector<16x16x32xf32>
    %37 = vector.extract_strided_slice %35 {offsets = [1, 0, 0], sizes = [16, 16, 32], strides = [1, 1, 1]} : vector<20x16x32xf32> to vector<16x16x32xf32>
    %38 = arith.maximumf %36, %37 : vector<16x16x32xf32>
    %39 = vector.extract_strided_slice %35 {offsets = [2, 0, 0], sizes = [16, 16, 32], strides = [1, 1, 1]} : vector<20x16x32xf32> to vector<16x16x32xf32>
    %40 = arith.maximumf %38, %39 : vector<16x16x32xf32>
    %41 = vector.extract_strided_slice %35 {offsets = [3, 0, 0], sizes = [16, 16, 32], strides = [1, 1, 1]} : vector<20x16x32xf32> to vector<16x16x32xf32>
    %42 = arith.maximumf %40, %41 : vector<16x16x32xf32>
    %43 = vector.extract_strided_slice %35 {offsets = [4, 0, 0], sizes = [16, 16, 32], strides = [1, 1, 1]} : vector<20x16x32xf32> to vector<16x16x32xf32>
    %44 = arith.maximumf %42, %43 : vector<16x16x32xf32>
    %cst_11 = arith.constant 0.000000e+00 : f32
    %45 = vector.broadcast %cst_11 : f32 to vector<16x8x32xf32>
    %46 = tpu.concatenate %45, %44, %45 in 1 : vector<16x8x32xf32>, vector<16x16x32xf32>, vector<16x8x32xf32> -> vector<16x32x32xf32>
    %47 = vector.extract_strided_slice %46 {offsets = [0, 6, 0], sizes = [16, 16, 32], strides = [1, 1, 1]} : vector<16x32x32xf32> to vector<16x16x32xf32>
    %48 = vector.extract_strided_slice %46 {offsets = [0, 7, 0], sizes = [16, 16, 32], strides = [1, 1, 1]} : vector<16x32x32xf32> to vector<16x16x32xf32>
    %49 = arith.maximumf %47, %48 : vector<16x16x32xf32>
    %50 = vector.extract_strided_slice %46 {offsets = [0, 8, 0], sizes = [16, 16, 32], strides = [1, 1, 1]} : vector<16x32x32xf32> to vector<16x16x32xf32>
    %51 = arith.maximumf %49, %50 : vector<16x16x32xf32>
    %52 = vector.extract_strided_slice %46 {offsets = [0, 9, 0], sizes = [16, 16, 32], strides = [1, 1, 1]} : vector<16x32x32xf32> to vector<16x16x32xf32>
    %53 = arith.maximumf %51, %52 : vector<16x16x32xf32>
    %54 = vector.extract_strided_slice %46 {offsets = [0, 10, 0], sizes = [16, 16, 32], strides = [1, 1, 1]} : vector<16x32x32xf32> to vector<16x16x32xf32>
    %55 = arith.maximumf %53, %54 : vector<16x16x32xf32>
    %cst_12 = arith.constant 0.000000e+00 : f32
    %56 = vector.broadcast %cst_12 : f32 to vector<2x16x32xf32>
    %57 = tpu.concatenate %56, %55, %56 in 0 : vector<2x16x32xf32>, vector<16x16x32xf32>, vector<2x16x32xf32> -> vector<20x16x32xf32>
    %58 = vector.extract_strided_slice %57 {offsets = [0, 0, 0], sizes = [16, 16, 32], strides = [1, 1, 1]} : vector<20x16x32xf32> to vector<16x16x32xf32>
    %59 = vector.extract_strided_slice %57 {offsets = [1, 0, 0], sizes = [16, 16, 32], strides = [1, 1, 1]} : vector<20x16x32xf32> to vector<16x16x32xf32>
    %60 = arith.maximumf %58, %59 : vector<16x16x32xf32>
    %61 = vector.extract_strided_slice %57 {offsets = [2, 0, 0], sizes = [16, 16, 32], strides = [1, 1, 1]} : vector<20x16x32xf32> to vector<16x16x32xf32>
    %62 = arith.maximumf %60, %61 : vector<16x16x32xf32>
    %63 = vector.extract_strided_slice %57 {offsets = [3, 0, 0], sizes = [16, 16, 32], strides = [1, 1, 1]} : vector<20x16x32xf32> to vector<16x16x32xf32>
    %64 = arith.maximumf %62, %63 : vector<16x16x32xf32>
    %65 = vector.extract_strided_slice %57 {offsets = [4, 0, 0], sizes = [16, 16, 32], strides = [1, 1, 1]} : vector<20x16x32xf32> to vector<16x16x32xf32>
    %66 = arith.maximumf %64, %65 : vector<16x16x32xf32>
    %cst_13 = arith.constant 0.000000e+00 : f32
    %67 = vector.broadcast %cst_13 : f32 to vector<16x8x32xf32>
    %68 = tpu.concatenate %67, %66, %67 in 1 : vector<16x8x32xf32>, vector<16x16x32xf32>, vector<16x8x32xf32> -> vector<16x32x32xf32>
    %69 = vector.extract_strided_slice %68 {offsets = [0, 6, 0], sizes = [16, 16, 32], strides = [1, 1, 1]} : vector<16x32x32xf32> to vector<16x16x32xf32>
    %70 = vector.extract_strided_slice %68 {offsets = [0, 7, 0], sizes = [16, 16, 32], strides = [1, 1, 1]} : vector<16x32x32xf32> to vector<16x16x32xf32>
    %71 = arith.maximumf %69, %70 : vector<16x16x32xf32>
    %72 = vector.extract_strided_slice %68 {offsets = [0, 8, 0], sizes = [16, 16, 32], strides = [1, 1, 1]} : vector<16x32x32xf32> to vector<16x16x32xf32>
    %73 = arith.maximumf %71, %72 : vector<16x16x32xf32>
    %74 = vector.extract_strided_slice %68 {offsets = [0, 9, 0], sizes = [16, 16, 32], strides = [1, 1, 1]} : vector<16x32x32xf32> to vector<16x16x32xf32>
    %75 = arith.maximumf %73, %74 : vector<16x16x32xf32>
    %76 = vector.extract_strided_slice %68 {offsets = [0, 10, 0], sizes = [16, 16, 32], strides = [1, 1, 1]} : vector<16x32x32xf32> to vector<16x16x32xf32>
    %77 = arith.maximumf %75, %76 : vector<16x16x32xf32>
    %78 = tpu.concatenate %11, %33, %55, %77 in 2 : vector<16x16x32xf32>, vector<16x16x32xf32>, vector<16x16x32xf32>, vector<16x16x32xf32> -> vector<16x16x128xf32>
    %79 = vector.shape_cast %78 : vector<16x16x128xf32> to vector<256x128xf32>
    %80 = arith.truncf %79 : vector<256x128xf32> to vector<256x128xbf16>
    %c0_14 = arith.constant 0 : index
    %c0_15 = arith.constant 0 : index
    %81 = vector.load %arg4[%c0_14, %c0_15] : memref<128x64xbf16, #tpu.memory_space<vmem>>, vector<128x64xbf16>
    %cst_16 = arith.constant dense<0.000000e+00> : vector<256x64xf32>
    %82 = tpu.matmul %80, %81, %cst_16 {dimension_numbers = #tpu.dot_dimension_numbers<[1], [0], [0], [1], [0, 0, 1, 1], [], []>} : vector<256x128xbf16>, vector<128x64xbf16>, vector<256x64xf32> -> vector<256x64xf32>
    %c0_17 = arith.constant 0 : index
    %c0_18 = arith.constant 0 : index
    %83 = vector.load %arg5[%c0_17, %c0_18] : memref<1x64xf32, #tpu.memory_space<vmem>>, vector<1x64xf32>
    %84 = vector.broadcast %83 : vector<1x64xf32> to vector<256x64xf32>
    %85 = arith.addf %82, %84 : vector<256x64xf32>
    %cst_19 = arith.constant 0.000000e+00 : f32
    %86 = vector.broadcast %cst_19 : f32 to vector<256x64xf32>
    %87 = arith.maximumf %85, %86 : vector<256x64xf32>
    %88 = vector.shape_cast %87 : vector<256x64xf32> to vector<16x16x64xf32>
    %c0_20 = arith.constant 0 : index
    %c0_21 = arith.constant 0 : index
    %c0_22 = arith.constant 0 : index
    %c0_23 = arith.constant 0 : index
    %89 = vector.load %arg6[%c0_20, %c0_21, %c0_22, %c0_23] : memref<1x16x16x64xf32, #tpu.memory_space<vmem>>, vector<1x16x16x64xf32>
    %90 = vector.shape_cast %89 : vector<1x16x16x64xf32> to vector<16x16x64xf32>
    %91 = vector.shape_cast %88 : vector<16x16x64xf32> to vector<1x16x16x64xf32>
    tpu.vector_store %arg6[%c0_20, %c0_21, %c0_22, %c0_23], %91 {strides = array<i32>} : memref<1x16x16x64xf32, #tpu.memory_space<vmem>>, vector<1x16x16x64xf32>,
    return
  }
  func.func @transform_0(%arg0: i32) -> (i32, i32, i32, i32) {
    %c0_i32 = arith.constant 0 : i32
    %c0_i32_0 = arith.constant 0 : i32
    %c0_i32_1 = arith.constant 0 : i32
    %c0_i32_2 = arith.constant 0 : i32
    return %arg0, %c0_i32, %c0_i32_0, %c0_i32_1 : i32, i32, i32, i32
  }
  func.func @transform_1(%arg0: i32) -> (i32, i32) {
    %c0_i32 = arith.constant 0 : i32
    %c0_i32_0 = arith.constant 0 : i32
    %c0_i32_1 = arith.constant 0 : i32
    return %c0_i32, %c0_i32_0 : i32, i32
  }
  func.func @transform_2(%arg0: i32) -> (i32, i32) {
    %c0_i32 = arith.constant 0 : i32
    %c0_i32_0 = arith.constant 0 : i32
    %c0_i32_1 = arith.constant 0 : i32
    return %c0_i32, %c0_i32_0 : i32, i32
  }
  func.func @transform_3(%arg0: i32) -> (i32, i32) {
    %c0_i32 = arith.constant 0 : i32
    %c0_i32_0 = arith.constant 0 : i32
    %c0_i32_1 = arith.constant 0 : i32
    return %c0_i32, %c0_i32_0 : i32, i32
  }
  func.func @transform_4(%arg0: i32) -> (i32, i32) {
    %c0_i32 = arith.constant 0 : i32
    %c0_i32_0 = arith.constant 0 : i32
    %c0_i32_1 = arith.constant 0 : i32
    return %c0_i32, %c0_i32_0 : i32, i32
  }
  func.func @transform_5(%arg0: i32) -> (i32, i32, i32, i32) {
    %c0_i32 = arith.constant 0 : i32
    %c0_i32_0 = arith.constant 0 : i32
    %c0_i32_1 = arith.constant 0 : i32
    %c0_i32_2 = arith.constant 0 : i32
    return %arg0, %c0_i32, %c0_i32_0, %c0_i32_1 : i32, i32, i32, i32
  }
}

</mosaic_0001>

<bundles_post_ra>
// kernel: simsppf_forward.1
= control target key start
LH: loop header
LB: loop body
LE: loop exit
PB: predicated region body
PF: predicated region fallthrough
CT: control target
= control target key end

     0   :  { %10 = vsyncpa [#allocation3], 0  ;;  %s7843_s0 = inlined_call_operand.hbm [shape: f32[2,16,16,64], index: 0, kind: input, shape index: {}]   ;;  %s7844_s1 = inlined_call_operand.vmem [shape: bf16[64,32], index: 1, kind: input, shape index: {}]   ;;  %s7845_s2 = inlined_call_operand.vmem [shape: f32[1,32], index: 2, kind: input, shape index: {}]   ;;  %s7846_s3 = inlined_call_operand.vmem [shape: bf16[128,64], index: 3, kind: input, shape index: {}]   ;;  %s7847_s4 = inlined_call_operand.vmem [shape: f32[1,64], index: 4, kind: input, shape index: {}]   ;;  %s7848_s5 = inlined_call_operand.hbm [shape: f32[2,16,16,64], index: 5, kind: output, shape index: {}]  }
   0x1   :  { %12 = vsyncpa [#allocation3 + $0x1], 0 }
   0x2   :  { %13 = vsyncpa [#allocation4], 0 }
   0x3   :  { %15 = vsyncpa [#allocation4 + $0x1], 0  ;;  %s4777_s18 = smov 0   ;;  %s4779_s19 = smov 0  }
   0x4   :  { %s4781_s20 = smov 0   ;;  %s4783_s21 = smov 0  }
   0x5 LB: > { %s4798_s22 = sadd.s32 4294967295, %s4735_s21   ;;  %s4143_s23 = sadd.s32 4294967294, %s4735_s21   ;;  %s4735_s21 = sphi %s4783_s21, %s8129_s21   ;;  %s4731_s20 = sphi %s4781_s20, %s8128_s20   ;;  %s4727_s19 = sphi %s4779_s19, %s8127_s19   ;;  %s4723_s18 = sphi %s4777_s18, %s8126_s18  }
   0x6   : > { %s4802_s24 = sadd.s32 1, %s4735_s21   ;;  %s28_s25 = sadd.s32 1, %s4731_s20 }
   0x7   : > { %s25_s26 = ssub.s32 %s4735_s21, %s4802_s24  ;;  %p35_p0 = scmp.ne.s32.totalorder %s4731_s20, %s4727_s19 }
   0x8   : > { %p26_p1 = scmp.eq.s32.totalorder %s25_s26, 0  ;;  %p36_p2 = scmp.eq.s32.totalorder %s4735_s21, 0 }
   0x9   : > { %p41_p3 = scmp.ne.s32.totalorder %s4727_s19, %s4723_s18  ;;  %p42_p4 = scmp.eq.s32.totalorder %s4798_s22, 0 }
   0xa   : > { %s4814_s27 = scalar_select %p26_p1, %s4731_s20, %s28_s25  }
   0xb   : > { %p4816_p5 = por %p36_p2, %p35_p0  ;;  %p4820_p6 = por %p42_p4, %p41_p3 }
   0xc   : > { %p149_p7 = scmp.eq.s32.totalorder %s4798_s22, 1  ;;  %p155_p8 = scmp.eq.s32.totalorder %s4143_s23, 1 }
   0xd   : > { %s7918_s29 = scalar_select %p4820_p6, 1, 0 }
   0xe   : > { %p4349_p10 = scmp.lt.s32.totalorder %s4735_s21, 2  ;;  %p4827_p11 = por %p149_p7, %p35_p0 }
   0xf   : > { %p4831_p12 = por %p155_p8, %p41_p3  ;;  %s187_s7 = sand.u32 1, %s4731_s20  }
  0x10   : > { %s7919_s30 = scalar_select %p4827_p11, 1, 0 }
  0x11   : > { %s7920_s6 = scalar_select %p4831_p12, 1, 0 }
  0x12   : > { %s4187_s8 = sshll.u32 %s4735_s21, 12  ;;  %s4146_s9 = sshll.u32 %s187_s7, 8 }
  0x13   : > { %s4840_s12 = scalar_lea.hbm %s7843_s0, %s4187_s8  ;;  %s191_s13 = scalar_lea.vmem [#allocation2], %s4146_s9 }
  0x14   : > { %s198_s14 = sshll.u32 %s191_s13, 4  ;;  %p4844_p13 = pnand %p4349_p10, %p4816_p5  ;;  %s4848_s14 = int_to_ptr.vmem [resolvable:$true] %s198_s14 }
  0x15   : > { %s4850_s16 = scalar_lea.sflag [#allocation3], %s187_s7  ;;  %s4643_s17 = scalar_lea.hbm %s4840_s12, 4096 }
  0x16   : > { %p4644_p0 = scmp.ne.s32.totalorder %s4840_s12, %s4643_s17  ;;  %p4645_p1 = pneg %p4844_p13 }
  0x17   : > { %s4648_s26 = scalar_lea.hbm %s7843_s0, 8192  ;;  %p4649_p4 = scmp.lt.s32.totalorder %s4840_s12, %s7843_s0 }
  0x18   : > { %p4646_p2 = pnand %p4645_p1, %p4644_p0  ;;  %p4650_p5 = scmp.lt.s32.totalorder %s4648_s26, %s4643_s17 }
  0x1a   : > { %p4647_p3 = pneg %p4646_p2  ;;  %p4651_p7 = por %p4650_p5, %p4649_p4 }
  0x1c   : > { %p4652_p8 = pnand %p4651_p7, %p4647_p3 }
  0x1e   : > { %4655 = shalt.err (!%p4652_p8)
}
  0x1f   : > { %s4656_s7 = scalar_lea.vmem %s4848_s14, 4096  ;;  %s4737_s9 = smov [#allocation2]  }
  0x20   : > { %p4657_p10 = scmp.ne.s32.totalorder %s4848_s14, %s4656_s7  ;;  %s4661_s10 = sshll.u32 %s4737_s9, 4  ;;  %s4662_s10 = int_to_ptr.vmem [resolvable:$false] %s4661_s10 }
  0x21   : > { %s4663_s11 = scalar_lea.vmem %s4662_s10, 8192  ;;  %p4664_p2 = scmp.lt.s32.totalorder %s4848_s14, %s4662_s10 }
  0x22   : > { %p4659_p9 = pnand %p4657_p10, %p4645_p1  ;;  %p4665_p12 = scmp.lt.s32.totalorder %s4663_s11, %s4656_s7 }
  0x24   : > { %p4660_p0 = pneg %p4659_p9  ;;  %p4666_p11 = por %p4665_p12, %p4664_p2 }
  0x26   : > { %p4667_p6 = pnand %p4666_p11, %p4660_p0 }
  0x28   : > { %4670 = shalt.err (!%p4667_p6)
}
  0x29   : > { %s4738_s13 = smov 128   ;;  %s4739_s17 = smov 8  }
  0x2a   : > { %4344 = dma.hbm_to_vmem [thread:$0]  (!%p4844_p13), %s4840_s12, 4096, %s4848_s14, %s4850_s16, %s4738_s13, %s4738_s13, %s4739_s17  }
  0x2b   : > { %p4149_p9 = scmp.ge.s32.totalorder %s4735_s21, 1  ;;  %p206_p1 = scmp.lt.s32.totalorder %s4735_s21, 3 }
  0x2d   : > { %p207_p3 = pnand %p4149_p9, %p206_p1 }
  0x2f   : > { %210 = sbr.rel (%p207_p3) target bundleno = 1128 (0x468), region = 40 }
  0x34   : > { %s4874_s23 = sand.u32 1, %s4727_s19   ;;  %p7922_p6 = scmp.ne.s32.totalorder %s7918_s29, 0 }
  0x35   : > { %s4150_s25 = sshll.u32 %s4874_s23, 8  ;;  %s213_s26 = scalar_lea.sflag [#allocation3], %s4874_s23 }
  0x36   : > { %s4880_s28 = scalar_lea.vmem [#allocation2], %s4150_s25 }
  0x37   : > { %4714 = dma.done.wait (%p7922_p6), %s213_s26, 4096  }
  0x38   : > { %4716 = vsyncadd (%p7922_p6), %s213_s26, 4294963200  ;;  %v4631_v0 = vld [vmem:[%s7844_s1 + $0x18] sm:$0xff]   ;;  %v4632_v1 = vld [vmem:[%s7844_s1 + $0x10] sm:$0xff]   ;;  %vm331_vm0 = vcmask 523264   ;;  %vm726_vm1 = vcmask 1046528   ;;  %vm888_vm2 = vcmask 1045504  }
  0x39   : > { %4233 = vmatprep.subr.bf16.mxu0 %v4631_v0  ;;  %v4633_v2 = vld [vmem:[%s7844_s1 + $0x8] sm:$0xff]   ;;  %v244_v3 = vld [vmem:[%s4880_s28] sm:$0xff]  ;;  %v246_v7 = vld [vmem:[%s4880_s28 + $0x10] sm:$0xff]  ;;  %vm1033_vm3 = vcmask 1044480   ;;  %vm1195_vm4 = vcmask 1043456   ;;  %vm1405_vm5 = vcmask 1041408  }
  0x3a   : > { %4234 = vmatpush3.bf16.msra.mxu0 %v4631_v0  ;;  %v245_v4 = vld [vmem:[%s4880_s28 + $0x8] sm:$0xff]  ;;  %v4634_v6 = vld [vmem:[%s7844_s1] sm:$0xff]   ;;  %v247_v8 = vld [vmem:[%s4880_s28 + $0x18] sm:$0xff]  ;;  %s4741_s13 = smov 32   ;;  %s4742_s17 = smov 64   ;;  %vm3646_vm6 = vcmask 261120  }
  0x3b   : > { %4235 = vmatprep.subr.bf16.mxu0 %v4632_v1  ;;  %v276_v5 = vpack.c.bf16 %v245_v4, %v244_v3  ;;  %v248_v9 = vld [vmem:[%s4880_s28 + $0x20] sm:$0xff]  ;;  %v249_v10 = vld [vmem:[%s4880_s28 + $0x28] sm:$0xff]  ;;  %v277_v11 = vpack.c.bf16 %v247_v8, %v246_v7  ;;  %v250_v13 = vld [vmem:[%s4880_s28 + $0x30] sm:$0xff]  ;;  %v4740_v8 = vmov 0.0   ;;  %s4743_s26 = smov 96   ;;  %vm3711_vm7 = vcmask 785408  }
  0x3c   : > { %v278_v12 = vpack.c.bf16 %v249_v10, %v248_v9  ;;  %v251_v14 = vld [vmem:[%s4880_s28 + $0x38] sm:$0xff]  ;;  %v252_v15 = vld [vmem:[%s4880_s28 + $0x40] sm:$0xff]  ;;  %v253_v16 = vld [vmem:[%s4880_s28 + $0x48] sm:$0xff]  ;;  %v4967_v9 = vrot.slane %v4740_v8, 1  ;;  %p8123_p12 = scmp.ne.s32.totalorder %s7919_s30, 0  ;;  %s4744_s11 = smov [#allocation5]  }
  0x3d   : > { %4241 = vmatprep.mubr.msk.bf16.mxu0 %vm331_vm0, %v276_v5  ;;  %v279_v17 = vpack.c.bf16 %v251_v14, %v250_v13  ;;  %v280_v18 = vpack.c.bf16 %v253_v16, %v252_v15  ;;  %v254_v19 = vld [vmem:[%s4880_s28 + $0x50] sm:$0xff]  ;;  %v255_v20 = vld [vmem:[%s4880_s28 + $0x58] sm:$0xff]  ;;  %v256_v21 = vld [vmem:[%s4880_s28 + $0x60] sm:$0xff]  ;;  %v4977_v16 = vrot.slane %v4740_v8, 3 }
  0x3e   : > { %4236 = vmatpush3.bf16.msra.mxu0 %v4632_v1  ;;  %v257_v22 = vld [vmem:[%s4880_s28 + $0x68] sm:$0xff]  ;;  %v281_v23 = vpack.c.bf16 %v255_v20, %v254_v19  ;;  %v258_v25 = vld [vmem:[%s4880_s28 + $0x70] sm:$0xff]  ;;  %v259_v26 = vld [vmem:[%s4880_s28 + $0x78] sm:$0xff] }
  0x3f   : > { %4237 = vmatprep.subr.bf16.mxu0 %v4633_v2  ;;  %v282_v24 = vpack.c.bf16 %v257_v22, %v256_v21  ;;  %v260_v27 = vld [vmem:[%s4880_s28 + $0x80] sm:$0xff]  ;;  %v261_v28 = vld [vmem:[%s4880_s28 + $0x88] sm:$0xff]  ;;  %v283_v29 = vpack.c.bf16 %v259_v26, %v258_v25  ;;  %v262_v31 = vld [vmem:[%s4880_s28 + $0x90] sm:$0xff] }
  0x40   : > { %v284_v30 = vpack.c.bf16 %v261_v28, %v260_v27  ;;  %v263_v32 = vld [vmem:[%s4880_s28 + $0x98] sm:$0xff]  ;;  %v264_v33 = vld [vmem:[%s4880_s28 + $0xa0] sm:$0xff]  ;;  %v265_v34 = vld [vmem:[%s4880_s28 + $0xa8] sm:$0xff] }
  0x41   : > { %v285_v35 = vpack.c.bf16 %v263_v32, %v262_v31  ;;  %v286_v36 = vpack.c.bf16 %v265_v34, %v264_v33  ;;  %v266_v37 = vld [vmem:[%s4880_s28 + $0xb0] sm:$0xff]  ;;  %v267_v38 = vld [vmem:[%s4880_s28 + $0xb8] sm:$0xff]  ;;  %v268_v39 = vld [vmem:[%s4880_s28 + $0xc0] sm:$0xff] }
  0x42   : > { %4238 = vmatpush3.bf16.msra.mxu0 %v4633_v2  ;;  %v269_v40 = vld [vmem:[%s4880_s28 + $0xc8] sm:$0xff]  ;;  %v287_v41 = vpack.c.bf16 %v267_v38, %v266_v37  ;;  %v270_v43 = vld [vmem:[%s4880_s28 + $0xd0] sm:$0xff]  ;;  %v271_v44 = vld [vmem:[%s4880_s28 + $0xd8] sm:$0xff] }
  0x43   : > { %4239 = vmatprep.subr.bf16.mxu0 %v4634_v6  ;;  %v288_v42 = vpack.c.bf16 %v269_v40, %v268_v39  ;;  %v272_v45 = vld [vmem:[%s4880_s28 + $0xe0] sm:$0xff]  ;;  %v273_v46 = vld [vmem:[%s4880_s28 + $0xe8] sm:$0xff]  ;;  %v289_v47 = vpack.c.bf16 %v271_v44, %v270_v43  ;;  %v274_v49 = vld [vmem:[%s4880_s28 + $0xf0] sm:$0xff] }
  0x44   : > { %v290_v48 = vpack.c.bf16 %v273_v46, %v272_v45  ;;  %v275_v50 = vld [vmem:[%s4880_s28 + $0xf8] sm:$0xff]  ;;  %v4949_v53 = vld [vmem:[%s7845_s2] ss:$0 sm:$0xff]  ;;  %s4675_s28 = sshll.u32 %s4744_s11, 4  ;;  %s4676_s28 = int_to_ptr.vmem [resolvable:$false] %s4675_s28 }
  0x45   : > { %v291_v51 = vpack.c.bf16 %v275_v50, %v274_v49  ;;  %s4677_s12 = scalar_lea.vmem %s4676_s28, 8192 }
  0x46   : > { %4240 = vmatpush3.bf16.msra.mxu0 %v4634_v6 }
  0x49   : > { %4242 = vmatmul.mubr.msk.bf16.vlgmr.msra.gmra.mxu0 %vm331_vm0, %v277_v11 }
  0x4a   : > { %4245 = vmatprep.mubr.msk.bf16.mxu0 %vm331_vm0, %v278_v12 }
  0x51   : > { %4246 = vmatmul.mubr.msk.bf16.gmra.mxu0 %vm331_vm0, %v279_v17  ;;  %v4979_v17 = vrot.slane %v4740_v8, 4 }
  0x52   : > { %4249 = vmatprep.mubr.msk.bf16.mxu0 %vm331_vm0, %v280_v18 }
  0x59   : > { %4250 = vmatmul.mubr.msk.bf16.gmra.mxu0 %vm331_vm0, %v281_v23 }
  0x5a   : > { %4253 = vmatprep.mubr.msk.bf16.mxu0 %vm331_vm0, %v282_v24 }
  0x61   : > { %4254 = vmatmul.mubr.msk.bf16.gmra.mxu0 %vm331_vm0, %v283_v29 }
  0x62   : > { %4257 = vmatprep.mubr.msk.bf16.mxu0 %vm331_vm0, %v284_v30 }
  0x69   : > { %4258 = vmatmul.mubr.msk.bf16.gmra.mxu0 %vm331_vm0, %v285_v35 }
  0x6a   : > { %4261 = vmatprep.mubr.msk.bf16.mxu0 %vm331_vm0, %v286_v36 }
  0x71   : > { %4262 = vmatmul.mubr.msk.bf16.gmra.mxu0 %vm331_vm0, %v287_v41 }
  0x72   : > { %4265 = vmatprep.mubr.msk.bf16.mxu0 %vm331_vm0, %v288_v42 }
  0x79   : > { %4266 = vmatmul.mubr.msk.bf16.gmra.mxu0 %vm331_vm0, %v289_v47 }
  0x7a   : > { %4269 = vmatprep.mubr.msk.bf16.mxu0 %vm331_vm0, %v290_v48 }
  0x81   : > { %4270 = vmatmul.mubr.msk.bf16.gmra.mxu0 %vm331_vm0, %v291_v51 }
 0x109   : > { %v4243_v52 = vpop.f32.mrf.mxu0 }
 0x10a   : > { %v423_v58 = vadd.f32 %v4243_v52, %v4949_v53 }
 0x10b   : > { %v414_v54 = vpop.f32.mrf.mxu0 }
 0x10c   : > { %v415_v55 = vadd.f32 %v4949_v53, %v414_v54  ;;  %v4960_v1 = vmax.f32 %v423_v58, 0.0 }
 0x10d   : > { %v4244_v56 = vpop.f32.mrf.mxu0 }
 0x10e   : > { %v4952_v57 = vmax.f32 %v415_v55, 0.0  ;;  %v426_v63 = vadd.f32 %v4244_v56, %v4949_v53  ;;  %7925 = vst [vmem:[#allocation10_spill] sm:$0xff] %v4960_v1 }
 0x10f   : > { %v417_v59 = vpop.f32.mrf.mxu0 }
 0x110   : > { %7923 = vst [vmem:[#allocation8_spill] sm:$0xff] %v4952_v57  ;;  %v418_v60 = vadd.f32 %v4949_v53, %v417_v59  ;;  %v573_v62 = vmax.f32 %v4952_v57, 0.0  ;;  %v575_v5 = vmax.f32 %v4952_v57, %v4960_v1  ;;  %v4970_v11 = vmax.f32 %v426_v63, 0.0 }
 0x111   : > { %v4247_v61 = vpop.f32.mrf.mxu0 }
 0x112   : > { %v4958_v0 = vmax.f32 %v418_v60, 0.0  ;;  %v439_v2 = vadd.f32 %v4247_v61, %v4949_v53  ;;  %v603_v10 = vmax.f32 %v573_v62, %v4960_v1  ;;  %7926 = vst [vmem:[#allocation11_spill] sm:$0xff] %v4970_v11 }
 0x113   : > { %v430_v3 = vpop.f32.mrf.mxu0 }
 0x114   : > { %7924 = vst [vmem:[#allocation9_spill] sm:$0xff] %v4958_v0  ;;  %v431_v4 = vadd.f32 %v4949_v53, %v430_v3  ;;  %v574_v6 = vmax.f32 %v4958_v0, 0.0  ;;  %v4975_v14 = vmax.f32 %v439_v2, 0.0  ;;  %v576_v18 = vmax.f32 %v4958_v0, %v4970_v11 }
 0x115   : > { %v4248_v7 = vpop.f32.mrf.mxu0 }
 0x116   : > { %v4972_v12 = vmax.f32 %v431_v4, 0.0  ;;  %v442_v13 = vadd.f32 %v4248_v7, %v4949_v53  ;;  %7928 = vst [vmem:[#allocation13_spill] sm:$0xff] %v4975_v14  ;;  %v604_v22 = vmax.f32 %v574_v6, %v4970_v11 }
 0x117   : > { %v433_v15 = vpop.f32.mrf.mxu0 }
 0x118   : > { %7927 = vst [vmem:[#allocation12_spill] sm:$0xff] %v4972_v12  ;;  %v577_v19 = vmax.f32 %v4960_v1, %v4972_v12  ;;  %v605_v20 = vmax.f32 %v575_v5, %v4972_v12  ;;  %v4987_v21 = vmax.f32 %v603_v10, %v4972_v12  ;;  %v579_v23 = vmax.f32 %v4972_v12, %v4975_v14 }
 0x119   : > { %v4992_v24 = vmax.f32 %v442_v13, 0.0  ;;  %v434_v25 = vadd.f32 %v4949_v53, %v433_v15  ;;  %v4251_v26 = vpop.f32.mrf.mxu0 }
 0x11a   : > { %v607_v27 = vmax.f32 %v577_v19, %v4975_v14  ;;  %v635_v28 = vmax.f32 %v605_v20, %v4975_v14  ;;  %v4999_v29 = vmax.f32 %v4987_v21, %v4975_v14  ;;  %v7853_v30 = vrot.slane %v4987_v21, 1 }
 0x11b   : > { %7929 = vst [vmem:[#allocation14_spill] sm:$0xff] %v4992_v24  ;;  %v5002_v31 = vmax.f32 %v434_v25, 0.0  ;;  %v455_v32 = vadd.f32 %v4251_v26, %v4949_v53  ;;  %v446_v33 = vpop.f32.mrf.mxu0 }
 0x11c   : > { %v447_v36 = vadd.f32 %v4949_v53, %v446_v33  ;;  %v5012_v37 = vsel %vm726_vm1, %v4967_v9, %v7853_v30  ;;  %v7851_v38 = vrot.slane %v4999_v29, 1 }
 0x11d   : > { %7930 = vst [vmem:[#allocation15_spill] sm:$0xff] %v5002_v31  ;;  %v578_v40 = vmax.f32 %v4970_v11, %v5002_v31  ;;  %v580_v41 = vmax.f32 %v5002_v31, %v4992_v24  ;;  %v606_v42 = vmax.f32 %v576_v18, %v5002_v31  ;;  %v5022_v43 = vmax.f32 %v604_v22, %v5002_v31  ;;  %v4252_v44 = vpop.f32.mrf.mxu0 }
 0x11e   : > { %v5024_v45 = vmax.f32 %v455_v32, 0.0  ;;  %v5026_v46 = vmax.f32 %v447_v36, 0.0  ;;  %v458_v47 = vadd.f32 %v4252_v44, %v4949_v53  ;;  %v5033_v48 = vsel %vm726_vm1, %v4967_v9, %v7851_v38 }
 0x11f   : > { %v608_v49 = vmax.f32 %v578_v40, %v4992_v24  ;;  %v636_v50 = vmax.f32 %v606_v42, %v4992_v24  ;;  %v5039_v51 = vmax.f32 %v5022_v43, %v4992_v24  ;;  %v449_v52 = vpop.f32.mrf.mxu0  ;;  %v7855_v54 = vrot.slane %v5022_v43, 1 }
 0x120   : > { %7931 = vst [vmem:[#allocation16_spill] sm:$0xff] %v5024_v45  ;;  %7932 = vst [vmem:[#allocation17_spill] sm:$0xff] %v5026_v46  ;;  %v581_v55 = vmax.f32 %v4975_v14, %v5026_v46  ;;  %v583_v56 = vmax.f32 %v5026_v46, %v5024_v45  ;;  %v609_v58 = vmax.f32 %v579_v23, %v5026_v46  ;;  %v5051_v61 = vmax.f32 %v458_v47, 0.0 }
 0x121   : > { %v637_v59 = vmax.f32 %v607_v27, %v5026_v46  ;;  %v5049_v60 = vmax.f32 %v635_v28, %v5026_v46  ;;  %v450_v62 = vadd.f32 %v4949_v53, %v449_v52  ;;  %v4255_v63 = vpop.f32.mrf.mxu0  ;;  %v7852_v2 = vrot.slane %v5039_v51, 1 }
 0x122   : > { %7933 = vst [vmem:[#allocation18_spill] sm:$0xff] %v5051_v61  ;;  %v471_v4 = vadd.f32 %v4255_v63, %v4949_v53  ;;  %v611_v5 = vmax.f32 %v581_v55, %v5024_v45  ;;  %v639_v6 = vmax.f32 %v609_v58, %v5024_v45  ;;  %v842_v13 = vmax.f32 %v5022_v43, %v7855_v54 }
 0x123   : > { %v5056_v3 = vmax.f32 %v637_v59, %v5024_v45  ;;  %v5061_v7 = vmax.f32 %v450_v62, 0.0  ;;  %v462_v8 = vpop.f32.mrf.mxu0  ;;  %v736_v10 = vrot.slane %v5049_v60, 1  ;;  %v5070_v15 = vmax.f32 %v5039_v51, %v7852_v2 }
 0x124   : > { %v5072_v18 = vmax.f32 %v471_v4, 0.0  ;;  %v463_v19 = vadd.f32 %v4949_v53, %v462_v8  ;;  %v7854_v20 = vrot.slane %v5022_v43, 2  ;;  %v7859_v22 = vrot.slane %v5039_v51, 2 }
 0x125   : > { %7934 = vst [vmem:[#allocation19_spill] sm:$0xff] %v5061_v7  ;;  %v582_v23 = vmax.f32 %v4992_v24, %v5061_v7  ;;  %v584_v25 = vmax.f32 %v5061_v7, %v5051_v61  ;;  %v610_v26 = vmax.f32 %v580_v41, %v5061_v7  ;;  %v638_v27 = vmax.f32 %v608_v49, %v5061_v7  ;;  %v4256_v28 = vpop.f32.mrf.mxu0 }
 0x126   : > { %7935 = vst [vmem:[#allocation20_spill] sm:$0xff] %v5072_v18  ;;  %v5084_v32 = vmax.f32 %v636_v50, %v5061_v7  ;;  %v5086_v33 = vmax.f32 %v463_v19, 0.0  ;;  %v474_v36 = vadd.f32 %v4256_v28, %v4949_v53  ;;  %v737_v40 = vsel %vm726_vm1, %v4967_v9, %v736_v10 }
 0x127   : > { %v5092_v42 = vmax.f32 %v638_v27, %v5051_v61  ;;  %v465_v44 = vpop.f32.mrf.mxu0  ;;  %v612_v41 = vmax.f32 %v582_v23, %v5051_v61  ;;  %v640_v47 = vmax.f32 %v610_v26, %v5051_v61  ;;  %v846_v49 = vmax.f32 %v737_v40, 0.0 }
 0x128   : > { %7936 = vst [vmem:[#allocation21_spill] sm:$0xff] %v5086_v33  ;;  %v585_v50 = vmax.f32 %v5024_v45, %v5086_v33  ;;  %v587_v52 = vmax.f32 %v5086_v33, %v5072_v18  ;;  %v613_v55 = vmax.f32 %v583_v56, %v5086_v33  ;;  %v641_v58 = vmax.f32 %v611_v5, %v5086_v33 }
 0x129   : > { %v5103_v59 = vmax.f32 %v639_v6, %v5086_v33  ;;  %v5105_v62 = vmax.f32 %v474_v36, 0.0  ;;  %v466_v63 = vadd.f32 %v4949_v53, %v465_v44  ;;  %v4259_v4 = vpop.f32.mrf.mxu0  ;;  %v738_v8 = vrot.slane %v5084_v32, 1 }
 0x12a   : > { %v5110_v19 = vmax.f32 %v641_v58, %v5072_v18  ;;  %v487_v23 = vadd.f32 %v4259_v4, %v4949_v53  ;;  %v615_v26 = vmax.f32 %v585_v50, %v5072_v18  ;;  %v643_v56 = vmax.f32 %v613_v55, %v5072_v18 }
 0x12b   : > { %7937 = vst [vmem:[#allocation22_spill] sm:$0xff] %v5105_v62  ;;  %v5115_v5 = vmax.f32 %v466_v63, 0.0  ;;  %v478_v6 = vpop.f32.mrf.mxu0  ;;  %v739_v27 = vsel %vm726_vm1, %v736_v10, %v738_v8  ;;  %v848_v28 = vmax.f32 %v5084_v32, %v738_v8  ;;  %v895_v36 = vrot.slane %v5049_v60, 2 }
 0x12c   : > { %v5120_v40 = vmax.f32 %v487_v23, 0.0  ;;  %v479_v44 = vadd.f32 %v4949_v53, %v478_v6  ;;  %v847_v58 = vmax.f32 %v5049_v60, %v739_v27  ;;  %v896_v50 = vrot.slane %v5084_v32, 2 }
 0x12d   : > { %7938 = vst [vmem:[#allocation23_spill] sm:$0xff] %v5115_v5  ;;  %v586_v55 = vmax.f32 %v5051_v61, %v5115_v5  ;;  %v588_v63 = vmax.f32 %v5115_v5, %v5105_v62  ;;  %v614_v10 = vmax.f32 %v584_v25, %v5115_v5  ;;  %v642_v4 = vmax.f32 %v612_v41, %v5115_v5  ;;  %v4260_v8 = vpop.f32.mrf.mxu0 }
 0x12e   : > { %7939 = vst [vmem:[#allocation24_spill] sm:$0xff] %v5120_v40  ;;  %v5132_v23 = vmax.f32 %v640_v47, %v5115_v5  ;;  %v5134_v35 = vmax.f32 %v479_v44, 0.0  ;;  %v490_v6 = vadd.f32 %v4260_v8, %v4949_v53  ;;  %v897_v27 = vsel %vm888_vm2, %v895_v36, %v896_v50 }
 0x12f   : > { %v5139_v39 = vmax.f32 %v642_v4, %v5105_v62  ;;  %v481_v34 = vpop.f32.mrf.mxu0  ;;  %v616_v38 = vmax.f32 %v586_v55, %v5105_v62  ;;  %v644_v25 = vmax.f32 %v614_v10, %v5105_v62  ;;  %v5145_v41 = vmax.f32 %v842_v13, %v7854_v20 }
 0x130   : > { %7940 = vst [vmem:[#allocation25_spill] sm:$0xff] %v5134_v35  ;;  %v589_v47 = vmax.f32 %v5072_v18, %v5134_v35  ;;  %v591_v44 = vmax.f32 %v5134_v35, %v5120_v40  ;;  %v617_v8 = vmax.f32 %v587_v52, %v5134_v35  ;;  %v645_v4 = vmax.f32 %v615_v26, %v5134_v35 }
 0x131   : > { %v5154_v2 = vmax.f32 %v643_v56, %v5134_v35  ;;  %v5156_v55 = vmax.f32 %v490_v6, 0.0  ;;  %v482_v10 = vadd.f32 %v4949_v53, %v481_v34  ;;  %v4263_v30 = vpop.f32.mrf.mxu0  ;;  %v990_v13 = vmax.f32 %v5070_v15, %v7859_v22 }
 0x132   : > { %v5163_v20 = vmax.f32 %v645_v4, %v5120_v40  ;;  %v503_v54 = vadd.f32 %v4263_v30, %v4949_v53  ;;  %v619_v52 = vmax.f32 %v589_v47, %v5120_v40  ;;  %v647_v26 = vmax.f32 %v617_v8, %v5120_v40 }
 0x133   : > { %7941 = vst [vmem:[#allocation26_spill] sm:$0xff] %v5156_v55  ;;  %v5168_v56 = vmax.f32 %v482_v10, 0.0  ;;  %v494_v6 = vpop.f32.mrf.mxu0  ;;  %v991_v1 = vmax.f32 %v846_v49, %v895_v36  ;;  %v992_v34 = vmax.f32 %v847_v58, %v897_v27  ;;  %v993_v11 = vmax.f32 %v848_v28, %v896_v50 }
 0x134   : > { %v5170_v57 = vmax.f32 %v503_v54, 0.0  ;;  %v495_v15 = vadd.f32 %v4949_v53, %v494_v6  ;;  %v7861_v4 = vrot.slane %v5022_v43, 3  ;;  %v7860_v22 = vrot.slane %v5039_v51, 3 }
 0x135   : > { %7942 = vst [vmem:[#allocation27_spill] sm:$0xff] %v5168_v56  ;;  %v5180_v8 = vmax.f32 %v588_v63, %v5168_v56  ;;  %v646_v49 = vmax.f32 %v616_v38, %v5168_v56  ;;  %v4264_v28 = vpop.f32.mrf.mxu0  ;;  %v5184_v54 = vmax.f32 %v644_v25, %v5168_v56  ;;  %v1043_v63 = vrot.slane %v5049_v60, 3 }
 0x136   : > { %7943 = vst [vmem:[#allocation28_spill] sm:$0xff] %v5170_v57  ;;  %v5186_v36 = vmax.f32 %v495_v15, 0.0  ;;  %v506_v58 = vadd.f32 %v4264_v28, %v4949_v53  ;;  %v1038_v50 = vsel %vm1033_vm3, %v7861_v4, %v4977_v16  ;;  %v1042_v38 = vsel %vm1033_vm3, %v7860_v22, %v4977_v16 }
 0x137   : > { %v5194_v27 = vmax.f32 %v646_v49, %v5156_v55  ;;  %v1044_v25 = vrot.slane %v5084_v32, 3  ;;  %v1149_v6 = vmax.f32 %v5145_v41, %v1038_v50  ;;  %v1152_v4 = vmax.f32 %v990_v13, %v1042_v38 }
 0x138   : > { %7944 = vst [vmem:[#allocation29_spill] sm:$0xff] %v5186_v36  ;;  %v5207_v15 = vmax.f32 %v591_v44, %v5186_v36  ;;  %v649_v49 = vmax.f32 %v619_v52, %v5186_v36  ;;  %v5211_v28 = vmax.f32 %v647_v26, %v5186_v36  ;;  %v5213_v47 = vmax.f32 %v506_v58, 0.0 }
 0x139   : > { %v1045_v30 = vsel %vm1033_vm3, %v1043_v63, %v1044_v25  ;;  %v1046_v22 = vsel %vm1033_vm3, %v1044_v25, %v4977_v16  ;;  %v1153_v44 = vmax.f32 %v991_v1, %v1043_v63  ;;  %v1197_v26 = vrot.slane %v5022_v43, 4 }
 0x13a   : > { %7945 = vst [vmem:[#allocation30_spill] sm:$0xff] %v5213_v47  ;;  %v5219_v10 = vmax.f32 %v649_v49, %v5170_v57  ;;  %v1154_v0 = vmax.f32 %v992_v34, %v1045_v30  ;;  %v1155_v52 = vmax.f32 %v993_v11, %v1046_v22  ;;  %v1202_v58 = vrot.slane %v5039_v51, 4 }
 0x13b   : > { %v1205_v35 = vrot.slane %v5049_v60, 4  ;;  %v1206_v31 = vrot.slane %v5084_v32, 4  ;;  %v7946_v25 = vrot.slane %v5022_v43, 1  ;;  %v7947_v49 = vrot.slane %v4987_v21, 1 }
 0x13c   : > { %v7948_v41 = vrot.slane %v5039_v51, 1  ;;  %v7949_v1 = vrot.slane %v4999_v29, 1  ;;  %v1200_v22 = vsel %vm1195_vm4, %v1197_v26, %v4979_v17  ;;  %v1204_v60 = vsel %vm1195_vm4, %v1202_v58, %v4979_v17 }
 0x13d   : > { %v731_v12 = vsel %vm726_vm1, %v7947_v49, %v7946_v25  ;;  %v840_v32 = vmax.f32 %v5012_v37, 0.0  ;;  %v1207_v34 = vsel %vm1195_vm4, %v1205_v35, %v1206_v31  ;;  %v1208_v30 = vsel %vm1195_vm4, %v1206_v31, %v4979_v17 }
 0x13e   : > { %v735_v11 = vsel %vm726_vm1, %v7949_v1, %v7948_v41  ;;  %v841_v13 = vmax.f32 %v4987_v21, %v731_v12  ;;  %v1311_v50 = vmax.f32 %v1149_v6, %v1200_v22  ;;  %v1314_v38 = vmax.f32 %v1152_v4, %v1204_v60  ;;  %v497_v60 = vpop.f32.mrf.mxu0 }
 0x13f   : > { %v1315_v63 = vmax.f32 %v1153_v44, %v1205_v35  ;;  %v1316_v25 = vmax.f32 %v1154_v0, %v1207_v34  ;;  %v1317_v49 = vmax.f32 %v1155_v52, %v1208_v30  ;;  %v843_v41 = vmax.f32 %v5033_v48, 0.0 }
 0x140   : > { %v1409_v1 = vrot.slane %v1311_v50, 6  ;;  %v1414_v18 = vrot.slane %v1314_v38, 6  ;;  %v844_v33 = vmax.f32 %v4999_v29, %v735_v11  ;;  %v7950_v37 = vrot.slane %v5022_v43, 2 }
 0x141   : > { %v7951_v12 = vrot.slane %v4987_v21, 2  ;;  %v1416_v45 = vrot.slane %v1315_v63, 6  ;;  %v1417_v61 = vrot.slane %v1316_v25, 6  ;;  %v1419_v31 = vrot.slane %v1317_v49, 6 }
 0x142   : > { %v7952_v4 = vrot.slane %v5039_v51, 2  ;;  %v7953_v0 = vrot.slane %v4999_v29, 2  ;;  %v7956_v50 = vrot.slane %v5022_v43, 3  ;;  %v7957_v38 = vrot.slane %v4987_v21, 3 }
 0x143   : > { %v891_v5 = vsel %vm888_vm2, %v7951_v12, %v7950_v37  ;;  %v7954_v48 = vmov %v7951_v12  ;;  %v5262_v34 = vsel %vm1405_vm5, %v1416_v45, %v1417_v61  ;;  %v5265_v30 = vsel %vm1405_vm5, %v1417_v61, %v1419_v31 }
 0x144   : > { %v894_v35 = vsel %vm888_vm2, %v7953_v0, %v7952_v4  ;;  %v985_v6 = vmax.f32 %v840_v32, %v7954_v48  ;;  %v986_v44 = vmax.f32 %v841_v13, %v891_v5  ;;  %v7955_v52 = vmov %v7953_v0 }
 0x145   : > { %v988_v11 = vmax.f32 %v843_v41, %v7955_v52  ;;  %v989_v22 = vmax.f32 %v844_v33, %v894_v35  ;;  %v1036_v63 = vsel %vm1033_vm3, %v7957_v38, %v7956_v50  ;;  %v1039_v32 = vrot.slane %v4999_v29, 3 }
 0x146   : > { %v4391_v5 = vpack.i.bf16 %v5265_v30, %v5262_v34  ;;  %v7958_v33 = vmov %v7957_v38  ;;  %v1148_v25 = vmax.f32 %v986_v44, %v1036_v63  ;;  %v1196_v45 = vrot.slane %v4987_v21, 4 }
 0x147   : > { %v1147_v13 = vmax.f32 %v985_v6, %v7958_v33  ;;  %v7959_v61 = vrot.slane %v5039_v51, 3  ;;  %v1150_v43 = vmax.f32 %v988_v11, %v1039_v32  ;;  %v1201_v41 = vrot.slane %v4999_v29, 4  ;;  %v4267_v29 = vpop.f32.mrf.mxu0 }
 0x148   : > { %v498_v37 = vadd.f32 %v4949_v53, %v497_v60  ;;  %4392 = vrot.lane.b32.xlu0 %v4391_v5, %s4741_s13  ;;  %v1198_v31 = vsel %vm1195_vm4, %v1196_v45, %v1197_v26  ;;  %v7960_v21 = vmax.f32 %v5105_v62, %v5168_v56  ;;  %v648_v11 = vmax.f32 %v5180_v8, %v5156_v55 }
 0x149   : > { %v1041_v49 = vsel %vm1033_vm3, %v1039_v32, %v7959_v61  ;;  %v1309_v4 = vmax.f32 %v1147_v13, %v1196_v45  ;;  %v1203_v51 = vsel %vm1195_vm4, %v1201_v41, %v1202_v58  ;;  %v1310_v35 = vmax.f32 %v1148_v25, %v1198_v31 }
 0x14a   : > { %v1151_v12 = vmax.f32 %v989_v22, %v1041_v49  ;;  %v620_v0 = vmax.f32 %v7960_v21, %v5156_v55  ;;  %v1312_v48 = vmax.f32 %v1150_v43, %v1201_v41  ;;  %v5290_v6 = vmax.f32 %v498_v37, 0.0 }
 0x14b   : > { %v1406_v52 = vrot.slane %v1309_v4, 6  ;;  %v519_v26 = vadd.f32 %v4267_v29, %v4949_v53  ;;  %v1407_v22 = vrot.slane %v1310_v35, 6  ;;  %v7962_v63 = vmax.f32 %v5168_v56, %v5156_v55 }
 0x14c   : > { %7961 = vst [vmem:[#allocation31_spill] sm:$0xff] %v5290_v6  ;;  %v1313_v44 = vmax.f32 %v1151_v12, %v1203_v51  ;;  %v1411_v60 = vrot.slane %v1312_v48, 6  ;;  %v650_v5 = vmax.f32 %v620_v0, %v5290_v6  ;;  %v5307_v8 = vmax.f32 %v648_v11, %v5290_v6 }
 0x14d   : > { %v5303_v32 = vmax.f32 %v7962_v63, %v5290_v6  ;;  %v5310_v33 = vsel %vm1405_vm5, %v1406_v52, %v1407_v22  ;;  %v5313_v13 = vsel %vm1405_vm5, %v1407_v22, %v1409_v1  ;;  %v5315_v25 = vmax.f32 %v519_v26, 0.0 }
 0x14e   : > { %v1412_v38 = vrot.slane %v1313_v44, 6  ;;  %7963 = vst [vmem:[#allocation32_spill] sm:$0xff] %v5310_v33  ;;  %7964 = vst [vmem:[#allocation33_spill] sm:$0xff] %v5313_v13  ;;  %v740_v45 = vrot.slane %v5056_v3, 1  ;;  %v1518_v43 = vmax.f32 %v5310_v33, 0.0  ;;  %v1519_v41 = vmax.f32 %v5313_v13, 0.0 }
 0x14f   : > { %7965 = vst [vmem:[#allocation34_spill] sm:$0xff] %v5315_v25  ;;  %v5337_v21 = vmax.f32 %v650_v5, %v5213_v47  ;;  %v742_v48 = vrot.slane %v5092_v42, 1  ;;  %v898_v11 = vrot.slane %v5056_v3, 2  ;;  %v899_v26 = vrot.slane %v5092_v42, 2 }
 0x150   : > { %v5319_v61 = vsel %vm1405_vm5, %v1411_v60, %v1412_v38  ;;  %v5322_v49 = vsel %vm1405_vm5, %v1412_v38, %v1414_v18  ;;  %v741_v0 = vsel %vm726_vm1, %v4967_v9, %v740_v45  ;;  %v1047_v38 = vrot.slane %v5056_v3, 3 }
 0x151   : > { %7966 = vst [vmem:[#allocation35_spill] sm:$0xff] %v5319_v61  ;;  %7967 = vst [vmem:[#allocation36_spill] sm:$0xff] %v5322_v49  ;;  %v1520_v37 = vmax.f32 %v5310_v33, %v5319_v61  ;;  %v1521_v1 = vmax.f32 %v5313_v13, %v5322_v49  ;;  %v1522_v12 = vmax.f32 %v5319_v61, %v5262_v34  ;;  %v849_v29 = vmax.f32 %v741_v0, 0.0 }
 0x152   : > { %v1548_v4 = vmax.f32 %v1518_v43, %v5319_v61  ;;  %v1549_v18 = vmax.f32 %v1519_v41, %v5322_v49  ;;  %v743_v22 = vsel %vm726_vm1, %v740_v45, %v742_v48  ;;  %v851_v60 = vmax.f32 %v5092_v42, %v742_v48 }
 0x153   : > { %v5342_v51 = vmax.f32 %v1520_v37, %v5262_v34  ;;  %v5345_v35 = vmax.f32 %v1521_v1, %v5265_v30  ;;  %v1048_v63 = vrot.slane %v5092_v42, 3  ;;  %v850_v37 = vmax.f32 %v5056_v3, %v743_v22  ;;  %v510_v1 = vpop.f32.mrf.mxu0 }
 0x154   : > { %v5349_v44 = vmax.f32 %v1548_v4, %v5262_v34  ;;  %v5352_v52 = vmax.f32 %v1549_v18, %v5265_v30  ;;  %v900_v4 = vsel %vm888_vm2, %v898_v11, %v899_v26  ;;  %v994_v18 = vmax.f32 %v849_v29, %v898_v11 }
 0x155   : > { %v996_v0 = vmax.f32 %v851_v60, %v899_v26  ;;  %v1049_v45 = vsel %vm1033_vm3, %v1047_v38, %v1048_v63  ;;  %v995_v48 = vmax.f32 %v850_v37, %v900_v4  ;;  %v1050_v58 = vsel %vm1033_vm3, %v1048_v63, %v4977_v16  ;;  %v4268_v63 = vpop.f32.mrf.mxu0 }
 0x156   : > { %v1209_v50 = vrot.slane %v5056_v3, 4  ;;  %v1210_v5 = vrot.slane %v5092_v42, 4  ;;  %v1156_v43 = vmax.f32 %v994_v18, %v1047_v38  ;;  %v511_v41 = vadd.f32 %v4949_v53, %v510_v1 }
 0x157   : > { %v1158_v31 = vmax.f32 %v996_v0, %v1050_v58  ;;  %v7968_v22 = vmax.f32 %v5120_v40, %v5186_v36  ;;  %v1157_v11 = vmax.f32 %v995_v48, %v1049_v45  ;;  %v651_v3 = vmax.f32 %v5207_v15, %v5170_v57 }
 0x158   : > { %v1211_v26 = vsel %vm1195_vm4, %v1209_v50, %v1210_v5  ;;  %v1212_v60 = vsel %vm1195_vm4, %v1210_v5, %v4979_v17  ;;  %v1318_v42 = vmax.f32 %v1156_v43, %v1209_v50  ;;  %v5380_v58 = vmax.f32 %v511_v41, 0.0 }
 0x159   : > { %v623_v29 = vmax.f32 %v7968_v22, %v5170_v57  ;;  %v1320_v38 = vmax.f32 %v1158_v31, %v1212_v60  ;;  %v522_v37 = vadd.f32 %v4268_v63, %v4949_v53  ;;  %v1319_v1 = vmax.f32 %v1157_v11, %v1211_v26 }
 0x15a   : > { %7969 = vst [vmem:[#allocation37_spill] sm:$0xff] %v5380_v58  ;;  %v744_v4 = vrot.slane %v5103_v59, 1  ;;  %v746_v18 = vrot.slane %v5132_v23, 1  ;;  %v901_v0 = vrot.slane %v5103_v59, 2  ;;  %v1421_v45 = vrot.slane %v1318_v42, 6 }
 0x15b   : > { %v1424_v48 = vrot.slane %v1320_v38, 6  ;;  %v653_v5 = vmax.f32 %v623_v29, %v5380_v58  ;;  %v5388_v15 = vmax.f32 %v651_v3, %v5380_v58  ;;  %v1422_v50 = vrot.slane %v1319_v1, 6 }
 0x15c   : > { %v5390_v31 = vmax.f32 %v522_v37, 0.0  ;;  %v745_v43 = vsel %vm726_vm1, %v4967_v9, %v744_v4  ;;  %v747_v41 = vsel %vm726_vm1, %v744_v4, %v746_v18  ;;  %v854_v60 = vmax.f32 %v5132_v23, %v746_v18 }
 0x15d   : > { %v5396_v22 = vmax.f32 %v653_v5, %v5315_v25  ;;  %v852_v11 = vmax.f32 %v745_v43, 0.0  ;;  %v853_v26 = vmax.f32 %v5103_v59, %v747_v41  ;;  %v5401_v29 = vsel %vm1405_vm5, %v1421_v45, %v1422_v50  ;;  %v513_v43 = vpop.f32.mrf.mxu0 }
 0x15e   : > { %7970 = vst [vmem:[#allocation38_spill] sm:$0xff] %v5390_v31  ;;  %v5404_v3 = vsel %vm1405_vm5, %v1422_v50, %v1424_v48  ;;  %v902_v63 = vrot.slane %v5132_v23, 2  ;;  %v1051_v42 = vrot.slane %v5103_v59, 3  ;;  %v1524_v1 = vmax.f32 %v5262_v34, %v5401_v29 }
 0x15f   : > { %v4396_v38 = vpack.i.bf16 %v5404_v3, %v5401_v29  ;;  %v1525_v37 = vmax.f32 %v5265_v30, %v5404_v3  ;;  %v5418_v4 = vmax.f32 %v1522_v12, %v5401_v29  ;;  %v7971_v18 = vmax.f32 %v5322_v49, %v5265_v30  ;;  %v4271_v14 = vpop.f32.mrf.mxu0 }
 0x160   : > { %v1580_v48 = vmax.f32 %v5342_v51, %v5401_v29  ;;  %v1581_v5 = vmax.f32 %v5345_v35, %v5404_v3  ;;  %v5432_v50 = vmax.f32 %v5349_v44, %v5401_v29  ;;  %v5437_v34 = vmax.f32 %v5352_v52, %v5404_v3 }
 0x161   : > { %v5424_v45 = vmax.f32 %v7971_v18, %v5404_v3  ;;  %4397 = vrot.lane.b32.xlu0 %v4396_v38, %s4741_s13  ;;  %v903_v30 = vsel %vm888_vm2, %v901_v0, %v902_v63  ;;  %v997_v12 = vmax.f32 %v852_v11, %v901_v0  ;;  %v999_v41 = vmax.f32 %v854_v60, %v902_v63 }
 0x162   : > { %v998_v18 = vmax.f32 %v853_v26, %v903_v30  ;;  %v1052_v35 = vrot.slane %v5132_v23, 3  ;;  %v1213_v40 = vrot.slane %v5103_v59, 4  ;;  %v1214_v62 = vrot.slane %v5132_v23, 4 }
 0x163   : > { %v1159_v56 = vmax.f32 %v997_v12, %v1051_v42  ;;  %v514_v38 = vadd.f32 %v4949_v53, %v513_v43  ;;  %v7972_v46 = vmax.f32 %v5156_v55, %v5290_v6  ;;  %v652_v26 = vmax.f32 %v5303_v32, %v5213_v47 }
 0x164   : > { %v1053_v0 = vsel %vm1033_vm3, %v1051_v42, %v1052_v35  ;;  %v1054_v11 = vsel %vm1033_vm3, %v1052_v35, %v4977_v16  ;;  %v748_v59 = vrot.slane %v5110_v19, 1  ;;  %v1215_v23 = vsel %vm1195_vm4, %v1213_v40, %v1214_v62 }
 0x165   : > { %v624_v7 = vmax.f32 %v7972_v46, %v5213_v47  ;;  %v1160_v60 = vmax.f32 %v998_v18, %v1053_v0  ;;  %v1161_v63 = vmax.f32 %v999_v41, %v1054_v11  ;;  %v1216_v43 = vsel %vm1195_vm4, %v1214_v62, %v4979_v17 }
 0x166   : > { %v1321_v30 = vmax.f32 %v1159_v56, %v1213_v40  ;;  %v5458_v12 = vmax.f32 %v514_v38, 0.0  ;;  %v749_v46 = vsel %vm726_vm1, %v4967_v9, %v748_v59  ;;  %v750_v42 = vrot.slane %v5139_v39, 1 }
 0x167   : > { %v1322_v35 = vmax.f32 %v1160_v60, %v1215_v23  ;;  %v1323_v51 = vmax.f32 %v1161_v63, %v1216_v43  ;;  %v855_v32 = vmax.f32 %v749_v46, 0.0  ;;  %v904_v55 = vrot.slane %v5110_v19, 2 }
 0x168   : > { %7973 = vst [vmem:[#allocation39_spill] sm:$0xff] %v5458_v12  ;;  %v1426_v18 = vrot.slane %v1321_v30, 6  ;;  %v654_v41 = vmax.f32 %v624_v7, %v5458_v12  ;;  %v5466_v0 = vmax.f32 %v652_v26, %v5458_v12  ;;  %v751_v62 = vsel %vm726_vm1, %v748_v59, %v750_v42 }
 0x169   : > { %v1427_v40 = vrot.slane %v1322_v35, 6  ;;  %v1429_v56 = vrot.slane %v1323_v51, 6  ;;  %v856_v38 = vmax.f32 %v5110_v19, %v751_v62  ;;  %v857_v11 = vmax.f32 %v5139_v39, %v750_v42  ;;  %v526_v62 = vpop.f32.mrf.mxu0 }
 0x16a   : > { %v5472_v60 = vmax.f32 %v654_v41, %v5390_v31  ;;  %v905_v63 = vrot.slane %v5139_v39, 2  ;;  %v1000_v23 = vmax.f32 %v855_v32, %v904_v55  ;;  %v1055_v7 = vrot.slane %v5110_v19, 3 }
 0x16b   : > { %v5477_v26 = vsel %vm1405_vm5, %v1426_v18, %v1427_v40  ;;  %v5480_v59 = vsel %vm1405_vm5, %v1427_v40, %v1429_v56  ;;  %v1056_v51 = vrot.slane %v5139_v39, 3  ;;  %v1217_v43 = vrot.slane %v5110_v19, 4 }
 0x16c   : > { %v4401_v30 = vpack.i.bf16 %v5480_v59, %v5477_v26  ;;  %v5487_v46 = vmax.f32 %v1525_v37, %v5480_v59  ;;  %v5490_v42 = vmax.f32 %v1524_v1, %v5477_v26  ;;  %v1582_v35 = vmax.f32 %v5418_v4, %v5477_v26 }
 0x16d   : > { %v1583_v32 = vmax.f32 %v5424_v45, %v5480_v59  ;;  %v5497_v18 = vmax.f32 %v1580_v48, %v5477_v26  ;;  %v5500_v19 = vmax.f32 %v1581_v5, %v5480_v59  ;;  %v906_v41 = vsel %vm888_vm2, %v904_v55, %v905_v63 }
 0x16e   : > { %4402 = vrot.lane.b32.xlu0 %v4401_v30, %s4741_s13  ;;  %v1001_v37 = vmax.f32 %v856_v38, %v906_v41  ;;  %v1002_v1 = vmax.f32 %v857_v11, %v905_v63  ;;  %v1057_v40 = vsel %vm1033_vm3, %v1055_v7, %v1056_v51  ;;  %v1058_v4 = vsel %vm1033_vm3, %v1056_v51, %v4977_v16 }
 0x16f   : > { %v1162_v56 = vmax.f32 %v1000_v23, %v1055_v7  ;;  %v1218_v45 = vrot.slane %v5139_v39, 4  ;;  %v1526_v48 = vmax.f32 %v5401_v29, %v5477_v26  ;;  %v1527_v5 = vmax.f32 %v5404_v3, %v5480_v59 }
 0x170   : > { %v1163_v55 = vmax.f32 %v1001_v37, %v1057_v40  ;;  %v1164_v24 = vmax.f32 %v1002_v1, %v1058_v4  ;;  %v535_v30 = vadd.f32 %v4271_v14, %v4949_v53  ;;  %v527_v38 = vadd.f32 %v4949_v53, %v526_v62  ;;  %v4272_v1 = vpop.f32.mrf.mxu0 }
 0x171   : > { %v1219_v11 = vsel %vm1195_vm4, %v1217_v43, %v1218_v45  ;;  %v1220_v63 = vsel %vm1195_vm4, %v1218_v45, %v4979_v17  ;;  %v1324_v23 = vmax.f32 %v1162_v56, %v1217_v43  ;;  %v597_v39 = vmax.f32 %v5170_v57, %v5380_v58 }
 0x172   : > { %v1325_v7 = vmax.f32 %v1163_v55, %v1219_v11  ;;  %v1326_v29 = vmax.f32 %v1164_v24, %v1220_v63  ;;  %v5519_v51 = vmax.f32 %v535_v30, 0.0  ;;  %v5521_v3 = vmax.f32 %v527_v38, 0.0 }
 0x173   : > { %v1431_v41 = vrot.slane %v1324_v23, 6  ;;  %v599_v14 = vmax.f32 %v5380_v58, %v5315_v25  ;;  %v7976_v62 = vmax.f32 %v5186_v36, %v5170_v57  ;;  %v627_v43 = vmax.f32 %v597_v39, %v5315_v25 }
 0x174   : > { %7974 = vst [vmem:[#allocation40_spill] sm:$0xff] %v5519_v51  ;;  %7975 = vst [vmem:[#allocation41_spill] sm:$0xff] %v5521_v3  ;;  %v1432_v40 = vrot.slane %v1325_v7, 6  ;;  %v1434_v4 = vrot.slane %v1326_v29, 6  ;;  %v601_v24 = vmax.f32 %v5315_v25, %v5521_v3  ;;  %v538_v56 = vadd.f32 %v4272_v1, %v4949_v53 }
 0x175   : > { %v625_v37 = vmax.f32 %v7976_v62, %v5380_v58  ;;  %v629_v45 = vmax.f32 %v599_v14, %v5521_v3  ;;  %v657_v30 = vmax.f32 %v627_v43, %v5521_v3  ;;  %v752_v38 = vrot.slane %v5154_v2, 1 }
 0x176   : > { %v5538_v11 = vsel %vm1405_vm5, %v1431_v41, %v1432_v40  ;;  %v5541_v63 = vsel %vm1405_vm5, %v1432_v40, %v1434_v4  ;;  %v631_v23 = vmax.f32 %v601_v24, %v5519_v51  ;;  %v5544_v39 = vmax.f32 %v538_v56, 0.0 }
 0x177   : > { %v655_v55 = vmax.f32 %v625_v37, %v5315_v25  ;;  %v4406_v7 = vpack.i.bf16 %v5541_v63, %v5538_v11  ;;  %v5553_v62 = vmax.f32 %v1526_v48, %v5538_v11  ;;  %v5556_v41 = vmax.f32 %v1527_v5, %v5541_v63 }
 0x178   : > { %7977 = vst [vmem:[#allocation42_spill] sm:$0xff] %v5544_v39  ;;  %v5563_v1 = vmax.f32 %v1582_v35, %v5538_v11  ;;  %v5567_v40 = vmax.f32 %v1583_v32, %v5541_v63  ;;  %v659_v48 = vmax.f32 %v629_v45, %v5519_v51  ;;  %v661_v4 = vmax.f32 %v631_v23, 0.0 }
 0x179   : > { %4407 = vrot.lane.b32.xlu1 %v4406_v7, %s4741_s13  ;;  %v5571_v5 = vmax.f32 %v655_v55, %v5521_v3  ;;  %v5574_v24 = vmax.f32 %v657_v30, %v5519_v51  ;;  %v753_v56 = vsel %vm726_vm1, %v4967_v9, %v752_v38  ;;  %v754_v35 = vrot.slane %v5184_v54, 1 }
 0x17a   : > { %v907_v37 = vrot.slane %v5154_v2, 2  ;;  %v5580_v7 = vmax.f32 %v659_v48, 0.0  ;;  %v5582_v32 = vmax.f32 %v661_v4, 0.0  ;;  %v858_v23 = vmax.f32 %v753_v56, 0.0  ;;  %v529_v48 = vpop.f32.mrf.mxu0 }
 0x17b   : > { %7978 = vst [vmem:[#allocation43_spill] sm:$0xff] %v5574_v24  ;;  %v755_v43 = vsel %vm726_vm1, %v752_v38, %v754_v35  ;;  %v860_v30 = vmax.f32 %v5184_v54, %v754_v35  ;;  %v908_v14 = vrot.slane %v5184_v54, 2  ;;  %v1059_v3 = vrot.slane %v5154_v2, 3 }
 0x17c   : > { %v7885_v29 = vrot.slane %v5580_v7, 1  ;;  %v7888_v58 = vrot.slane %v5582_v32, 1  ;;  %v859_v4 = vmax.f32 %v5154_v2, %v755_v43  ;;  %v1003_v55 = vmax.f32 %v858_v23, %v907_v37 }
 0x17d   : > { %v909_v57 = vsel %vm888_vm2, %v907_v37, %v908_v14  ;;  %v1005_v51 = vmax.f32 %v860_v30, %v908_v14  ;;  %v1060_v25 = vrot.slane %v5184_v54, 3  ;;  %v7979_v49 = vrot.slane %v5580_v7, 2 }
 0x17e   : > { %v785_v35 = vsel %vm726_vm1, %v4967_v9, %v7885_v29  ;;  %v789_v45 = vsel %vm726_vm1, %v4967_v9, %v7888_v58  ;;  %v1004_v38 = vmax.f32 %v859_v4, %v909_v57  ;;  %v1221_v29 = vrot.slane %v5154_v2, 4 }
 0x17f   : > { %v882_v56 = vmax.f32 %v785_v35, 0.0  ;;  %v885_v36 = vmax.f32 %v789_v45, 0.0  ;;  %v7980_v58 = vrot.slane %v5582_v32, 2  ;;  %v1222_v13 = vrot.slane %v5184_v54, 4 }
 0x180   : > { %v530_v35 = vadd.f32 %v4949_v53, %v529_v48  ;;  %v1061_v37 = vsel %vm1033_vm3, %v1059_v3, %v1060_v25  ;;  %v1062_v57 = vsel %vm1033_vm3, %v1060_v25, %v4977_v16  ;;  %v1165_v14 = vmax.f32 %v1003_v55, %v1059_v3 }
 0x181   : > { %v1027_v61 = vmax.f32 %v882_v56, %v7979_v49  ;;  %v1030_v43 = vmax.f32 %v885_v36, %v7980_v58  ;;  %v598_v45 = vmax.f32 %v5213_v47, %v5458_v12  ;;  %v7981_v2 = vrot.slane %v5580_v7, 3 }
 0x182   : > { %v7982_v49 = vrot.slane %v5582_v32, 3  ;;  %v1166_v36 = vmax.f32 %v1004_v38, %v1061_v37  ;;  %v1167_v58 = vmax.f32 %v1005_v51, %v1062_v57  ;;  %v1223_v54 = vsel %vm1195_vm4, %v1221_v29, %v1222_v13 }
 0x183   : > { %v1189_v23 = vmax.f32 %v1027_v61, %v7981_v2  ;;  %v1224_v53 = vsel %vm1195_vm4, %v1222_v13, %v4979_v17  ;;  %v1327_v48 = vmax.f32 %v1165_v14, %v1221_v29  ;;  %v5628_v4 = vmax.f32 %v530_v35, 0.0 }
 0x184   : > { %v1192_v30 = vmax.f32 %v1030_v43, %v7982_v49  ;;  %v7984_v25 = vrot.slane %v5580_v7, 4  ;;  %v7986_v55 = vrot.slane %v5582_v32, 4  ;;  %v1328_v56 = vmax.f32 %v1166_v36, %v1223_v54 }
 0x185   : > { %7983 = vst [vmem:[#allocation44_spill] sm:$0xff] %v5628_v4  ;;  %v1329_v43 = vmax.f32 %v1167_v58, %v1224_v53  ;;  %v1436_v38 = vrot.slane %v1327_v48, 6  ;;  %v600_v51 = vmax.f32 %v5458_v12, %v5390_v31  ;;  %v602_v13 = vmax.f32 %v5390_v31, %v5628_v4 }
 0x186   : > { %v5632_v3 = vmax.f32 %v1189_v23, %v7984_v25  ;;  %v5636_v61 = vmax.f32 %v1192_v30, %v7986_v55  ;;  %v7988_v29 = vmax.f32 %v5290_v6, %v5213_v47  ;;  %v1437_v14 = vrot.slane %v1328_v56, 6 }
 0x187   : > { %v1439_v2 = vrot.slane %v1329_v43, 6  ;;  %v628_v23 = vmax.f32 %v598_v45, %v5390_v31  ;;  %v630_v49 = vmax.f32 %v600_v51, %v5628_v4  ;;  %v632_v30 = vmax.f32 %v602_v13, %v5544_v39 }
 0x188   : > { %7985 = vst [vmem:[#allocation45_spill] sm:$0xff] %v5632_v3  ;;  %7987 = vst [vmem:[#allocation46_spill] sm:$0xff] %v5636_v61  ;;  %v626_v35 = vmax.f32 %v7988_v29, %v5458_v12  ;;  %v5653_v58 = vsel %vm1405_vm5, %v1436_v38, %v1437_v14  ;;  %v756_v53 = vrot.slane %v5163_v20, 1  ;;  %v758_v48 = vrot.slane %v5194_v27, 1 }
 0x189   : > { %v5656_v54 = vsel %vm1405_vm5, %v1437_v14, %v1439_v2  ;;  %v7989_v56 = vmax.f32 %v5477_v26, %v5538_v11  ;;  %v7990_v38 = vmax.f32 %v5480_v59, %v5541_v63  ;;  %v7992_v26 = vmax.f32 %v5490_v42, %v5538_v11 }
 0x18a   : > { %v656_v36 = vmax.f32 %v626_v35, %v5390_v31  ;;  %v4411_v25 = vpack.i.bf16 %v5656_v54, %v5653_v58  ;;  %v7991_v35 = vmax.f32 %v5487_v46, %v5541_v63  ;;  %v658_v2 = vmax.f32 %v628_v23, %v5628_v4 }
 0x18b   : > { %v5670_v43 = vmax.f32 %v7989_v56, %v5653_v58  ;;  %v5676_v51 = vmax.f32 %v7990_v38, %v5656_v54  ;;  %v5693_v59 = vmax.f32 %v7992_v26, %v5653_v58  ;;  %v660_v56 = vmax.f32 %v630_v49, %v5544_v39 }
 0x18c   : > { %v5686_v14 = vmax.f32 %v7991_v35, %v5656_v54  ;;  %4412 = vrot.lane.b32.xlu0 %v4411_v25, %s4741_s13  ;;  %v662_v38 = vmax.f32 %v632_v30, 0.0  ;;  %v5698_v57 = vmax.f32 %v656_v36, %v5628_v4  ;;  %v757_v46 = vsel %vm726_vm1, %v4967_v9, %v756_v53 }
 0x18d   : > { %v759_v35 = vsel %vm726_vm1, %v756_v53, %v758_v48  ;;  %v863_v25 = vmax.f32 %v5194_v27, %v758_v48  ;;  %v5705_v37 = vmax.f32 %v658_v2, %v5544_v39  ;;  %v690_v42 = vmax.f32 %v660_v56, 0.0 }
 0x18e   : > { %v692_v26 = vmax.f32 %v662_v38, 0.0  ;;  %v861_v29 = vmax.f32 %v757_v46, 0.0  ;;  %v862_v23 = vmax.f32 %v5163_v20, %v759_v35  ;;  %v910_v49 = vrot.slane %v5163_v20, 2 }
 0x18f   : > { %7993 = vst [vmem:[#allocation47_spill] sm:$0xff] %v5705_v37  ;;  %v911_v30 = vrot.slane %v5194_v27, 2  ;;  %v1063_v36 = vrot.slane %v5163_v20, 3  ;;  %v786_v13 = vrot.slane %v690_v42, 1  ;;  %v932_v55 = vrot.slane %v690_v42, 2 }
 0x190   : > { %v790_v45 = vrot.slane %v692_v26, 1  ;;  %v935_v53 = vrot.slane %v692_v26, 2  ;;  %v1092_v12 = vrot.slane %v690_v42, 3  ;;  %v1096_v48 = vrot.slane %v692_v26, 3 }
 0x191   : > { %v1254_v47 = vrot.slane %v690_v42, 4  ;;  %v1258_v2 = vrot.slane %v692_v26, 4  ;;  %v7994_v56 = vrot.slane %v5580_v7, 1  ;;  %v7995_v46 = vrot.slane %v5582_v32, 1 }
 0x192   : > { %v884_v6 = vmax.f32 %v690_v42, %v786_v13  ;;  %v887_v39 = vmax.f32 %v692_v26, %v790_v45  ;;  %v7996_v33 = vrot.slane %v5580_v7, 2  ;;  %v7997_v3 = vrot.slane %v5582_v32, 2 }
 0x193   : > { %v787_v38 = vsel %vm726_vm1, %v7994_v56, %v786_v13  ;;  %v791_v35 = vsel %vm726_vm1, %v7995_v46, %v790_v45  ;;  %v8000_v46 = vrot.slane %v5580_v7, 3  ;;  %v5736_v13 = vsel %vm1033_vm3, %v1092_v12, %v4977_v16 }
 0x194   : > { %v883_v4 = vmax.f32 %v5580_v7, %v787_v38  ;;  %v886_v31 = vmax.f32 %v5582_v32, %v791_v35  ;;  %v933_v61 = vsel %vm888_vm2, %v7996_v33, %v932_v55  ;;  %v936_v37 = vsel %vm888_vm2, %v7997_v3, %v935_v53  ;;  %8002 = vst [vmem:[#allocation51_spill] sm:$0xff] %v5736_v13 }
 0x195   : > { %v5725_v24 = vmax.f32 %v884_v6, %v932_v55  ;;  %v5727_v56 = vmax.f32 %v887_v39, %v935_v53  ;;  %v5732_v45 = vsel %vm1033_vm3, %v8000_v46, %v1092_v12  ;;  %v8005_v26 = vrot.slane %v5582_v32, 3 }
 0x196   : > { %8001 = vst [vmem:[#allocation50_spill] sm:$0xff] %v5732_v45  ;;  %v5738_v42 = vmax.f32 %v883_v4, %v933_v61  ;;  %v5740_v33 = vmax.f32 %v886_v31, %v936_v37  ;;  %v5749_v39 = vsel %vm1033_vm3, %v1096_v48, %v4977_v16  ;;  %v8008_v4 = vrot.slane %v5580_v7, 4 }
 0x197   : > { %7998 = vst [vmem:[#allocation48_spill] sm:$0xff] %v5725_v24  ;;  %7999 = vst [vmem:[#allocation49_spill] sm:$0xff] %v5727_v56  ;;  %v5745_v6 = vsel %vm1033_vm3, %v8005_v26, %v1096_v48  ;;  %v5762_v61 = vsel %vm1195_vm4, %v1254_v47, %v4979_v17  ;;  %v8010_v53 = vrot.slane %v5582_v32, 4  ;;  %v5775_v7 = vsel %vm1195_vm4, %v1258_v2, %v4979_v17 }
 0x198   : > { %8003 = vst [vmem:[#allocation52_spill] sm:$0xff] %v5738_v42  ;;  %8004 = vst [vmem:[#allocation53_spill] sm:$0xff] %v5740_v33  ;;  %v5758_v31 = vsel %vm1195_vm4, %v8008_v4, %v1254_v47  ;;  %v912_v38 = vsel %vm888_vm2, %v910_v49, %v911_v30  ;;  %v1006_v35 = vmax.f32 %v861_v29, %v910_v49  ;;  %v1064_v46 = vrot.slane %v5194_v27, 3 }
 0x199   : > { %8006 = vst [vmem:[#allocation54_spill] sm:$0xff] %v5745_v6  ;;  %8007 = vst [vmem:[#allocation55_spill] sm:$0xff] %v5749_v39  ;;  %v5771_v48 = vsel %vm1195_vm4, %v8010_v53, %v1258_v2  ;;  %v1008_v47 = vmax.f32 %v863_v25, %v911_v30  ;;  %v1007_v26 = vmax.f32 %v862_v23, %v912_v38  ;;  %v1225_v4 = vrot.slane %v5163_v20, 4 }
 0x19a   : > { %8009 = vst [vmem:[#allocation56_spill] sm:$0xff] %v5762_v61  ;;  %8011 = vst [vmem:[#allocation57_spill] sm:$0xff] %v5771_v48  ;;  %v1226_v12 = vrot.slane %v5194_v27, 4  ;;  %v760_v32 = vrot.slane %v5211_v28, 1  ;;  %v1065_v53 = vsel %vm1033_vm3, %v1063_v36, %v1064_v46  ;;  %v1066_v55 = vsel %vm1033_vm3, %v1064_v46, %v4977_v16 }
 0x19b   : > { %8012 = vst [vmem:[#allocation58_spill] sm:$0xff] %v5775_v7  ;;  %v1168_v2 = vmax.f32 %v1006_v35, %v1063_v36  ;;  %v762_v3 = vrot.slane %v5307_v8, 1  ;;  %v1169_v37 = vmax.f32 %v1007_v26, %v1065_v53  ;;  %v1170_v29 = vmax.f32 %v1008_v47, %v1066_v55 }
 0x19c   : > { %v1227_v25 = vsel %vm1195_vm4, %v1225_v4, %v1226_v12  ;;  %v1228_v23 = vsel %vm1195_vm4, %v1226_v12, %v4979_v17  ;;  %v761_v27 = vsel %vm726_vm1, %v4967_v9, %v760_v32  ;;  %v913_v55 = vrot.slane %v5211_v28, 2 }
 0x19d   : > { %v1330_v20 = vmax.f32 %v1168_v2, %v1225_v4  ;;  %v763_v49 = vsel %vm726_vm1, %v760_v32, %v762_v3  ;;  %v866_v30 = vmax.f32 %v5307_v8, %v762_v3  ;;  %v1331_v38 = vmax.f32 %v1169_v37, %v1227_v25 }
 0x19e   : > { %v1332_v46 = vmax.f32 %v1170_v29, %v1228_v23  ;;  %v864_v36 = vmax.f32 %v761_v27, 0.0  ;;  %v865_v35 = vmax.f32 %v5211_v28, %v763_v49  ;;  %v914_v47 = vrot.slane %v5307_v8, 2 }
 0x19f   : > { %v1441_v26 = vrot.slane %v1330_v20, 6  ;;  %v1067_v12 = vrot.slane %v5211_v28, 3  ;;  %v1442_v4 = vrot.slane %v1331_v38, 6  ;;  %v1068_v2 = vrot.slane %v5307_v8, 3 }
 0x1a0   : > { %v1444_v53 = vrot.slane %v1332_v46, 6  ;;  %v1229_v32 = vrot.slane %v5211_v28, 4  ;;  %v915_v3 = vsel %vm888_vm2, %v913_v55, %v914_v47  ;;  %v1009_v37 = vmax.f32 %v864_v36, %v913_v55 }
 0x1a1   : > { %v1011_v29 = vmax.f32 %v866_v30, %v914_v47  ;;  %v1230_v25 = vrot.slane %v5307_v8, 4  ;;  %v5802_v23 = vsel %vm1405_vm5, %v1441_v26, %v1442_v4  ;;  %v1010_v27 = vmax.f32 %v865_v35, %v915_v3 }
 0x1a2   : > { %v5805_v20 = vsel %vm1405_vm5, %v1442_v4, %v1444_v53  ;;  %v1069_v49 = vsel %vm1033_vm3, %v1067_v12, %v1068_v2  ;;  %v1532_v28 = vmax.f32 %v5653_v58, %v5802_v23  ;;  %v8013_v8 = vmax.f32 %v5541_v63, %v5656_v54 }
 0x1a3   : > { %v4416_v38 = vpack.i.bf16 %v5805_v20, %v5802_v23  ;;  %v1533_v30 = vmax.f32 %v5656_v54, %v5805_v20  ;;  %v8014_v36 = vmax.f32 %v5538_v11, %v5653_v58  ;;  %v1588_v26 = vmax.f32 %v5670_v43, %v5802_v23 }
 0x1a4   : > { %v5818_v46 = vmax.f32 %v8013_v8, %v5805_v20  ;;  %v1589_v55 = vmax.f32 %v5676_v51, %v5805_v20  ;;  %v8015_v47 = vmax.f32 %v5553_v62, %v5653_v58  ;;  %v8016_v11 = vmax.f32 %v5556_v41, %v5656_v54 }
 0x1a5   : > { %v5824_v35 = vmax.f32 %v8014_v36, %v5802_v23  ;;  %4417 = vrot.lane.b32.xlu1 %v4416_v38, %s4741_s13  ;;  %v1070_v43 = vsel %vm1033_vm3, %v1068_v2, %v4977_v16  ;;  %v1171_v53 = vmax.f32 %v1009_v37, %v1067_v12  ;;  %v1172_v3 = vmax.f32 %v1010_v27, %v1069_v49 }
 0x1a6   : > { %v5834_v4 = vmax.f32 %v8015_v47, %v5802_v23  ;;  %v5841_v63 = vmax.f32 %v8016_v11, %v5805_v20  ;;  %v1173_v51 = vmax.f32 %v1011_v29, %v1070_v43  ;;  %v1231_v8 = vsel %vm1195_vm4, %v1229_v32, %v1230_v25 }
 0x1a7   : > { %v1232_v62 = vsel %vm1195_vm4, %v1230_v25, %v4979_v17  ;;  %v8017_v58 = vrot.slane %v5349_v44, 1  ;;  %v1333_v36 = vmax.f32 %v1171_v53, %v1229_v32  ;;  %v1334_v41 = vmax.f32 %v1172_v3, %v1231_v8 }
 0x1a8   : > { %v8018_v54 = vrot.slane %v5352_v52, 1  ;;  %v8020_v2 = vrot.slane %v5432_v50, 1  ;;  %v1335_v29 = vmax.f32 %v1173_v51, %v1232_v62  ;;  %v1676_v25 = vrot.slane %v5437_v34, 1 }
 0x1a9   : > { %v1671_v38 = vsel %vm726_vm1, %v4967_v9, %v8017_v58  ;;  %v8019_v47 = vmov %v8017_v58  ;;  %v1678_v27 = vrot.slane %v5497_v18, 1  ;;  %v1680_v49 = vrot.slane %v5500_v19, 1 }
 0x1aa   : > { %v1673_v12 = vsel %vm726_vm1, %v8019_v47, %v8018_v54  ;;  %v1675_v37 = vsel %vm726_vm1, %v4967_v9, %v8020_v2  ;;  %v1446_v32 = vrot.slane %v1333_v36, 6  ;;  %v1447_v11 = vrot.slane %v1334_v41, 6 }
 0x1ab   : > { %v1782_v43 = vmax.f32 %v1671_v38, 0.0  ;;  %v1783_v53 = vmax.f32 %v5349_v44, %v1673_v12  ;;  %v1449_v3 = vrot.slane %v1335_v29, 6  ;;  %v8021_v8 = vmov %v8020_v2 }
 0x1ac   : > { %v1677_v58 = vsel %vm726_vm1, %v8021_v8, %v1676_v25  ;;  %v1679_v54 = vsel %vm726_vm1, %v4967_v9, %v1678_v27  ;;  %v1681_v51 = vsel %vm726_vm1, %v1678_v27, %v1680_v49  ;;  %v5872_v62 = vsel %vm1405_vm5, %v1446_v32, %v1447_v11 }
 0x1ad   : > { %v8022_v47 = vrot.slane %v5352_v52, 1  ;;  %v1785_v38 = vmax.f32 %v1675_v37, 0.0  ;;  %v1786_v41 = vmax.f32 %v5432_v50, %v1677_v58  ;;  %v5879_v12 = vsel %vm1405_vm5, %v1447_v11, %v1449_v3 }
 0x1ae   : > { %v5884_v29 = vmax.f32 %v1532_v28, %v5872_v62  ;;  %v4426_v32 = vpack.i.bf16 %v5879_v12, %v5872_v62  ;;  %v5893_v8 = vmax.f32 %v1533_v30, %v5879_v12  ;;  %v5898_v3 = vmax.f32 %v1588_v26, %v5872_v62 }
 0x1af   : > { %v1784_v36 = vmax.f32 %v5352_v52, %v8022_v47  ;;  %v5901_v28 = vmax.f32 %v1589_v55, %v5879_v12  ;;  %v1787_v58 = vmax.f32 %v5437_v34, %v1676_v25  ;;  %v1788_v47 = vmax.f32 %v1679_v54, 0.0 }
 0x1b0   : > { %4427 = vrot.lane.b32.xlu0 %v4426_v32, %s4741_s13  ;;  %v1789_v27 = vmax.f32 %v5497_v18, %v1681_v51  ;;  %v1790_v37 = vmax.f32 %v5500_v19, %v1680_v49  ;;  %v1830_v30 = vrot.slane %v5349_v44, 2  ;;  %v1831_v2 = vrot.slane %v5352_v52, 2 }
 0x1b1   : > { %v1833_v11 = vrot.slane %v5432_v50, 2  ;;  %v1834_v26 = vrot.slane %v5437_v34, 2  ;;  %v1836_v55 = vrot.slane %v5497_v18, 2  ;;  %v1837_v39 = vrot.slane %v5500_v19, 2 }
 0x1b2   : > { %v1832_v25 = vsel %vm888_vm2, %v1830_v30, %v1831_v2  ;;  %v1926_v54 = vmax.f32 %v1782_v43, %v1830_v30  ;;  %v1928_v32 = vmax.f32 %v1784_v36, %v1831_v2  ;;  %v1974_v51 = vrot.slane %v5349_v44, 3 }
 0x1b3   : > { %v1835_v49 = vsel %vm888_vm2, %v1833_v11, %v1834_v26  ;;  %v1838_v56 = vsel %vm888_vm2, %v1836_v55, %v1837_v39  ;;  %v1927_v7 = vmax.f32 %v1783_v53, %v1832_v25  ;;  %v1929_v6 = vmax.f32 %v1785_v38, %v1833_v11 }
 0x1b4   : > { %v1930_v33 = vmax.f32 %v1786_v41, %v1835_v49  ;;  %v1931_v48 = vmax.f32 %v1787_v58, %v1834_v26  ;;  %v1932_v13 = vmax.f32 %v1788_v47, %v1836_v55  ;;  %v1933_v24 = vmax.f32 %v1789_v27, %v1838_v56 }
 0x1b5   : > { %v1934_v61 = vmax.f32 %v1790_v37, %v1837_v39  ;;  %v8023_v45 = vrot.slane %v5352_v52, 3  ;;  %v1978_v2 = vrot.slane %v5432_v50, 3  ;;  %v1979_v30 = vrot.slane %v5437_v34, 3 }
 0x1b6   : > { %v1982_v53 = vrot.slane %v5497_v18, 3  ;;  %v1983_v38 = vrot.slane %v5500_v19, 3  ;;  %v2086_v41 = vmax.f32 %v1926_v54, %v1974_v51  ;;  %v2134_v37 = vrot.slane %v5349_v44, 4 }
 0x1b7   : > { %v1976_v42 = vsel %vm1033_vm3, %v1974_v51, %v8023_v45  ;;  %v8024_v43 = vmov %v8023_v45  ;;  %v2089_v27 = vmax.f32 %v1929_v6, %v1978_v2  ;;  %v1980_v45 = vsel %vm1033_vm3, %v1978_v2, %v1979_v30 }
 0x1b8   : > { %v1977_v36 = vsel %vm1033_vm3, %v8024_v43, %v4977_v16  ;;  %v2087_v56 = vmax.f32 %v1927_v7, %v1976_v42  ;;  %v1981_v11 = vsel %vm1033_vm3, %v1979_v30, %v4977_v16  ;;  %v1984_v58 = vsel %vm1033_vm3, %v1982_v53, %v1983_v38 }
 0x1b9   : > { %v2088_v39 = vmax.f32 %v1928_v32, %v1977_v36  ;;  %v1985_v47 = vsel %vm1033_vm3, %v1983_v38, %v4977_v16  ;;  %v2090_v26 = vmax.f32 %v1930_v33, %v1980_v45  ;;  %v2091_v55 = vmax.f32 %v1931_v48, %v1981_v11 }
 0x1ba   : > { %v2092_v25 = vmax.f32 %v1932_v13, %v1982_v53  ;;  %v2093_v49 = vmax.f32 %v1933_v24, %v1984_v58  ;;  %v2094_v54 = vmax.f32 %v1934_v61, %v1985_v47  ;;  %v2135_v42 = vrot.slane %v5352_v52, 4 }
 0x1bb   : > { %v2138_v6 = vrot.slane %v5432_v50, 4  ;;  %v2139_v44 = vrot.slane %v5437_v34, 4  ;;  %v2142_v7 = vrot.slane %v5497_v18, 4  ;;  %v2143_v32 = vrot.slane %v5500_v19, 4 }
 0x1bc   : > { %v2246_v51 = vmax.f32 %v2086_v41, %v2134_v37  ;;  %v1682_v43 = vrot.slane %v5563_v1, 1  ;;  %v2136_v36 = vsel %vm1195_vm4, %v2134_v37, %v2135_v42  ;;  %v2137_v13 = vsel %vm1195_vm4, %v2135_v42, %v4979_v17 }
 0x1bd   : > { %v2140_v24 = vsel %vm1195_vm4, %v2138_v6, %v2139_v44  ;;  %v2141_v52 = vsel %vm1195_vm4, %v2139_v44, %v4979_v17  ;;  %v2144_v50 = vsel %vm1195_vm4, %v2142_v7, %v2143_v32  ;;  %v2145_v34 = vsel %vm1195_vm4, %v2143_v32, %v4979_v17 }
 0x1be   : > { %v2247_v18 = vmax.f32 %v2087_v56, %v2136_v36  ;;  %v2248_v19 = vmax.f32 %v2088_v39, %v2137_v13  ;;  %v2249_v33 = vmax.f32 %v2089_v27, %v2138_v6  ;;  %v2250_v61 = vmax.f32 %v2090_v26, %v2140_v24 }
 0x1bf   : > { %v2251_v48 = vmax.f32 %v2091_v55, %v2141_v52  ;;  %v2252_v2 = vmax.f32 %v2092_v25, %v2142_v7  ;;  %v2253_v30 = vmax.f32 %v2093_v49, %v2144_v50  ;;  %v2254_v53 = vmax.f32 %v2094_v54, %v2145_v34 }
 0x1c0   : > { %v2342_v38 = vrot.slane %v2246_v51, 6  ;;  %v2343_v41 = vrot.slane %v2247_v18, 6  ;;  %v2345_v37 = vrot.slane %v2248_v19, 6  ;;  %v2347_v45 = vrot.slane %v2249_v33, 6 }
 0x1c1   : > { %v2348_v11 = vrot.slane %v2250_v61, 6  ;;  %v2350_v58 = vrot.slane %v2251_v48, 6  ;;  %v2352_v42 = vrot.slane %v2252_v2, 6  ;;  %v2353_v44 = vrot.slane %v2253_v30, 6 }
 0x1c2   : > { %v5951_v47 = vsel %vm1405_vm5, %v2342_v38, %v2343_v41  ;;  %v2355_v32 = vrot.slane %v2254_v53, 6  ;;  %v5954_v56 = vsel %vm1405_vm5, %v2343_v41, %v2345_v37  ;;  %v1683_v50 = vsel %vm726_vm1, %v4967_v9, %v1682_v43 }
 0x1c3   : > { %v5957_v39 = vsel %vm1405_vm5, %v2347_v45, %v2348_v11  ;;  %v5960_v27 = vsel %vm1405_vm5, %v2348_v11, %v2350_v58  ;;  %v2454_v26 = vmax.f32 %v5951_v47, 0.0  ;;  %v5964_v55 = vsel %vm1405_vm5, %v2352_v42, %v2353_v44 }
 0x1c4   : > { %v5967_v25 = vsel %vm1405_vm5, %v2353_v44, %v2355_v32  ;;  %v2455_v49 = vmax.f32 %v5954_v56, 0.0  ;;  %v2456_v54 = vmax.f32 %v5951_v47, %v5957_v39  ;;  %v2457_v6 = vmax.f32 %v5954_v56, %v5960_v27 }
 0x1c5   : > { %v2459_v7 = vmax.f32 %v5960_v27, %v5967_v25  ;;  %v2484_v51 = vmax.f32 %v2454_v26, %v5957_v39  ;;  %v4421_v36 = vpack.i.bf16 %v5967_v25, %v5964_v55  ;;  %v2458_v24 = vmax.f32 %v5957_v39, %v5964_v55 }
 0x1c6   : > { %v2485_v13 = vmax.f32 %v2455_v49, %v5960_v27  ;;  %v5983_v52 = vmax.f32 %v2456_v54, %v5964_v55  ;;  %v5988_v34 = vmax.f32 %v2457_v6, %v5967_v25  ;;  %v1684_v19 = vrot.slane %v5567_v40, 1 }
 0x1c7   : > { %4422 = vrot.lane.b32.xlu1 %v4421_v36, %s4742_s17  ;;  %v5992_v18 = vmax.f32 %v2484_v51, %v5964_v55  ;;  %v1791_v33 = vmax.f32 %v1683_v50, 0.0  ;;  %v1839_v48 = vrot.slane %v5563_v1, 2  ;;  %v1840_v2 = vrot.slane %v5567_v40, 2 }
 0x1c8   : > { %v5996_v61 = vmax.f32 %v2485_v13, %v5967_v25  ;;  %v1986_v30 = vrot.slane %v5563_v1, 3  ;;  %v1685_v53 = vsel %vm726_vm1, %v1682_v43, %v1684_v19  ;;  %v1793_v38 = vmax.f32 %v5567_v40, %v1684_v19 }
 0x1c9   : > { %8025 = vst [vmem:[#allocation59_spill] sm:$0xff] %v5992_v18  ;;  %v1987_v41 = vrot.slane %v5567_v40, 3  ;;  %v2146_v37 = vrot.slane %v5563_v1, 4  ;;  %v1792_v45 = vmax.f32 %v5563_v1, %v1685_v53  ;;  %v1841_v11 = vsel %vm888_vm2, %v1839_v48, %v1840_v2 }
 0x1ca   : > { %8026 = vst [vmem:[#allocation60_spill] sm:$0xff] %v5996_v61  ;;  %v1935_v58 = vmax.f32 %v1791_v33, %v1839_v48  ;;  %v2147_v42 = vrot.slane %v5567_v40, 4  ;;  %v1937_v44 = vmax.f32 %v1793_v38, %v1840_v2  ;;  %v1686_v43 = vrot.slane %v5693_v59, 1 }
 0x1cb   : > { %v1988_v32 = vsel %vm1033_vm3, %v1986_v30, %v1987_v41  ;;  %v1989_v26 = vsel %vm1033_vm3, %v1987_v41, %v4977_v16  ;;  %v1936_v49 = vmax.f32 %v1792_v45, %v1841_v11  ;;  %v1688_v40 = vrot.slane %v5686_v14, 1 }
 0x1cc   : > { %v2095_v54 = vmax.f32 %v1935_v58, %v1986_v30  ;;  %v2148_v6 = vsel %vm1195_vm4, %v2146_v37, %v2147_v42  ;;  %v2149_v1 = vsel %vm1195_vm4, %v2147_v42, %v4979_v17  ;;  %v2097_v51 = vmax.f32 %v1937_v44, %v1989_v26 }
 0x1cd   : > { %v1687_v36 = vsel %vm726_vm1, %v4967_v9, %v1686_v43  ;;  %v1842_v13 = vrot.slane %v5693_v59, 2  ;;  %v2096_v50 = vmax.f32 %v1936_v49, %v1988_v32  ;;  %v1843_v48 = vrot.slane %v5686_v14, 2 }
 0x1ce   : > { %v2255_v19 = vmax.f32 %v2095_v54, %v2146_v37  ;;  %v1794_v33 = vmax.f32 %v1687_v36, 0.0  ;;  %v2257_v2 = vmax.f32 %v2097_v51, %v2149_v1  ;;  %v1689_v30 = vsel %vm726_vm1, %v1686_v43, %v1688_v40 }
 0x1cf   : > { %v1796_v53 = vmax.f32 %v5686_v14, %v1688_v40  ;;  %v1990_v38 = vrot.slane %v5693_v59, 3  ;;  %v2256_v41 = vmax.f32 %v2096_v50, %v2148_v6  ;;  %v1795_v11 = vmax.f32 %v5693_v59, %v1689_v30 }
 0x1d0   : > { %v2357_v45 = vrot.slane %v2255_v19, 6  ;;  %v1844_v58 = vsel %vm888_vm2, %v1842_v13, %v1843_v48  ;;  %v2360_v42 = vrot.slane %v2257_v2, 6  ;;  %v1938_v44 = vmax.f32 %v1794_v33, %v1842_v13 }
 0x1d1   : > { %v1940_v32 = vmax.f32 %v1796_v53, %v1843_v48  ;;  %v1991_v37 = vrot.slane %v5686_v14, 3  ;;  %v2358_v26 = vrot.slane %v2256_v41, 6  ;;  %v1939_v49 = vmax.f32 %v1795_v11, %v1844_v58 }
 0x1d2   : > { %v2150_v54 = vrot.slane %v5693_v59, 4  ;;  %v2151_v43 = vrot.slane %v5686_v14, 4  ;;  %v2098_v51 = vmax.f32 %v1938_v44, %v1990_v38  ;;  %v764_v36 = vrot.slane %v5219_v10, 1 }
 0x1d3   : > { %v1992_v1 = vsel %vm1033_vm3, %v1990_v38, %v1991_v37  ;;  %v1993_v6 = vsel %vm1033_vm3, %v1991_v37, %v4977_v16  ;;  %v6033_v40 = vsel %vm1405_vm5, %v2357_v45, %v2358_v26  ;;  %v6036_v13 = vsel %vm1405_vm5, %v2358_v26, %v2360_v42 }
 0x1d4   : > { %v2099_v50 = vmax.f32 %v1939_v49, %v1992_v1  ;;  %v2100_v19 = vmax.f32 %v1940_v32, %v1993_v6  ;;  %v4431_v59 = vpack.i.bf16 %v6036_v13, %v6033_v40  ;;  %v2461_v14 = vmax.f32 %v5967_v25, %v6036_v13 }
 0x1d5   : > { %v6046_v33 = vmax.f32 %v2459_v7, %v6036_v13  ;;  %v2517_v48 = vmax.f32 %v5988_v34, %v6036_v13  ;;  %v6052_v2 = vmax.f32 %v5996_v61, %v6036_v13  ;;  %v2460_v30 = vmax.f32 %v5964_v55, %v6033_v40  ;;  %v8058_v61 = vld [vmem:[#allocation53_spill] sm:$0xff] }
 0x1d6   : > { %v6060_v53 = vmax.f32 %v2458_v24, %v6033_v40  ;;  %v2516_v25 = vmax.f32 %v5983_v52, %v6033_v40  ;;  %4432 = vrot.lane.b32.xlu1 %v4431_v59, %s4742_s17  ;;  %v6067_v7 = vmax.f32 %v5992_v18, %v6033_v40  ;;  %v2152_v34 = vsel %vm1195_vm4, %v2150_v54, %v2151_v43  ;;  %v8059_v18 = vld [vmem:[#allocation54_spill] sm:$0xff] }
 0x1d7   : > { %8027 = vst [vmem:[#allocation61_spill] sm:$0xff] %v6052_v2  ;;  %v2153_v38 = vsel %vm1195_vm4, %v2151_v43, %v4979_v17  ;;  %v2258_v41 = vmax.f32 %v2098_v51, %v2150_v54  ;;  %v2259_v45 = vmax.f32 %v2099_v50, %v2152_v34  ;;  %v765_v55 = vsel %vm726_vm1, %v4967_v9, %v764_v36 }
 0x1d8   : > { %8028 = vst [vmem:[#allocation62_spill] sm:$0xff] %v6067_v7  ;;  %v2260_v11 = vmax.f32 %v2100_v19, %v2153_v38  ;;  %v766_v24 = vrot.slane %v5337_v21, 1  ;;  %v867_v58 = vmax.f32 %v765_v55, 0.0  ;;  %v916_v42 = vrot.slane %v5219_v10, 2 }
 0x1d9   : > { %v2362_v52 = vrot.slane %v2258_v41, 6  ;;  %v917_v44 = vrot.slane %v5337_v21, 2  ;;  %v2363_v32 = vrot.slane %v2259_v45, 6  ;;  %v1071_v6 = vrot.slane %v5219_v10, 3 }
 0x1da   : > { %v2365_v37 = vrot.slane %v2260_v11, 6  ;;  %v767_v26 = vsel %vm726_vm1, %v764_v36, %v766_v24  ;;  %v869_v49 = vmax.f32 %v5337_v21, %v766_v24  ;;  %v1012_v1 = vmax.f32 %v867_v58, %v916_v42 }
 0x1db   : > { %v868_v54 = vmax.f32 %v5219_v10, %v767_v26  ;;  %v918_v43 = vsel %vm888_vm2, %v916_v42, %v917_v44  ;;  %v6083_v51 = vsel %vm1405_vm5, %v2362_v52, %v2363_v32  ;;  %v1072_v59 = vrot.slane %v5337_v21, 3 }
 0x1dc   : > { %v6086_v50 = vsel %vm1405_vm5, %v2363_v32, %v2365_v37  ;;  %v1014_v19 = vmax.f32 %v869_v49, %v917_v44  ;;  %v6096_v41 = vmax.f32 %v2460_v30, %v6083_v51  ;;  %v6106_v24 = vmax.f32 %v2516_v25, %v6083_v51 }
 0x1dd   : > { %v4441_v36 = vpack.i.bf16 %v6086_v50, %v6083_v51  ;;  %v6099_v45 = vmax.f32 %v2461_v14, %v6086_v50  ;;  %v6110_v52 = vmax.f32 %v2517_v48, %v6086_v50  ;;  %v1013_v58 = vmax.f32 %v868_v54, %v918_v43 }
 0x1de   : > { %v1073_v30 = vsel %vm1033_vm3, %v1071_v6, %v1072_v59  ;;  %v1074_v14 = vsel %vm1033_vm3, %v1072_v59, %v4977_v16  ;;  %v1174_v42 = vmax.f32 %v1012_v1, %v1071_v6  ;;  %v1233_v32 = vrot.slane %v5219_v10, 4 }
 0x1df   : > { %4442 = vrot.lane.b32.xlu0 %v4441_v36, %s4742_s17  ;;  %v1176_v44 = vmax.f32 %v1014_v19, %v1074_v14  ;;  %v1234_v37 = vrot.slane %v5337_v21, 4  ;;  %v1175_v26 = vmax.f32 %v1013_v58, %v1073_v30  ;;  %v768_v25 = vrot.slane %v5388_v15, 1 }
 0x1e0   : > { %v770_v49 = vrot.slane %v5466_v0, 1  ;;  %v919_v48 = vrot.slane %v5388_v15, 2  ;;  %v1336_v36 = vmax.f32 %v1174_v42, %v1233_v32  ;;  %v920_v1 = vrot.slane %v5466_v0, 2 }
 0x1e1   : > { %v1235_v54 = vsel %vm1195_vm4, %v1233_v32, %v1234_v37  ;;  %v1236_v43 = vsel %vm1195_vm4, %v1234_v37, %v4979_v17  ;;  %v769_v10 = vsel %vm726_vm1, %v4967_v9, %v768_v25  ;;  %v1075_v42 = vrot.slane %v5388_v15, 3 }
 0x1e2   : > { %v1337_v6 = vmax.f32 %v1175_v26, %v1235_v54  ;;  %v1338_v19 = vmax.f32 %v1176_v44, %v1236_v43  ;;  %v771_v21 = vsel %vm726_vm1, %v768_v25, %v770_v49  ;;  %v1451_v59 = vrot.slane %v1336_v36, 6 }
 0x1e3   : > { %v870_v58 = vmax.f32 %v769_v10, 0.0  ;;  %v871_v30 = vmax.f32 %v5388_v15, %v771_v21  ;;  %v872_v14 = vmax.f32 %v5466_v0, %v770_v49  ;;  %v921_v37 = vsel %vm888_vm2, %v919_v48, %v920_v1 }
 0x1e4   : > { %v1452_v11 = vrot.slane %v1337_v6, 6  ;;  %v1454_v55 = vrot.slane %v1338_v19, 6  ;;  %v1076_v54 = vrot.slane %v5466_v0, 3  ;;  %v1237_v36 = vrot.slane %v5388_v15, 4 }
 0x1e5   : > { %v1015_v32 = vmax.f32 %v870_v58, %v919_v48  ;;  %v1016_v26 = vmax.f32 %v871_v30, %v921_v37  ;;  %v1017_v44 = vmax.f32 %v872_v14, %v920_v1  ;;  %v1238_v49 = vrot.slane %v5466_v0, 4 }
 0x1e6   : > { %v6133_v43 = vsel %vm1405_vm5, %v1451_v59, %v1452_v11  ;;  %v6136_v25 = vsel %vm1405_vm5, %v1452_v11, %v1454_v55  ;;  %v8029_v19 = vmax.f32 %v5802_v23, %v5872_v62  ;;  %v8030_v15 = vmax.f32 %v5805_v20, %v5879_v12 }
 0x1e7   : > { %v4436_v6 = vpack.i.bf16 %v6136_v25, %v6133_v43  ;;  %v1536_v48 = vmax.f32 %v5872_v62, %v6133_v43  ;;  %v1537_v1 = vmax.f32 %v5879_v12, %v6136_v25  ;;  %v1592_v11 = vmax.f32 %v5884_v29, %v6133_v43 }
 0x1e8   : > { %v6150_v10 = vmax.f32 %v8029_v19, %v6133_v43  ;;  %v6156_v0 = vmax.f32 %v8030_v15, %v6136_v25  ;;  %v1593_v55 = vmax.f32 %v5893_v8, %v6136_v25  ;;  %v8031_v21 = vmax.f32 %v5824_v35, %v5872_v62 }
 0x1e9   : > { %v8032_v23 = vmax.f32 %v5818_v46, %v5879_v12  ;;  %4437 = vrot.lane.b32.xlu1 %v4436_v6, %s4741_s13  ;;  %v1077_v20 = vsel %vm1033_vm3, %v1075_v42, %v1076_v54  ;;  %v1078_v29 = vsel %vm1033_vm3, %v1076_v54, %v4977_v16  ;;  %v1177_v8 = vmax.f32 %v1015_v32, %v1075_v42 }
 0x1ea   : > { %v6166_v59 = vmax.f32 %v8031_v21, %v6133_v43  ;;  %v1178_v30 = vmax.f32 %v1016_v26, %v1077_v20  ;;  %v1179_v14 = vmax.f32 %v1017_v44, %v1078_v29  ;;  %v1239_v35 = vsel %vm1195_vm4, %v1237_v36, %v1238_v49 }
 0x1eb   : > { %v6172_v58 = vmax.f32 %v8032_v23, %v6136_v25  ;;  %v1240_v62 = vsel %vm1195_vm4, %v1238_v49, %v4979_v17  ;;  %v1339_v37 = vmax.f32 %v1177_v8, %v1237_v36  ;;  %v1690_v46 = vrot.slane %v5834_v4, 1 }
 0x1ec   : > { %v1692_v12 = vrot.slane %v5841_v63, 1  ;;  %v1845_v6 = vrot.slane %v5834_v4, 2  ;;  %v1340_v19 = vmax.f32 %v1178_v30, %v1239_v35  ;;  %v1341_v15 = vmax.f32 %v1179_v14, %v1240_v62 }
 0x1ed   : > { %v1846_v21 = vrot.slane %v5841_v63, 2  ;;  %v1994_v42 = vrot.slane %v5834_v4, 3  ;;  %v1456_v32 = vrot.slane %v1339_v37, 6  ;;  %v1691_v26 = vsel %vm726_vm1, %v4967_v9, %v1690_v46 }
 0x1ee   : > { %v1693_v44 = vsel %vm726_vm1, %v1690_v46, %v1692_v12  ;;  %v1799_v54 = vmax.f32 %v5841_v63, %v1692_v12  ;;  %v1457_v36 = vrot.slane %v1340_v19, 6  ;;  %v1459_v49 = vrot.slane %v1341_v15, 6 }
 0x1ef   : > { %v1797_v23 = vmax.f32 %v1691_v26, 0.0  ;;  %v1798_v20 = vmax.f32 %v5834_v4, %v1693_v44  ;;  %v1847_v29 = vsel %vm888_vm2, %v1845_v6, %v1846_v21  ;;  %v1995_v30 = vrot.slane %v5841_v63, 3 }
 0x1f0   : > { %v1943_v8 = vmax.f32 %v1799_v54, %v1846_v21  ;;  %v2154_v14 = vrot.slane %v5834_v4, 4  ;;  %v6195_v35 = vsel %vm1405_vm5, %v1456_v32, %v1457_v36  ;;  %v6198_v62 = vsel %vm1405_vm5, %v1457_v36, %v1459_v49 }
 0x1f1   : > { %v1941_v37 = vmax.f32 %v1797_v23, %v1845_v6  ;;  %v1942_v46 = vmax.f32 %v1798_v20, %v1847_v29  ;;  %v4446_v12 = vpack.i.bf16 %v6198_v62, %v6195_v35  ;;  %v6207_v21 = vmax.f32 %v1536_v48, %v6195_v35 }
 0x1f2   : > { %v6210_v4 = vmax.f32 %v1537_v1, %v6198_v62  ;;  %v6217_v26 = vmax.f32 %v1592_v11, %v6195_v35  ;;  %v6220_v44 = vmax.f32 %v1593_v55, %v6198_v62  ;;  %v1996_v48 = vsel %vm1033_vm3, %v1994_v42, %v1995_v30 }
 0x1f3   : > { %4447 = vrot.lane.b32.xlu0 %v4446_v12, %s4741_s13  ;;  %v1997_v1 = vsel %vm1033_vm3, %v1995_v30, %v4977_v16  ;;  %v2101_v54 = vmax.f32 %v1941_v37, %v1994_v42  ;;  %v2102_v36 = vmax.f32 %v1942_v46, %v1996_v48  ;;  %v2155_v23 = vrot.slane %v5841_v63, 4 }
 0x1f4   : > { %v2103_v49 = vmax.f32 %v1943_v8, %v1997_v1  ;;  %v1694_v20 = vrot.slane %v5898_v3, 1  ;;  %v1696_v11 = vrot.slane %v5901_v28, 1  ;;  %v1848_v55 = vrot.slane %v5898_v3, 2 }
 0x1f5   : > { %v2261_v29 = vmax.f32 %v2101_v54, %v2154_v14  ;;  %v1849_v6 = vrot.slane %v5901_v28, 2  ;;  %v2156_v12 = vsel %vm1195_vm4, %v2154_v14, %v2155_v23  ;;  %v2157_v32 = vsel %vm1195_vm4, %v2155_v23, %v4979_v17 }
 0x1f6   : > { %v1695_v42 = vsel %vm726_vm1, %v4967_v9, %v1694_v20  ;;  %v1998_v8 = vrot.slane %v5898_v3, 3  ;;  %v2262_v63 = vmax.f32 %v2102_v36, %v2156_v12  ;;  %v2263_v30 = vmax.f32 %v2103_v49, %v2157_v32 }
 0x1f7   : > { %v2367_v37 = vrot.slane %v2261_v29, 6  ;;  %v1697_v46 = vsel %vm726_vm1, %v1694_v20, %v1696_v11  ;;  %v1800_v48 = vmax.f32 %v1695_v42, 0.0  ;;  %v1802_v54 = vmax.f32 %v5901_v28, %v1696_v11 }
 0x1f8   : > { %v1801_v1 = vmax.f32 %v5898_v3, %v1697_v46  ;;  %v1850_v14 = vsel %vm888_vm2, %v1848_v55, %v1849_v6  ;;  %v2368_v15 = vrot.slane %v2262_v63, 6  ;;  %v2370_v19 = vrot.slane %v2263_v30, 6 }
 0x1f9   : > { %v1999_v23 = vrot.slane %v5901_v28, 3  ;;  %v2158_v38 = vrot.slane %v5898_v3, 4  ;;  %v1944_v34 = vmax.f32 %v1800_v48, %v1848_v55  ;;  %v1946_v36 = vmax.f32 %v1802_v54, %v1849_v6 }
 0x1fa   : > { %v1945_v2 = vmax.f32 %v1801_v1, %v1850_v14  ;;  %v2159_v32 = vrot.slane %v5901_v28, 4  ;;  %v6245_v49 = vsel %vm1405_vm5, %v2367_v37, %v2368_v15  ;;  %v6248_v20 = vsel %vm1405_vm5, %v2368_v15, %v2370_v19 }
 0x1fb   : > { %v2000_v29 = vsel %vm1033_vm3, %v1998_v8, %v1999_v23  ;;  %v2001_v11 = vsel %vm1033_vm3, %v1999_v23, %v4977_v16  ;;  %v4451_v12 = vpack.i.bf16 %v6248_v20, %v6245_v49  ;;  %v2464_v3 = vmax.f32 %v6083_v51, %v6245_v49 }
 0x1fc   : > { %v2465_v28 = vmax.f32 %v6086_v50, %v6248_v20  ;;  %v8033_v6 = vmax.f32 %v6033_v40, %v6083_v51  ;;  %v8034_v15 = vmax.f32 %v6036_v13, %v6086_v50  ;;  %v2521_v42 = vmax.f32 %v6099_v45, %v6248_v20 }
 0x1fd   : > { %v8035_v63 = vmax.f32 %v6046_v33, %v6086_v50  ;;  %v2520_v40 = vmax.f32 %v6096_v41, %v6245_v49  ;;  %4452 = vrot.lane.b32.xlu1 %v4451_v12, %s4742_s17  ;;  %v8036_v13 = vmax.f32 %v6060_v53, %v6083_v51  ;;  %v2104_v46 = vmax.f32 %v1944_v34, %v1998_v8 }
 0x1fe   : > { %v6263_v19 = vmax.f32 %v8033_v6, %v6245_v49  ;;  %v6269_v55 = vmax.f32 %v8034_v15, %v6248_v20  ;;  %v2105_v48 = vmax.f32 %v1945_v2, %v2000_v29  ;;  %v2106_v45 = vmax.f32 %v1946_v36, %v2001_v11 }
 0x1ff   : > { %v6277_v30 = vmax.f32 %v8035_v63, %v6248_v20  ;;  %v6286_v37 = vmax.f32 %v8036_v13, %v6245_v49  ;;  %v2160_v1 = vsel %vm1195_vm4, %v2158_v38, %v2159_v32  ;;  %v2161_v33 = vsel %vm1195_vm4, %v2159_v32, %v4979_v17 }
 0x200   : > { %v772_v50 = vrot.slane %v5396_v22, 1  ;;  %v774_v41 = vrot.slane %v5472_v60, 1  ;;  %v2264_v54 = vmax.f32 %v2104_v46, %v2158_v38  ;;  %v2265_v14 = vmax.f32 %v2105_v48, %v2160_v1 }
 0x201   : > { %v2266_v23 = vmax.f32 %v2106_v45, %v2161_v33  ;;  %v922_v12 = vrot.slane %v5396_v22, 2  ;;  %v923_v34 = vrot.slane %v5472_v60, 2  ;;  %v1079_v15 = vrot.slane %v5396_v22, 3 }
 0x202   : > { %v773_v53 = vsel %vm726_vm1, %v4967_v9, %v772_v50  ;;  %v775_v2 = vsel %vm726_vm1, %v772_v50, %v774_v41  ;;  %v875_v51 = vmax.f32 %v5472_v60, %v774_v41  ;;  %v2372_v8 = vrot.slane %v2264_v54, 6 }
 0x203   : > { %v2373_v36 = vrot.slane %v2265_v14, 6  ;;  %v2375_v32 = vrot.slane %v2266_v23, 6  ;;  %v873_v29 = vmax.f32 %v773_v53, 0.0  ;;  %v874_v11 = vmax.f32 %v5396_v22, %v775_v2 }
 0x204   : > { %v924_v38 = vsel %vm888_vm2, %v922_v12, %v923_v34  ;;  %v1020_v6 = vmax.f32 %v875_v51, %v923_v34  ;;  %v1080_v48 = vrot.slane %v5472_v60, 3  ;;  %v1241_v34 = vrot.slane %v5396_v22, 4 }
 0x205   : > { %v6303_v63 = vsel %vm1405_vm5, %v2372_v8, %v2373_v36  ;;  %v6306_v13 = vsel %vm1405_vm5, %v2373_v36, %v2375_v32  ;;  %v1018_v46 = vmax.f32 %v873_v29, %v922_v12  ;;  %v1019_v53 = vmax.f32 %v874_v11, %v924_v38 }
 0x206   : > { %v4461_v45 = vpack.i.bf16 %v6306_v13, %v6303_v63  ;;  %v2466_v1 = vmax.f32 %v6245_v49, %v6303_v63  ;;  %v6316_v50 = vmax.f32 %v2465_v28, %v6306_v13  ;;  %v6319_v41 = vmax.f32 %v2464_v3, %v6303_v63 }
 0x207   : > { %v6326_v23 = vmax.f32 %v2520_v40, %v6303_v63  ;;  %v6330_v12 = vmax.f32 %v2521_v42, %v6306_v13  ;;  %v1081_v28 = vsel %vm1033_vm3, %v1079_v15, %v1080_v48  ;;  %v1082_v3 = vsel %vm1033_vm3, %v1080_v48, %v4977_v16 }
 0x208   : > { %4462 = vrot.lane.b32.xlu0 %v4461_v45, %s4742_s17  ;;  %v1180_v2 = vmax.f32 %v1018_v46, %v1079_v15  ;;  %v1182_v51 = vmax.f32 %v1020_v6, %v1082_v3  ;;  %v1242_v8 = vrot.slane %v5472_v60, 4  ;;  %v1181_v36 = vmax.f32 %v1019_v53, %v1081_v28 }
 0x209   : > { %v8037_v40 = vrot.slane %v5571_v5, 1  ;;  %v778_v42 = vrot.slane %v5698_v57, 1  ;;  %v925_v29 = vrot.slane %v5571_v5, 2  ;;  %v926_v3 = vrot.slane %v5698_v57, 2 }
 0x20a   : > { %v1243_v11 = vsel %vm1195_vm4, %v1241_v34, %v1242_v8  ;;  %v1244_v38 = vsel %vm1195_vm4, %v1242_v8, %v4979_v17  ;;  %v1342_v6 = vmax.f32 %v1180_v2, %v1241_v34  ;;  %v1083_v8 = vrot.slane %v5571_v5, 3 }
 0x20b   : > { %v777_v32 = vsel %vm726_vm1, %v4967_v9, %v8037_v40  ;;  %v1343_v22 = vmax.f32 %v1181_v36, %v1243_v11  ;;  %v1344_v46 = vmax.f32 %v1182_v51, %v1244_v38  ;;  %v8038_v60 = vmov %v8037_v40 }
 0x20c   : > { %v876_v15 = vmax.f32 %v777_v32, 0.0  ;;  %v779_v48 = vsel %vm726_vm1, %v8038_v60, %v778_v42  ;;  %v878_v45 = vmax.f32 %v5698_v57, %v778_v42  ;;  %v1461_v53 = vrot.slane %v1342_v6, 6 }
 0x20d   : > { %v877_v28 = vmax.f32 %v5571_v5, %v779_v48  ;;  %v1462_v14 = vrot.slane %v1343_v22, 6  ;;  %v1464_v54 = vrot.slane %v1344_v46, 6  ;;  %v1084_v2 = vrot.slane %v5698_v57, 3 }
 0x20e   : > { %v1021_v40 = vmax.f32 %v876_v15, %v925_v29  ;;  %v927_v51 = vsel %vm888_vm2, %v925_v29, %v926_v3  ;;  %v1023_v34 = vmax.f32 %v878_v45, %v926_v3  ;;  %v1245_v36 = vrot.slane %v5571_v5, 4 }
 0x20f   : > { %v1246_v32 = vrot.slane %v5698_v57, 4  ;;  %v6358_v42 = vsel %vm1405_vm5, %v1461_v53, %v1462_v14  ;;  %v6361_v11 = vsel %vm1405_vm5, %v1462_v14, %v1464_v54  ;;  %v1022_v38 = vmax.f32 %v877_v28, %v927_v51 }
 0x210   : > { %v1085_v6 = vsel %vm1033_vm3, %v1083_v8, %v1084_v2  ;;  %v4456_v15 = vpack.i.bf16 %v6361_v11, %v6358_v42  ;;  %v1540_v29 = vmax.f32 %v6195_v35, %v6358_v42  ;;  %v1541_v5 = vmax.f32 %v6198_v62, %v6361_v11 }
 0x211   : > { %v8039_v57 = vmax.f32 %v6133_v43, %v6195_v35  ;;  %v8040_v54 = vmax.f32 %v6136_v25, %v6198_v62  ;;  %v1596_v46 = vmax.f32 %v6207_v21, %v6358_v42  ;;  %v1597_v60 = vmax.f32 %v6210_v4, %v6361_v11 }
 0x212   : > { %v8041_v48 = vmax.f32 %v6150_v10, %v6195_v35  ;;  %v8042_v43 = vmax.f32 %v6156_v0, %v6198_v62  ;;  %4457 = vrot.lane.b32.xlu1 %v4456_v15, %s4741_s13  ;;  %v1086_v25 = vsel %vm1033_vm3, %v1084_v2, %v4977_v16  ;;  %v1183_v21 = vmax.f32 %v1021_v40, %v1083_v8 }
 0x213   : > { %v6374_v22 = vmax.f32 %v8039_v57, %v6358_v42  ;;  %v6380_v14 = vmax.f32 %v8040_v54, %v6361_v11  ;;  %v1184_v28 = vmax.f32 %v1022_v38, %v1085_v6  ;;  %v1185_v4 = vmax.f32 %v1023_v34, %v1086_v25 }
 0x214   : > { %v6390_v45 = vmax.f32 %v8041_v48, %v6358_v42  ;;  %v6396_v53 = vmax.f32 %v8042_v43, %v6361_v11  ;;  %v1247_v3 = vsel %vm1195_vm4, %v1245_v36, %v1246_v32  ;;  %v1248_v10 = vsel %vm1195_vm4, %v1246_v32, %v4979_v17 }
 0x215   : > { %v1698_v35 = vrot.slane %v6166_v59, 1  ;;  %v1345_v51 = vmax.f32 %v1183_v21, %v1245_v36  ;;  %v1346_v57 = vmax.f32 %v1184_v28, %v1247_v3  ;;  %v1700_v0 = vrot.slane %v6172_v58, 1 }
 0x216   : > { %v1851_v62 = vrot.slane %v6166_v59, 2  ;;  %v1347_v15 = vmax.f32 %v1185_v4, %v1248_v10  ;;  %v1852_v40 = vrot.slane %v6172_v58, 2  ;;  %v2002_v8 = vrot.slane %v6166_v59, 3 }
 0x217   : > { %v1699_v2 = vsel %vm726_vm1, %v4967_v9, %v1698_v35  ;;  %v1466_v34 = vrot.slane %v1345_v51, 6  ;;  %v1467_v38 = vrot.slane %v1346_v57, 6  ;;  %v1701_v32 = vsel %vm726_vm1, %v1698_v35, %v1700_v0  ;;  %v8043_v51 = vld [vmem:[#allocation43_spill] sm:$0xff] }
 0x218   : > { %v1803_v6 = vmax.f32 %v1699_v2, 0.0  ;;  %v1469_v54 = vrot.slane %v1347_v15, 6  ;;  %v1804_v36 = vmax.f32 %v6166_v59, %v1701_v32  ;;  %v1805_v48 = vmax.f32 %v6172_v58, %v1700_v0  ;;  %v8045_v0 = vld [vmem:[#allocation47_spill] sm:$0xff] }
 0x219   : > { %v1853_v43 = vsel %vm888_vm2, %v1851_v62, %v1852_v40  ;;  %v6416_v25 = vsel %vm1405_vm5, %v1466_v34, %v1467_v38  ;;  %v2003_v28 = vrot.slane %v6172_v58, 3  ;;  %v2162_v4 = vrot.slane %v6166_v59, 4 }
 0x21a   : > { %v1947_v21 = vmax.f32 %v1803_v6, %v1851_v62  ;;  %v6421_v3 = vsel %vm1405_vm5, %v1467_v38, %v1469_v54  ;;  %v6426_v35 = vmax.f32 %v1540_v29, %v6416_v25  ;;  %v6440_v15 = vmax.f32 %v1596_v46, %v6416_v25 }
 0x21b   : > { %v4466_v57 = vpack.i.bf16 %v6421_v3, %v6416_v25  ;;  %v6435_v59 = vmax.f32 %v1541_v5, %v6421_v3  ;;  %v6443_v29 = vmax.f32 %v1597_v60, %v6421_v3  ;;  %v1948_v2 = vmax.f32 %v1804_v36, %v1853_v43 }
 0x21c   : > { %v1949_v34 = vmax.f32 %v1805_v48, %v1852_v40  ;;  %v2004_v38 = vsel %vm1033_vm3, %v2002_v8, %v2003_v28  ;;  %v2005_v32 = vsel %vm1033_vm3, %v2003_v28, %v4977_v16  ;;  %v2107_v5 = vmax.f32 %v1947_v21, %v2002_v8 }
 0x21d   : > { %4467 = vrot.lane.b32.xlu0 %v4466_v57, %s4741_s13  ;;  %v2163_v6 = vrot.slane %v6172_v58, 4  ;;  %v2108_v54 = vmax.f32 %v1948_v2, %v2004_v38  ;;  %v8044_v46 = vrot.slane %v8043_v51, 1  ;;  %v782_v36 = vrot.slane %v8045_v0, 1 }
 0x21e   : > { %v2109_v62 = vmax.f32 %v1949_v34, %v2005_v32  ;;  %v2267_v43 = vmax.f32 %v2107_v5, %v2162_v4  ;;  %v928_v32 = vrot.slane %v8043_v51, 2  ;;  %v1088_v5 = vrot.slane %v8045_v0, 3 }
 0x21f   : > { %v781_v60 = vsel %vm726_vm1, %v4967_v9, %v8044_v46  ;;  %v2164_v40 = vsel %vm1195_vm4, %v2162_v4, %v2163_v6  ;;  %v2165_v48 = vsel %vm1195_vm4, %v2163_v6, %v4979_v17  ;;  %v8046_v58 = vmov %v8044_v46 }
 0x220   : > { %v879_v57 = vmax.f32 %v781_v60, 0.0  ;;  %v2268_v28 = vmax.f32 %v2108_v54, %v2164_v40  ;;  %v2269_v8 = vmax.f32 %v2109_v62, %v2165_v48  ;;  %v783_v21 = vsel %vm726_vm1, %v8046_v58, %v782_v36  ;;  %v8053_v58 = vld [vmem:[#allocation56_spill] sm:$0xff] }
 0x221   : > { %v881_v2 = vmax.f32 %v8045_v0, %v782_v36  ;;  %v2377_v34 = vrot.slane %v2267_v43, 6  ;;  %v880_v38 = vmax.f32 %v8043_v51, %v783_v21  ;;  %v929_v46 = vrot.slane %v8045_v0, 2 }
 0x222   : > { %v2378_v10 = vrot.slane %v2268_v28, 6  ;;  %v2380_v33 = vrot.slane %v2269_v8, 6  ;;  %v1087_v4 = vrot.slane %v8043_v51, 3  ;;  %v1024_v6 = vmax.f32 %v879_v57, %v928_v32  ;;  %v8054_v57 = vld [vmem:[#allocation48_spill] sm:$0xff] }
 0x223   : > { %v930_v62 = vsel %vm888_vm2, %v928_v32, %v929_v46  ;;  %v1026_v54 = vmax.f32 %v881_v2, %v929_v46  ;;  %v1249_v60 = vrot.slane %v8043_v51, 4  ;;  %v8048_v2 = vmax.f32 %v6263_v19, %v6303_v63  ;;  %v8050_v19 = vld [vmem:[#allocation52_spill] sm:$0xff] }
 0x224   : > { %v6470_v36 = vsel %vm1405_vm5, %v2377_v34, %v2378_v10  ;;  %v6473_v40 = vsel %vm1405_vm5, %v2378_v10, %v2380_v33  ;;  %v1025_v48 = vmax.f32 %v880_v38, %v930_v62  ;;  %v1089_v43 = vsel %vm1033_vm3, %v1087_v4, %v1088_v5 }
 0x225   : > { %v4471_v28 = vpack.i.bf16 %v6473_v40, %v6470_v36  ;;  %v6486_v51 = vmax.f32 %v2466_v1, %v6470_v36  ;;  %v8047_v33 = vmax.f32 %v6248_v20, %v6306_v13  ;;  %v6502_v34 = vmax.f32 %v8048_v2, %v6470_v36 }
 0x226   : > { %v8049_v49 = vmax.f32 %v6269_v55, %v6306_v13  ;;  %v1090_v20 = vsel %vm1033_vm3, %v1088_v5, %v4977_v16  ;;  %v1186_v38 = vmax.f32 %v1024_v6, %v1087_v4  ;;  %v1187_v32 = vmax.f32 %v1025_v48, %v1089_v43  ;;  %v8055_v55 = vld [vmem:[#allocation51_spill] sm:$0xff]  ;;  %v8061_v6 = vld [vmem:[#allocation58_spill] sm:$0xff] }
 0x227   : > { %v6492_v10 = vmax.f32 %v8047_v33, %v6473_v40  ;;  %4472 = vrot.lane.b32.xlu1 %v4471_v28, %s4742_s17  ;;  %v1188_v46 = vmax.f32 %v1026_v54, %v1090_v20  ;;  %v1250_v62 = vrot.slane %v8045_v0, 4  ;;  %v8051_v33 = vld [vmem:[#allocation50_spill] sm:$0xff]  ;;  %v8057_v28 = vld [vmem:[#allocation57_spill] sm:$0xff]  ;;  %v8060_v5 = vmax.f32 %v8058_v61, %v8059_v18  ;;  %v8063_v48 = vld [vmem:[#allocation55_spill] sm:$0xff] }
 0x228   : > { %v6508_v1 = vmax.f32 %v8049_v49, %v6473_v40  ;;  %v8052_v2 = vmax.f32 %v8050_v19, %v8051_v33  ;;  %v8056_v49 = vmax.f32 %v8054_v57, %v8055_v55  ;;  %v1348_v7 = vmax.f32 %v1186_v38, %v1249_v60  ;;  %v8062_v54 = vld [vmem:[#allocation49_spill] sm:$0xff] }
 0x229   : > { %v1355_v4 = vmax.f32 %v8060_v5, %v8057_v28  ;;  %v8064_v0 = vmax.f32 %v8062_v54, %v8063_v48  ;;  %v2614_v20 = vrot.slane %v6106_v24, 1  ;;  %v1252_v19 = vsel %vm1195_vm4, %v1250_v62, %v4979_v17  ;;  %v8065_v18 = vld [vmem:[#allocation45_spill] sm:$0xff] }
 0x22a   : > { %v1352_v21 = vmax.f32 %v8052_v2, %v5758_v31  ;;  %v1353_v8 = vmax.f32 %v8056_v49, %v8053_v58  ;;  %v1251_v31 = vsel %vm1195_vm4, %v1249_v60, %v1250_v62  ;;  %v1350_v33 = vmax.f32 %v1188_v46, %v1252_v19 }
 0x22b   : > { %v1356_v43 = vmax.f32 %v8064_v0, %v8061_v6  ;;  %v1349_v38 = vmax.f32 %v1187_v32, %v1251_v31  ;;  %v1471_v2 = vrot.slane %v1348_v7, 6  ;;  %v1482_v55 = vrot.slane %v1355_v4, 6 }
 0x22c   : > { %v1477_v57 = vrot.slane %v1352_v21, 6  ;;  %v1479_v58 = vrot.slane %v1353_v8, 6  ;;  %v8066_v61 = vrot.slane %v8065_v18, 6  ;;  %v2615_v60 = vsel %vm726_vm1, %v4967_v9, %v2614_v20  ;;  %v8067_v21 = vld [vmem:[#allocation46_spill] sm:$0xff] }
 0x22d   : > { %v1484_v5 = vrot.slane %v1356_v43, 6  ;;  %v1472_v6 = vrot.slane %v1349_v38, 6  ;;  %v1474_v62 = vrot.slane %v1350_v33, 6  ;;  %v8068_v8 = vrot.slane %v8067_v21, 6 }
 0x22e   : > { %v6537_v49 = vsel %vm1405_vm5, %v8066_v61, %v1477_v57  ;;  %v6540_v28 = vsel %vm1405_vm5, %v1477_v57, %v1479_v58  ;;  %v2616_v7 = vrot.slane %v6110_v52, 1  ;;  %v2724_v4 = vmax.f32 %v2615_v60, 0.0 }
 0x22f   : > { %v6547_v32 = vsel %vm1405_vm5, %v8068_v8, %v1482_v55  ;;  %v6551_v46 = vsel %vm1405_vm5, %v1482_v55, %v1484_v5  ;;  %v2772_v54 = vrot.slane %v6106_v24, 2  ;;  %v2773_v48 = vrot.slane %v6110_v52, 2 }
 0x230   : > { %v1473_v0 = vsel %vm1405_vm5, %v1471_v2, %v1472_v6  ;;  %v1475_v43 = vsel %vm1405_vm5, %v1472_v6, %v1474_v62  ;;  %v2617_v31 = vsel %vm726_vm1, %v2614_v20, %v2616_v7  ;;  %v2726_v19 = vmax.f32 %v6110_v52, %v2616_v7 }
 0x231   : > { %v1547_v57 = vmax.f32 %v1475_v43, %v6540_v28  ;;  %v4476_v58 = vpack.i.bf16 %v1475_v43, %v1473_v0  ;;  %v1544_v38 = vmax.f32 %v6416_v25, %v1473_v0  ;;  %v1545_v33 = vmax.f32 %v6421_v3, %v1475_v43 }
 0x232   : > { %v1546_v55 = vmax.f32 %v1473_v0, %v6537_v49  ;;  %v8069_v18 = vmax.f32 %v6358_v42, %v6416_v25  ;;  %v8070_v2 = vmax.f32 %v6361_v11, %v6421_v3  ;;  %v1600_v20 = vmax.f32 %v6426_v35, %v1473_v0 }
 0x233   : > { %v1577_v60 = vmax.f32 %v1547_v57, %v6551_v46  ;;  %v1574_v6 = vmax.f32 %v1544_v38, %v6537_v49  ;;  %v1575_v62 = vmax.f32 %v1545_v33, %v6540_v28  ;;  %v1601_v21 = vmax.f32 %v6435_v59, %v1475_v43  ;;  %4477 = vrot.lane.b32.xlu1 %v4476_v58, %s4741_s13 }
 0x234   : > { %v1572_v61 = vmax.f32 %v8069_v18, %v1473_v0  ;;  %v1573_v5 = vmax.f32 %v8070_v2, %v1475_v43  ;;  %v1576_v8 = vmax.f32 %v1546_v55, %v6547_v32  ;;  %v8071_v11 = vmax.f32 %v6374_v22, %v6416_v25 }
 0x235   : > { %v1607_v57 = vmax.f32 %v1577_v60, 0.0  ;;  %v1604_v38 = vmax.f32 %v1574_v6, %v6547_v32  ;;  %v1605_v33 = vmax.f32 %v1575_v62, %v6551_v46  ;;  %v8072_v59 = vmax.f32 %v6380_v14, %v6421_v3 }
 0x236   : > { %v1602_v42 = vmax.f32 %v1572_v61, %v6537_v49  ;;  %v1603_v7 = vmax.f32 %v1573_v5, %v6540_v28  ;;  %v6581_v35 = vmax.f32 %v8071_v11, %v1473_v0  ;;  %v1606_v55 = vmax.f32 %v1576_v8, 0.0 }
 0x237   : > { %v6588_v58 = vmax.f32 %v8072_v59, %v1475_v43  ;;  %v6591_v18 = vmax.f32 %v1600_v20, %v6537_v49  ;;  %v6594_v61 = vmax.f32 %v1601_v21, %v6540_v28  ;;  %v6599_v25 = vmax.f32 %v1607_v57, 0.0 }
 0x238   : > { %v6597_v22 = vmax.f32 %v1602_v42, %v6547_v32  ;;  %v6602_v0 = vmax.f32 %v1603_v7, %v6551_v46  ;;  %v6604_v2 = vmax.f32 %v1604_v38, 0.0  ;;  %v6606_v14 = vmax.f32 %v1605_v33, 0.0 }
 0x239   : > { %8073 = vst [vmem:[#allocation43_spill] sm:$0xff] %v6599_v25  ;;  %v6608_v3 = vmax.f32 %v1606_v55, 0.0  ;;  %v2725_v43 = vmax.f32 %v6106_v24, %v2617_v31  ;;  %v2774_v5 = vsel %vm888_vm2, %v2772_v54, %v2773_v48  ;;  %v2868_v20 = vmax.f32 %v2724_v4, %v2772_v54 }
 0x23a   : > { %v2870_v60 = vmax.f32 %v2726_v19, %v2773_v48  ;;  %v2918_v6 = vrot.slane %v6106_v24, 3  ;;  %v2919_v62 = vrot.slane %v6110_v52, 3  ;;  %v3078_v21 = vrot.slane %v6106_v24, 4 }
 0x23b   : > { %v2869_v8 = vmax.f32 %v2725_v43, %v2774_v5  ;;  %v3079_v42 = vrot.slane %v6110_v52, 4  ;;  %v1702_v7 = vrot.slane %v6217_v26, 1  ;;  %v1704_v11 = vrot.slane %v6220_v44, 1 }
 0x23c   : > { %v2920_v57 = vsel %vm1033_vm3, %v2918_v6, %v2919_v62  ;;  %v2921_v31 = vsel %vm1033_vm3, %v2919_v62, %v4977_v16  ;;  %v3028_v4 = vmax.f32 %v2868_v20, %v2918_v6  ;;  %v1854_v54 = vrot.slane %v6217_v26, 2 }
 0x23d   : > { %v3029_v48 = vmax.f32 %v2869_v8, %v2920_v57  ;;  %v3030_v19 = vmax.f32 %v2870_v60, %v2921_v31  ;;  %v3080_v38 = vsel %vm1195_vm4, %v3078_v21, %v3079_v42  ;;  %v3081_v24 = vsel %vm1195_vm4, %v3079_v42, %v4979_v17 }
 0x23e   : > { %v3188_v52 = vmax.f32 %v3028_v4, %v3078_v21  ;;  %v1703_v33 = vsel %vm726_vm1, %v4967_v9, %v1702_v7  ;;  %v1705_v59 = vsel %vm726_vm1, %v1702_v7, %v1704_v11  ;;  %v1808_v55 = vmax.f32 %v6220_v44, %v1704_v11 }
 0x23f   : > { %v3189_v43 = vmax.f32 %v3029_v48, %v3080_v38  ;;  %v3190_v5 = vmax.f32 %v3030_v19, %v3081_v24  ;;  %v1806_v20 = vmax.f32 %v1703_v33, 0.0  ;;  %v1807_v6 = vmax.f32 %v6217_v26, %v1705_v59 }
 0x240   : > { %v3480_v62 = vrot.slane %v3188_v52, 6  ;;  %v1855_v60 = vrot.slane %v6220_v44, 2  ;;  %v2006_v8 = vrot.slane %v6217_v26, 3  ;;  %v2007_v42 = vrot.slane %v6220_v44, 3 }
 0x241   : > { %v3481_v21 = vrot.slane %v3189_v43, 6  ;;  %v3483_v57 = vrot.slane %v3190_v5, 6  ;;  %v1950_v31 = vmax.f32 %v1806_v20, %v1854_v54  ;;  %v2166_v4 = vrot.slane %v6217_v26, 4 }
 0x242   : > { %v1856_v7 = vsel %vm888_vm2, %v1854_v54, %v1855_v60  ;;  %v1952_v11 = vmax.f32 %v1808_v55, %v1855_v60  ;;  %v2008_v48 = vsel %vm1033_vm3, %v2006_v8, %v2007_v42  ;;  %v2009_v19 = vsel %vm1033_vm3, %v2007_v42, %v4977_v16 }
 0x243   : > { %v3482_v38 = vsel %vm1405_vm5, %v3480_v62, %v3481_v21  ;;  %v3484_v24 = vsel %vm1405_vm5, %v3481_v21, %v3483_v57  ;;  %v1951_v52 = vmax.f32 %v1807_v6, %v1856_v7  ;;  %v2110_v33 = vmax.f32 %v1950_v31, %v2006_v8 }
 0x244   : > { %v4481_v59 = vpack.i.bf16 %v3484_v24, %v3482_v38  ;;  %v2112_v43 = vmax.f32 %v1952_v11, %v2009_v19  ;;  %v2167_v5 = vrot.slane %v6220_v44, 4  ;;  %v2618_v26 = vrot.slane %v6286_v37, 1 }
 0x245   : > { %v2111_v20 = vmax.f32 %v1951_v52, %v2008_v48  ;;  %v2270_v54 = vmax.f32 %v2110_v33, %v2166_v4  ;;  %v2620_v55 = vrot.slane %v6277_v30, 1  ;;  %v2775_v60 = vrot.slane %v6286_v37, 2 }
 0x246   : > { %4482 = vrot.lane.b32.xlu0 %v4481_v59, %s4743_s26  ;;  %v2168_v62 = vsel %vm1195_vm4, %v2166_v4, %v2167_v5  ;;  %v2169_v6 = vsel %vm1195_vm4, %v2167_v5, %v4979_v17  ;;  %v2619_v8 = vsel %vm726_vm1, %v4967_v9, %v2618_v26  ;;  %v2776_v44 = vrot.slane %v6277_v30, 2 }
 0x247   : > { %v2271_v42 = vmax.f32 %v2111_v20, %v2168_v62  ;;  %v2272_v21 = vmax.f32 %v2112_v43, %v2169_v6  ;;  %v2382_v57 = vrot.slane %v2270_v54, 6  ;;  %v2621_v31 = vsel %vm726_vm1, %v2618_v26, %v2620_v55 }
 0x248   : > { %v2727_v7 = vmax.f32 %v2619_v8, 0.0  ;;  %v2728_v11 = vmax.f32 %v6286_v37, %v2621_v31  ;;  %v2729_v48 = vmax.f32 %v6277_v30, %v2620_v55  ;;  %v2777_v4 = vsel %vm888_vm2, %v2775_v60, %v2776_v44 }
 0x249   : > { %v2383_v19 = vrot.slane %v2271_v42, 6  ;;  %v2385_v38 = vrot.slane %v2272_v21, 6  ;;  %v2922_v24 = vrot.slane %v6286_v37, 3  ;;  %v2923_v52 = vrot.slane %v6277_v30, 3 }
 0x24a   : > { %v2871_v33 = vmax.f32 %v2727_v7, %v2775_v60  ;;  %v2872_v59 = vmax.f32 %v2728_v11, %v2777_v4  ;;  %v2873_v5 = vmax.f32 %v2729_v48, %v2776_v44  ;;  %v3082_v43 = vrot.slane %v6286_v37, 4 }
 0x24b   : > { %v6659_v26 = vsel %vm1405_vm5, %v2382_v57, %v2383_v19  ;;  %v6662_v20 = vsel %vm1405_vm5, %v2383_v19, %v2385_v38  ;;  %v2924_v54 = vsel %vm1033_vm3, %v2922_v24, %v2923_v52  ;;  %v2925_v55 = vsel %vm1033_vm3, %v2923_v52, %v4977_v16 }
 0x24c   : > { %v4486_v62 = vpack.i.bf16 %v6662_v20, %v6659_v26  ;;  %v8074_v6 = vmax.f32 %v6303_v63, %v6470_v36  ;;  %v8075_v44 = vmax.f32 %v6306_v13, %v6473_v40  ;;  %v8076_v31 = vmax.f32 %v6319_v41, %v6470_v36 }
 0x24d   : > { %v8077_v63 = vmax.f32 %v6316_v50, %v6473_v40  ;;  %v3031_v13 = vmax.f32 %v2871_v33, %v2922_v24  ;;  %v3032_v48 = vmax.f32 %v2872_v59, %v2924_v54  ;;  %v3033_v4 = vmax.f32 %v2873_v5, %v2925_v55 }
 0x24e   : > { %v6677_v8 = vmax.f32 %v8074_v6, %v6659_v26  ;;  %v6683_v42 = vmax.f32 %v8075_v44, %v6662_v20  ;;  %v6693_v7 = vmax.f32 %v8076_v31, %v6659_v26  ;;  %4487 = vrot.lane.b32.xlu0 %v4486_v62, %s4742_s17  ;;  %v3083_v19 = vrot.slane %v6277_v30, 4 }
 0x24f   : > { %v6699_v11 = vmax.f32 %v8077_v63, %v6662_v20  ;;  %v2622_v38 = vrot.slane %v6326_v23, 1  ;;  %v2624_v52 = vrot.slane %v6330_v12, 1  ;;  %v2778_v41 = vrot.slane %v6326_v23, 2 }
 0x250   : > { %v3191_v6 = vmax.f32 %v3031_v13, %v3082_v43  ;;  %v2779_v44 = vrot.slane %v6330_v12, 2  ;;  %v2926_v50 = vrot.slane %v6326_v23, 3  ;;  %v2927_v31 = vrot.slane %v6330_v12, 3 }
 0x251   : > { %v3084_v62 = vsel %vm1195_vm4, %v3082_v43, %v3083_v19  ;;  %v3085_v24 = vsel %vm1195_vm4, %v3083_v19, %v4979_v17  ;;  %v2623_v30 = vsel %vm726_vm1, %v4967_v9, %v2622_v38  ;;  %v2625_v33 = vsel %vm726_vm1, %v2622_v38, %v2624_v52 }
 0x252   : > { %v3192_v59 = vmax.f32 %v3032_v48, %v3084_v62  ;;  %v3193_v5 = vmax.f32 %v3033_v4, %v3085_v24  ;;  %v3485_v54 = vrot.slane %v3191_v6, 6  ;;  %v2730_v55 = vmax.f32 %v2623_v30, 0.0 }
 0x253   : > { %v2731_v63 = vmax.f32 %v6326_v23, %v2625_v33  ;;  %v2732_v13 = vmax.f32 %v6330_v12, %v2624_v52  ;;  %v2780_v57 = vsel %vm888_vm2, %v2778_v41, %v2779_v44  ;;  %v2928_v43 = vsel %vm1033_vm3, %v2926_v50, %v2927_v31 }
 0x254   : > { %v3486_v21 = vrot.slane %v3192_v59, 6  ;;  %v3488_v37 = vrot.slane %v3193_v5, 6  ;;  %v2874_v19 = vmax.f32 %v2730_v55, %v2778_v41  ;;  %v2929_v60 = vsel %vm1033_vm3, %v2927_v31, %v4977_v16 }
 0x255   : > { %v2875_v25 = vmax.f32 %v2731_v63, %v2780_v57  ;;  %v2876_v38 = vmax.f32 %v2732_v13, %v2779_v44  ;;  %v3086_v48 = vrot.slane %v6326_v23, 4  ;;  %v3087_v4 = vrot.slane %v6330_v12, 4 }
 0x256   : > { %v3487_v6 = vsel %vm1405_vm5, %v3485_v54, %v3486_v21  ;;  %v3489_v52 = vsel %vm1405_vm5, %v3486_v21, %v3488_v37  ;;  %v3034_v62 = vmax.f32 %v2874_v19, %v2926_v50  ;;  %v1706_v24 = vrot.slane %v6390_v45, 1 }
 0x257   : > { %v4491_v30 = vpack.i.bf16 %v3489_v52, %v3487_v6  ;;  %v3035_v33 = vmax.f32 %v2875_v25, %v2928_v43  ;;  %v3036_v59 = vmax.f32 %v2876_v38, %v2929_v60  ;;  %v3088_v41 = vsel %vm1195_vm4, %v3086_v48, %v3087_v4 }
 0x258   : > { %v3089_v57 = vsel %vm1195_vm4, %v3087_v4, %v4979_v17  ;;  %v3194_v44 = vmax.f32 %v3034_v62, %v3086_v48  ;;  %v1707_v23 = vsel %vm726_vm1, %v4967_v9, %v1706_v24  ;;  %v1708_v12 = vrot.slane %v6396_v53, 1 }
 0x259   : > { %4492 = vrot.lane.b32.xlu1 %v4491_v30, %s4743_s26  ;;  %v3195_v37 = vmax.f32 %v3035_v33, %v3088_v41  ;;  %v3196_v21 = vmax.f32 %v3036_v59, %v3089_v57  ;;  %v1809_v50 = vmax.f32 %v1707_v23, 0.0  ;;  %v1857_v31 = vrot.slane %v6390_v45, 2 }
 0x25a   : > { %v3490_v25 = vrot.slane %v3194_v44, 6  ;;  %v1709_v60 = vsel %vm726_vm1, %v1706_v24, %v1708_v12  ;;  %v1811_v5 = vmax.f32 %v6396_v53, %v1708_v12  ;;  %v1858_v54 = vrot.slane %v6396_v53, 2 }
 0x25b   : > { %v3491_v55 = vrot.slane %v3195_v37, 6  ;;  %v3493_v63 = vrot.slane %v3196_v21, 6  ;;  %v1810_v13 = vmax.f32 %v6390_v45, %v1709_v60  ;;  %v1953_v43 = vmax.f32 %v1809_v50, %v1857_v31 }
 0x25c   : > { %v1859_v19 = vsel %vm888_vm2, %v1857_v31, %v1858_v54  ;;  %v1955_v38 = vmax.f32 %v1811_v5, %v1858_v54  ;;  %v2010_v48 = vrot.slane %v6390_v45, 3  ;;  %v2011_v4 = vrot.slane %v6396_v53, 3 }
 0x25d   : > { %v3492_v6 = vsel %vm1405_vm5, %v3490_v25, %v3491_v55  ;;  %v3494_v52 = vsel %vm1405_vm5, %v3491_v55, %v3493_v63  ;;  %v1954_v62 = vmax.f32 %v1810_v13, %v1859_v19  ;;  %v2170_v24 = vrot.slane %v6390_v45, 4 }
 0x25e   : > { %v4501_v30 = vpack.i.bf16 %v3494_v52, %v3492_v6  ;;  %v2012_v33 = vsel %vm1033_vm3, %v2010_v48, %v2011_v4  ;;  %v2013_v59 = vsel %vm1033_vm3, %v2011_v4, %v4977_v16  ;;  %v2113_v41 = vmax.f32 %v1953_v43, %v2010_v48 }
 0x25f   : > { %v2114_v57 = vmax.f32 %v1954_v62, %v2012_v33  ;;  %v2115_v44 = vmax.f32 %v1955_v38, %v2013_v59  ;;  %v2171_v23 = vrot.slane %v6396_v53, 4  ;;  %v1710_v12 = vrot.slane %v6440_v15, 1 }
 0x260   : > { %4502 = vrot.lane.b32.xlu0 %v4501_v30, %s4743_s26  ;;  %v2273_v37 = vmax.f32 %v2113_v41, %v2170_v24  ;;  %v1712_v21 = vrot.slane %v6443_v29, 1  ;;  %v1860_v45 = vrot.slane %v6440_v15, 2  ;;  %v1861_v50 = vrot.slane %v6443_v29, 2 }
 0x261   : > { %v2172_v31 = vsel %vm1195_vm4, %v2170_v24, %v2171_v23  ;;  %v2173_v25 = vsel %vm1195_vm4, %v2171_v23, %v4979_v17  ;;  %v1711_v60 = vsel %vm726_vm1, %v4967_v9, %v1710_v12  ;;  %v2014_v53 = vrot.slane %v6440_v15, 3 }
 0x262   : > { %v2274_v5 = vmax.f32 %v2114_v57, %v2172_v31  ;;  %v2275_v54 = vmax.f32 %v2115_v44, %v2173_v25  ;;  %v2387_v55 = vrot.slane %v2273_v37, 6  ;;  %v1713_v63 = vsel %vm726_vm1, %v1710_v12, %v1712_v21 }
 0x263   : > { %v1812_v13 = vmax.f32 %v1711_v60, 0.0  ;;  %v1813_v43 = vmax.f32 %v6440_v15, %v1713_v63  ;;  %v1814_v19 = vmax.f32 %v6443_v29, %v1712_v21  ;;  %v1862_v38 = vsel %vm888_vm2, %v1860_v45, %v1861_v50 }
 0x264   : > { %v2388_v48 = vrot.slane %v2274_v5, 6  ;;  %v2390_v4 = vrot.slane %v2275_v54, 6  ;;  %v2015_v6 = vrot.slane %v6443_v29, 3  ;;  %v2174_v52 = vrot.slane %v6440_v15, 4 }
 0x265   : > { %v1956_v62 = vmax.f32 %v1812_v13, %v1860_v45  ;;  %v1957_v24 = vmax.f32 %v1813_v43, %v1862_v38  ;;  %v1958_v30 = vmax.f32 %v1814_v19, %v1861_v50  ;;  %v2175_v33 = vrot.slane %v6443_v29, 4 }
 0x266   : > { %v6767_v59 = vsel %vm1405_vm5, %v2387_v55, %v2388_v48  ;;  %v6770_v41 = vsel %vm1405_vm5, %v2388_v48, %v2390_v4  ;;  %v2016_v57 = vsel %vm1033_vm3, %v2014_v53, %v2015_v6  ;;  %v2017_v44 = vsel %vm1033_vm3, %v2015_v6, %v4977_v16 }
 0x267   : > { %v4496_v23 = vpack.i.bf16 %v6770_v41, %v6767_v59  ;;  %v2472_v15 = vmax.f32 %v6659_v26, %v6767_v59  ;;  %v2473_v29 = vmax.f32 %v6662_v20, %v6770_v41  ;;  %v8078_v12 = vmax.f32 %v6470_v36, %v6659_v26 }
 0x268   : > { %v8079_v21 = vmax.f32 %v6473_v40, %v6662_v20  ;;  %v2528_v50 = vmax.f32 %v6677_v8, %v6767_v59  ;;  %v2529_v31 = vmax.f32 %v6683_v42, %v6770_v41  ;;  %v8080_v25 = vmax.f32 %v6486_v51, %v6659_v26 }
 0x269   : > { %v6785_v37 = vmax.f32 %v8078_v12, %v6767_v59  ;;  %v8081_v36 = vmax.f32 %v6492_v10, %v6662_v20  ;;  %4497 = vrot.lane.b32.xlu1 %v4496_v23, %s4742_s17  ;;  %v2116_v40 = vmax.f32 %v1956_v62, %v2014_v53  ;;  %v2117_v54 = vmax.f32 %v1957_v24, %v2016_v57 }
 0x26a   : > { %v6791_v45 = vmax.f32 %v8079_v21, %v6770_v41  ;;  %v6801_v60 = vmax.f32 %v8080_v25, %v6767_v59  ;;  %v2118_v8 = vmax.f32 %v1958_v30, %v2017_v44  ;;  %v2176_v55 = vsel %vm1195_vm4, %v2174_v52, %v2175_v33 }
 0x26b   : > { %v6807_v5 = vmax.f32 %v8081_v36, %v6770_v41  ;;  %v2177_v42 = vsel %vm1195_vm4, %v2175_v33, %v4979_v17  ;;  %v2626_v51 = vrot.slane %v6502_v34, 1  ;;  %v2628_v26 = vrot.slane %v6508_v1, 1 }
 0x26c   : > { %v2276_v63 = vmax.f32 %v2116_v40, %v2174_v52  ;;  %v2277_v13 = vmax.f32 %v2117_v54, %v2176_v55  ;;  %v2278_v43 = vmax.f32 %v2118_v8, %v2177_v42  ;;  %v2781_v10 = vrot.slane %v6502_v34, 2 }
 0x26d   : > { %v2627_v20 = vsel %vm726_vm1, %v4967_v9, %v2626_v51  ;;  %v2629_v53 = vsel %vm726_vm1, %v2626_v51, %v2628_v26  ;;  %v2735_v19 = vmax.f32 %v6508_v1, %v2628_v26  ;;  %v2782_v38 = vrot.slane %v6508_v1, 2 }
 0x26e   : > { %v2392_v48 = vrot.slane %v2276_v63, 6  ;;  %v2393_v4 = vrot.slane %v2277_v13, 6  ;;  %v2395_v6 = vrot.slane %v2278_v43, 6  ;;  %v2733_v62 = vmax.f32 %v2627_v20, 0.0 }
 0x26f   : > { %v2734_v24 = vmax.f32 %v6502_v34, %v2629_v53  ;;  %v2783_v52 = vsel %vm888_vm2, %v2781_v10, %v2782_v38  ;;  %v2879_v30 = vmax.f32 %v2735_v19, %v2782_v38  ;;  %v2930_v33 = vrot.slane %v6502_v34, 3 }
 0x270   : > { %v6825_v57 = vsel %vm1405_vm5, %v2392_v48, %v2393_v4  ;;  %v6828_v44 = vsel %vm1405_vm5, %v2393_v4, %v2395_v6  ;;  %v2877_v23 = vmax.f32 %v2733_v62, %v2781_v10  ;;  %v2931_v12 = vrot.slane %v6508_v1, 3 }
 0x271   : > { %v4506_v21 = vpack.i.bf16 %v6828_v44, %v6825_v57  ;;  %v2474_v25 = vmax.f32 %v6767_v59, %v6825_v57  ;;  %v2475_v36 = vmax.f32 %v6770_v41, %v6828_v44  ;;  %v6838_v40 = vmax.f32 %v2472_v15, %v6825_v57 }
 0x272   : > { %v6841_v54 = vmax.f32 %v2473_v29, %v6828_v44  ;;  %v2530_v8 = vmax.f32 %v6785_v37, %v6825_v57  ;;  %v2531_v55 = vmax.f32 %v6791_v45, %v6828_v44  ;;  %v6848_v42 = vmax.f32 %v2528_v50, %v6825_v57 }
 0x273   : > { %v6851_v51 = vmax.f32 %v2529_v31, %v6828_v44  ;;  %4507 = vrot.lane.b32.xlu0 %v4506_v21, %s4742_s17  ;;  %v2878_v26 = vmax.f32 %v2734_v24, %v2783_v52  ;;  %v2932_v15 = vsel %vm1033_vm3, %v2930_v33, %v2931_v12  ;;  %v2933_v29 = vsel %vm1033_vm3, %v2931_v12, %v4977_v16 }
 0x274   : > { %v3037_v63 = vmax.f32 %v2877_v23, %v2930_v33  ;;  %v3039_v13 = vmax.f32 %v2879_v30, %v2933_v29  ;;  %v3090_v43 = vrot.slane %v6502_v34, 4  ;;  %v3091_v10 = vrot.slane %v6508_v1, 4 }
 0x275   : > { %v3038_v20 = vmax.f32 %v2878_v26, %v2932_v15  ;;  %v1718_v50 = vrot.slane %v6591_v18, 1  ;;  %v1720_v31 = vrot.slane %v6594_v61, 1  ;;  %v1866_v53 = vrot.slane %v6591_v18, 2 }
 0x276   : > { %v3092_v19 = vsel %vm1195_vm4, %v3090_v43, %v3091_v10  ;;  %v3093_v38 = vsel %vm1195_vm4, %v3091_v10, %v4979_v17  ;;  %v3197_v48 = vmax.f32 %v3037_v63, %v3090_v43  ;;  %v1867_v4 = vrot.slane %v6594_v61, 2 }
 0x277   : > { %v3198_v6 = vmax.f32 %v3038_v20, %v3092_v19  ;;  %v3199_v62 = vmax.f32 %v3039_v13, %v3093_v38  ;;  %v1719_v34 = vsel %vm726_vm1, %v4967_v9, %v1718_v50  ;;  %v1721_v1 = vsel %vm726_vm1, %v1718_v50, %v1720_v31 }
 0x278   : > { %v3495_v24 = vrot.slane %v3197_v48, 6  ;;  %v1818_v52 = vmax.f32 %v1719_v34, 0.0  ;;  %v1819_v30 = vmax.f32 %v6591_v18, %v1721_v1  ;;  %v1820_v33 = vmax.f32 %v6594_v61, %v1720_v31 }
 0x279   : > { %v3496_v23 = vrot.slane %v3198_v6, 6  ;;  %v3498_v12 = vrot.slane %v3199_v62, 6  ;;  %v1868_v21 = vsel %vm888_vm2, %v1866_v53, %v1867_v4  ;;  %v2022_v26 = vrot.slane %v6591_v18, 3 }
 0x27a   : > { %v1962_v15 = vmax.f32 %v1818_v52, %v1866_v53  ;;  %v1963_v29 = vmax.f32 %v1819_v30, %v1868_v21  ;;  %v1964_v63 = vmax.f32 %v1820_v33, %v1867_v4  ;;  %v2023_v13 = vrot.slane %v6594_v61, 3 }
 0x27b   : > { %v3497_v43 = vsel %vm1405_vm5, %v3495_v24, %v3496_v23  ;;  %v3499_v10 = vsel %vm1405_vm5, %v3496_v23, %v3498_v12  ;;  %v2182_v20 = vrot.slane %v6591_v18, 4  ;;  %v2183_v50 = vrot.slane %v6594_v61, 4 }
 0x27c   : > { %v4511_v31 = vpack.i.bf16 %v3499_v10, %v3497_v43  ;;  %v2024_v19 = vsel %vm1033_vm3, %v2022_v26, %v2023_v13  ;;  %v2025_v38 = vsel %vm1033_vm3, %v2023_v13, %v4977_v16  ;;  %v2122_v48 = vmax.f32 %v1962_v15, %v2022_v26 }
 0x27d   : > { %v2123_v53 = vmax.f32 %v1963_v29, %v2024_v19  ;;  %v2124_v6 = vmax.f32 %v1964_v63, %v2025_v38  ;;  %v2184_v4 = vsel %vm1195_vm4, %v2182_v20, %v2183_v50  ;;  %v2185_v62 = vsel %vm1195_vm4, %v2183_v50, %v4979_v17 }
 0x27e   : > { %4512 = vrot.lane.b32.xlu1 %v4511_v31, %s4743_s26  ;;  %v2282_v34 = vmax.f32 %v2122_v48, %v2182_v20  ;;  %v1714_v18 = vrot.slane %v6581_v35, 1  ;;  %v1716_v61 = vrot.slane %v6588_v58, 1  ;;  %v1863_v1 = vrot.slane %v6581_v35, 2 }
 0x27f   : > { %v2283_v24 = vmax.f32 %v2123_v53, %v2184_v4  ;;  %v2284_v52 = vmax.f32 %v2124_v6, %v2185_v62  ;;  %v1864_v30 = vrot.slane %v6588_v58, 2  ;;  %v2018_v33 = vrot.slane %v6581_v35, 3 }
 0x280   : > { %v2402_v23 = vrot.slane %v2282_v34, 6  ;;  %v1715_v12 = vsel %vm726_vm1, %v4967_v9, %v1714_v18  ;;  %v1717_v21 = vsel %vm726_vm1, %v1714_v18, %v1716_v61  ;;  %v1817_v26 = vmax.f32 %v6588_v58, %v1716_v61 }
 0x281   : > { %v2403_v15 = vrot.slane %v2283_v24, 6  ;;  %v2405_v29 = vrot.slane %v2284_v52, 6  ;;  %v1815_v63 = vmax.f32 %v1715_v12, 0.0  ;;  %v1816_v13 = vmax.f32 %v6581_v35, %v1717_v21 }
 0x282   : > { %v1865_v43 = vsel %vm888_vm2, %v1863_v1, %v1864_v30  ;;  %v1961_v10 = vmax.f32 %v1817_v26, %v1864_v30  ;;  %v2019_v20 = vrot.slane %v6588_v58, 3  ;;  %v2178_v50 = vrot.slane %v6581_v35, 4 }
 0x283   : > { %v6899_v31 = vsel %vm1405_vm5, %v2402_v23, %v2403_v15  ;;  %v6902_v19 = vsel %vm1405_vm5, %v2403_v15, %v2405_v29  ;;  %v1959_v38 = vmax.f32 %v1815_v63, %v1863_v1  ;;  %v1960_v48 = vmax.f32 %v1816_v13, %v1865_v43 }
 0x284   : > { %v4521_v53 = vpack.i.bf16 %v6902_v19, %v6899_v31  ;;  %v2020_v6 = vsel %vm1033_vm3, %v2018_v33, %v2019_v20  ;;  %v2021_v4 = vsel %vm1033_vm3, %v2019_v20, %v4977_v16  ;;  %v2179_v62 = vrot.slane %v6588_v58, 4 }
 0x285   : > { %v2119_v34 = vmax.f32 %v1959_v38, %v2018_v33  ;;  %v2120_v35 = vmax.f32 %v1960_v48, %v2020_v6  ;;  %v2121_v18 = vmax.f32 %v1961_v10, %v2021_v4  ;;  %v2630_v61 = vrot.slane %v6693_v7, 1 }
 0x286   : > { %4522 = vrot.lane.b32.xlu0 %v4521_v53, %s4742_s17  ;;  %v2180_v1 = vsel %vm1195_vm4, %v2178_v50, %v2179_v62  ;;  %v2181_v24 = vsel %vm1195_vm4, %v2179_v62, %v4979_v17  ;;  %v2632_v52 = vrot.slane %v6699_v11, 1  ;;  %v2784_v30 = vrot.slane %v6693_v7, 2 }
 0x287   : > { %v2279_v23 = vmax.f32 %v2119_v34, %v2178_v50  ;;  %v2280_v12 = vmax.f32 %v2120_v35, %v2180_v1  ;;  %v2281_v21 = vmax.f32 %v2121_v18, %v2181_v24  ;;  %v2631_v58 = vsel %vm726_vm1, %v4967_v9, %v2630_v61 }
 0x288   : > { %v2633_v33 = vsel %vm726_vm1, %v2630_v61, %v2632_v52  ;;  %v2736_v26 = vmax.f32 %v2631_v58, 0.0  ;;  %v2738_v15 = vmax.f32 %v6699_v11, %v2632_v52  ;;  %v2785_v29 = vrot.slane %v6699_v11, 2 }
 0x289   : > { %v2397_v63 = vrot.slane %v2279_v23, 6  ;;  %v2398_v13 = vrot.slane %v2280_v12, 6  ;;  %v2400_v43 = vrot.slane %v2281_v21, 6  ;;  %v2737_v10 = vmax.f32 %v6693_v7, %v2633_v33 }
 0x28a   : > { %v2786_v20 = vsel %vm888_vm2, %v2784_v30, %v2785_v29  ;;  %v2880_v50 = vmax.f32 %v2736_v26, %v2784_v30  ;;  %v2882_v38 = vmax.f32 %v2738_v15, %v2785_v29  ;;  %v2934_v48 = vrot.slane %v6693_v7, 3 }
 0x28b   : > { %v6926_v53 = vsel %vm1405_vm5, %v2397_v63, %v2398_v13  ;;  %v6929_v6 = vsel %vm1405_vm5, %v2398_v13, %v2400_v43  ;;  %v2881_v4 = vmax.f32 %v2737_v10, %v2786_v20  ;;  %v2935_v62 = vrot.slane %v6699_v11, 3 }
 0x28c   : > { %v4516_v34 = vpack.i.bf16 %v6929_v6, %v6926_v53  ;;  %v2476_v35 = vmax.f32 %v6825_v57, %v6926_v53  ;;  %v2477_v18 = vmax.f32 %v6828_v44, %v6929_v6  ;;  %v6942_v61 = vmax.f32 %v2474_v25, %v6926_v53 }
 0x28d   : > { %v6948_v1 = vmax.f32 %v2475_v36, %v6929_v6  ;;  %v2532_v24 = vmax.f32 %v6838_v40, %v6926_v53  ;;  %v2533_v52 = vmax.f32 %v6841_v54, %v6929_v6  ;;  %v6958_v30 = vmax.f32 %v2530_v8, %v6926_v53 }
 0x28e   : > { %v6964_v59 = vmax.f32 %v2531_v55, %v6929_v6  ;;  %4517 = vrot.lane.b32.xlu1 %v4516_v34, %s4742_s17  ;;  %v2936_v41 = vsel %vm1033_vm3, %v2934_v48, %v2935_v62  ;;  %v2937_v25 = vsel %vm1033_vm3, %v2935_v62, %v4977_v16  ;;  %v3040_v36 = vmax.f32 %v2880_v50, %v2934_v48 }
 0x28f   : > { %v6971_v40 = vmax.f32 %v2532_v24, %v6899_v31  ;;  %v6974_v37 = vmax.f32 %v2533_v52, %v6902_v19  ;;  %v3041_v54 = vmax.f32 %v2881_v4, %v2936_v41  ;;  %v3042_v8 = vmax.f32 %v2882_v38, %v2937_v25 }
 0x290   : > { %v3094_v45 = vrot.slane %v6693_v7, 4  ;;  %v3095_v55 = vrot.slane %v6699_v11, 4  ;;  %v1722_v23 = vrot.slane %v6597_v22, 1  ;;  %v1724_v12 = vrot.slane %v6602_v0, 1 }
 0x291   : > { %v1869_v21 = vrot.slane %v6597_v22, 2  ;;  %v1870_v58 = vrot.slane %v6602_v0, 2  ;;  %v2026_v33 = vrot.slane %v6597_v22, 3  ;;  %v2027_v26 = vrot.slane %v6602_v0, 3 }
 0x292   : > { %v3096_v15 = vsel %vm1195_vm4, %v3094_v45, %v3095_v55  ;;  %v3097_v29 = vsel %vm1195_vm4, %v3095_v55, %v4979_v17  ;;  %v3200_v7 = vmax.f32 %v3040_v36, %v3094_v45  ;;  %v1723_v11 = vsel %vm726_vm1, %v4967_v9, %v1722_v23 }
 0x293   : > { %v3201_v63 = vmax.f32 %v3041_v54, %v3096_v15  ;;  %v3202_v13 = vmax.f32 %v3042_v8, %v3097_v29  ;;  %v1725_v43 = vsel %vm726_vm1, %v1722_v23, %v1724_v12  ;;  %v1821_v10 = vmax.f32 %v1723_v11, 0.0  ;;  %v8082_v11 = vld [vmem:[#allocation32_spill] sm:$0xff] }
 0x294   : > { %v3500_v20 = vrot.slane %v3200_v7, 6  ;;  %v1822_v50 = vmax.f32 %v6597_v22, %v1725_v43  ;;  %v1823_v38 = vmax.f32 %v6602_v0, %v1724_v12  ;;  %v1871_v48 = vsel %vm888_vm2, %v1869_v21, %v1870_v58 }
 0x295   : > { %v3501_v4 = vrot.slane %v3201_v63, 6  ;;  %v3503_v62 = vrot.slane %v3202_v13, 6  ;;  %v1965_v34 = vmax.f32 %v1821_v10, %v1869_v21  ;;  %v2028_v24 = vsel %vm1033_vm3, %v2026_v33, %v2027_v26  ;;  %v8083_v63 = vld [vmem:[#allocation33_spill] sm:$0xff] }
 0x296   : > { %v1966_v52 = vmax.f32 %v1822_v50, %v1871_v48  ;;  %v1967_v41 = vmax.f32 %v1823_v38, %v1870_v58  ;;  %v2029_v25 = vsel %vm1033_vm3, %v2027_v26, %v4977_v16  ;;  %v2186_v36 = vrot.slane %v6597_v22, 4  ;;  %v4635_v58 = vld [vmem:[%s7846_s3 + $0x38] sm:$0xff]  }
 0x297   : > { %v3502_v54 = vsel %vm1405_vm5, %v3500_v20, %v3501_v4  ;;  %v3504_v8 = vsel %vm1405_vm5, %v3501_v4, %v3503_v62  ;;  %v2125_v45 = vmax.f32 %v1965_v34, %v2026_v33  ;;  %v2187_v55 = vrot.slane %v6602_v0, 4  ;;  %v4636_v0 = vld [vmem:[%s7846_s3 + $0x30] sm:$0xff]   ;;  %4321 = vmatprep.subr.bf16.mxu1 %v4635_v58  ;;  %4273 = vmatprep.subr.bf16.mxu0 %v4635_v58 }
 0x298   : > { %v4531_v23 = vpack.i.bf16 %v3504_v8, %v3502_v54  ;;  %v2126_v12 = vmax.f32 %v1966_v52, %v2028_v24  ;;  %v2127_v15 = vmax.f32 %v1967_v41, %v2029_v25  ;;  %v2534_v21 = vmax.f32 %v6942_v61, %v6899_v31  ;;  %4329 = vmatpush3.bf16.msra.mxu1 %v4635_v58  ;;  %v4637_v52 = vld [vmem:[%s7846_s3 + $0x28] sm:$0xff]  }
 0x299   : > { %v2188_v26 = vsel %vm1195_vm4, %v2186_v36, %v2187_v55  ;;  %v2189_v22 = vsel %vm1195_vm4, %v2187_v55, %v4979_v17  ;;  %v2285_v29 = vmax.f32 %v2125_v45, %v2186_v36  ;;  %v2535_v33 = vmax.f32 %v6948_v1, %v6902_v19  ;;  %4274 = vmatpush3.bf16.msra.mxu0 %v4635_v58 }
 0x29a   : > { %4532 = vrot.lane.b32.xlu0 %v4531_v23, %s4743_s26  ;;  %v2286_v61 = vmax.f32 %v2126_v12, %v2188_v26  ;;  %v2287_v7 = vmax.f32 %v2127_v15, %v2189_v22  ;;  %v4536_v13 = vpack.i.bf16 %v8083_v63, %v8082_v11  ;;  %v4541_v43 = vpack.i.bf16 %v6540_v28, %v6537_v49 }
 0x29b   : > { %v2407_v10 = vrot.slane %v2285_v29, 6  ;;  %v2638_v20 = vrot.slane %v6848_v42, 1  ;;  %v2640_v50 = vrot.slane %v6851_v51, 1  ;;  %v2790_v1 = vrot.slane %v6848_v42, 2  ;;  %4322 = vmatprep.subr.bf16.mxu1 %v4636_v0  ;;  %4275 = vmatprep.subr.bf16.mxu0 %v4636_v0 }
 0x29c   : > { %v2408_v38 = vrot.slane %v2286_v61, 6  ;;  %v2410_v48 = vrot.slane %v2287_v7, 6  ;;  %v2791_v4 = vrot.slane %v6851_v51, 2  ;;  %v2942_v62 = vrot.slane %v6848_v42, 3  ;;  %4330 = vmatpush3.bf16.msra.mxu1 %v4636_v0  ;;  %v4638_v61 = vld [vmem:[%s7846_s3 + $0x20] sm:$0xff]  }
 0x29d   : > { %v2639_v49 = vsel %vm726_vm1, %v4967_v9, %v2638_v20  ;;  %v2641_v28 = vsel %vm726_vm1, %v2638_v20, %v2640_v50  ;;  %v2744_v34 = vmax.f32 %v6851_v51, %v2640_v50  ;;  %v2943_v24 = vrot.slane %v6851_v51, 3  ;;  %4323 = vmatprep.subr.bf16.mxu1 %v4637_v52  ;;  %4276 = vmatpush3.bf16.msra.mxu0 %v4636_v0 }
 0x29e   : > { %v7032_v41 = vsel %vm1405_vm5, %v2407_v10, %v2408_v38  ;;  %v7035_v25 = vsel %vm1405_vm5, %v2408_v38, %v2410_v48  ;;  %4537 = vrot.lane.b32.xlu0 %v4536_v13, %s4741_s13  ;;  %v2742_v36 = vmax.f32 %v2639_v49, 0.0  ;;  %v2743_v54 = vmax.f32 %v6848_v42, %v2641_v28  ;;  %4277 = vmatprep.subr.bf16.mxu0 %v4637_v52  ;;  %v4639_v28 = vld [vmem:[%s7846_s3 + $0x18] sm:$0xff]  }
 0x29f   : > { %v4526_v8 = vpack.i.bf16 %v7035_v25, %v7032_v41  ;;  %v7042_v45 = vmax.f32 %v2534_v21, %v7032_v41  ;;  %v7045_v55 = vmax.f32 %v2535_v33, %v7035_v25  ;;  %v2792_v23 = vsel %vm888_vm2, %v2790_v1, %v2791_v4 }
 0x2a0   : > { %v2886_v12 = vmax.f32 %v2742_v36, %v2790_v1  ;;  %v2887_v15 = vmax.f32 %v2743_v54, %v2792_v23  ;;  %v2888_v58 = vmax.f32 %v2744_v34, %v2791_v4  ;;  %v2944_v26 = vsel %vm1033_vm3, %v2942_v62, %v2943_v24  ;;  %4331 = vmatpush3.bf16.msra.mxu1 %v4637_v52 }
 0x2a1   : > { %4527 = vrot.lane.b32.xlu1 %v4526_v8, %s4742_s17  ;;  %v2945_v22 = vsel %vm1033_vm3, %v2943_v24, %v4977_v16  ;;  %v3102_v29 = vrot.slane %v6848_v42, 4  ;;  %v3103_v21 = vrot.slane %v6851_v51, 4  ;;  %v2634_v33 = vrot.slane %v6801_v60, 1  ;;  %4324 = vmatprep.subr.bf16.mxu1 %v4638_v61 }
 0x2a2   : > { %v3046_v7 = vmax.f32 %v2886_v12, %v2942_v62  ;;  %v3047_v11 = vmax.f32 %v2887_v15, %v2944_v26  ;;  %v3048_v63 = vmax.f32 %v2888_v58, %v2945_v22  ;;  %v2636_v13 = vrot.slane %v6807_v5, 1  ;;  %4278 = vmatpush3.bf16.msra.mxu0 %v4637_v52 }
 0x2a3   : > { %v3104_v10 = vsel %vm1195_vm4, %v3102_v29, %v3103_v21  ;;  %v3105_v42 = vsel %vm1195_vm4, %v3103_v21, %v4979_v17  ;;  %v2635_v51 = vsel %vm726_vm1, %v4967_v9, %v2634_v33  ;;  %v2787_v20 = vrot.slane %v6801_v60, 2  ;;  %4279 = vmatprep.subr.bf16.mxu0 %v4638_v61 }
 0x2a4   : > { %v3206_v50 = vmax.f32 %v3046_v7, %v3102_v29  ;;  %v3207_v1 = vmax.f32 %v3047_v11, %v3104_v10  ;;  %v3208_v38 = vmax.f32 %v3048_v63, %v3105_v42  ;;  %v2637_v48 = vsel %vm726_vm1, %v2634_v33, %v2636_v13  ;;  %4332 = vmatpush3.bf16.msra.mxu1 %v4638_v61  ;;  %v4640_v7 = vld [vmem:[%s7846_s3 + $0x10] sm:$0xff]   ;;  %v8084_v10 = vld [vmem:[#allocation35_spill] sm:$0xff]  ;;  %v8085_v42 = vld [vmem:[#allocation36_spill] sm:$0xff] }
 0x2a5   : > { %4542 = vrot.lane.b32.xlu1 %v4541_v43, %s4741_s13  ;;  %v2739_v0 = vmax.f32 %v2635_v51, 0.0  ;;  %v2740_v4 = vmax.f32 %v6801_v60, %v2637_v48  ;;  %v2741_v62 = vmax.f32 %v6807_v5, %v2636_v13  ;;  %v2788_v49 = vrot.slane %v6807_v5, 2  ;;  %4325 = vmatprep.subr.bf16.mxu1 %v4639_v28 }
 0x2a6   : > { %v3510_v34 = vrot.slane %v3206_v50, 6  ;;  %v3511_v24 = vrot.slane %v3207_v1, 6  ;;  %v3513_v36 = vrot.slane %v3208_v38, 6  ;;  %v2938_v54 = vrot.slane %v6801_v60, 3  ;;  %4280 = vmatpush3.bf16.msra.mxu0 %v4638_v61 }
 0x2a7   : > { %v2789_v43 = vsel %vm888_vm2, %v2787_v20, %v2788_v49  ;;  %v2883_v8 = vmax.f32 %v2739_v0, %v2787_v20  ;;  %v2885_v23 = vmax.f32 %v2741_v62, %v2788_v49  ;;  %v2939_v12 = vrot.slane %v6807_v5, 3  ;;  %4281 = vmatprep.subr.bf16.mxu0 %v4639_v28 }
 0x2a8   : > { %v3512_v15 = vsel %vm1405_vm5, %v3510_v34, %v3511_v24  ;;  %v3514_v58 = vsel %vm1405_vm5, %v3511_v24, %v3513_v36  ;;  %v2884_v26 = vmax.f32 %v2740_v4, %v2789_v43  ;;  %v3098_v22 = vrot.slane %v6801_v60, 4  ;;  %4333 = vmatpush3.bf16.msra.mxu1 %v4639_v28  ;;  %v4641_v34 = vld [vmem:[%s7846_s3 + $0x8] sm:$0xff]  }
 0x2a9   : > { %v4551_v29 = vpack.i.bf16 %v3514_v58, %v3512_v15  ;;  %v2940_v21 = vsel %vm1033_vm3, %v2938_v54, %v2939_v12  ;;  %v2941_v52 = vsel %vm1033_vm3, %v2939_v12, %v4977_v16  ;;  %v3043_v33 = vmax.f32 %v2883_v8, %v2938_v54  ;;  %4326 = vmatprep.subr.bf16.mxu1 %v4640_v7 }
 0x2aa   : > { %v3044_v11 = vmax.f32 %v2884_v26, %v2940_v21  ;;  %v3045_v63 = vmax.f32 %v2885_v23, %v2941_v52  ;;  %v3099_v13 = vrot.slane %v6807_v5, 4  ;;  %v4556_v60 = vpack.i.bf16 %v8085_v42, %v8084_v10  ;;  %4282 = vmatpush3.bf16.msra.mxu0 %v4639_v28 }
 0x2ab   : > { %4552 = vrot.lane.b32.xlu0 %v4551_v29, %s4743_s26  ;;  %v3203_v51 = vmax.f32 %v3043_v33, %v3098_v22  ;;  %v4561_v20 = vpack.i.bf16 %v6551_v46, %v6547_v32  ;;  %v2646_v50 = vrot.slane %v6971_v40, 1  ;;  %v2648_v1 = vrot.slane %v6974_v37, 1  ;;  %4283 = vmatprep.subr.bf16.mxu0 %v4640_v7 }
 0x2ac   : > { %v3100_v38 = vsel %vm1195_vm4, %v3098_v22, %v3099_v13  ;;  %v3101_v5 = vsel %vm1195_vm4, %v3099_v13, %v4979_v17  ;;  %v2796_v48 = vrot.slane %v6971_v40, 2  ;;  %v2797_v61 = vrot.slane %v6974_v37, 2  ;;  %4334 = vmatpush3.bf16.msra.mxu1 %v4640_v7 }
 0x2ad   : > { %v3204_v0 = vmax.f32 %v3044_v11, %v3100_v38  ;;  %v3205_v4 = vmax.f32 %v3045_v63, %v3101_v5  ;;  %v3505_v62 = vrot.slane %v3203_v51, 6  ;;  %v2647_v49 = vsel %vm726_vm1, %v4967_v9, %v2646_v50  ;;  %4327 = vmatprep.subr.bf16.mxu1 %v4641_v34  ;;  %v4642_v11 = vld [vmem:[%s7846_s3] sm:$0xff]  }
 0x2ae   : > { %v2649_v24 = vsel %vm726_vm1, %v2646_v50, %v2648_v1  ;;  %v2748_v36 = vmax.f32 %v2647_v49, 0.0  ;;  %v2750_v54 = vmax.f32 %v6974_v37, %v2648_v1  ;;  %v2798_v43 = vsel %vm888_vm2, %v2796_v48, %v2797_v61  ;;  %4284 = vmatpush3.bf16.msra.mxu0 %v4640_v7 }
 0x2af   : > { %v3506_v8 = vrot.slane %v3204_v0, 6  ;;  %v3508_v23 = vrot.slane %v3205_v4, 6  ;;  %4557 = vrot.lane.b32.xlu0 %v4556_v60, %s4741_s13  ;;  %v2749_v12 = vmax.f32 %v6971_v40, %v2649_v24  ;;  %v2950_v15 = vrot.slane %v6971_v40, 3  ;;  %4285 = vmatprep.subr.bf16.mxu0 %v4641_v34 }
 0x2b0   : > { %v2892_v58 = vmax.f32 %v2748_v36, %v2796_v48  ;;  %v2894_v26 = vmax.f32 %v2750_v54, %v2797_v61  ;;  %v2951_v22 = vrot.slane %v6974_v37, 3  ;;  %v3110_v29 = vrot.slane %v6971_v40, 4  ;;  %4335 = vmatpush3.bf16.msra.mxu1 %v4641_v34 }
 0x2b1   : > { %v3507_v21 = vsel %vm1405_vm5, %v3505_v62, %v3506_v8  ;;  %v3509_v28 = vsel %vm1405_vm5, %v3506_v8, %v3508_v23  ;;  %v2893_v52 = vmax.f32 %v2749_v12, %v2798_v43  ;;  %v3111_v33 = vrot.slane %v6974_v37, 4  ;;  %4328 = vmatprep.subr.bf16.mxu1 %v4642_v11 }
 0x2b2   : > { %v4546_v63 = vpack.i.bf16 %v3509_v28, %v3507_v21  ;;  %v2952_v13 = vsel %vm1033_vm3, %v2950_v15, %v2951_v22  ;;  %v2953_v10 = vsel %vm1033_vm3, %v2951_v22, %v4977_v16  ;;  %v3052_v40 = vmax.f32 %v2892_v58, %v2950_v15  ;;  %4286 = vmatpush3.bf16.msra.mxu0 %v4641_v34 }
 0x2b3   : > { %v3053_v42 = vmax.f32 %v2893_v52, %v2952_v13  ;;  %v3054_v60 = vmax.f32 %v2894_v26, %v2953_v10  ;;  %v3112_v51 = vsel %vm1195_vm4, %v3110_v29, %v3111_v33  ;;  %v3113_v37 = vsel %vm1195_vm4, %v3111_v33, %v4979_v17  ;;  %4287 = vmatprep.subr.bf16.mxu0 %v4642_v11 }
 0x2b4   : > { %4547 = vrot.lane.b32.xlu1 %v4546_v63, %s4743_s26  ;;  %v3212_v50 = vmax.f32 %v3052_v40, %v3110_v29  ;;  %v2642_v1 = vrot.slane %v6958_v30, 1  ;;  %v2644_v38 = vrot.slane %v6964_v59, 1  ;;  %v2793_v5 = vrot.slane %v6958_v30, 2  ;;  %4336 = vmatpush3.bf16.msra.mxu1 %v4642_v11 }
 0x2b5   : > { %v3213_v48 = vmax.f32 %v3053_v42, %v3112_v51  ;;  %v3214_v7 = vmax.f32 %v3054_v60, %v3113_v37  ;;  %v2794_v61 = vrot.slane %v6964_v59, 2  ;;  %v2946_v0 = vrot.slane %v6958_v30, 3 }
 0x2b6   : > { %v3520_v4 = vrot.slane %v3212_v50, 6  ;;  %v2643_v62 = vsel %vm726_vm1, %v4967_v9, %v2642_v1  ;;  %v2645_v49 = vsel %vm726_vm1, %v2642_v1, %v2644_v38  ;;  %v2747_v24 = vmax.f32 %v6964_v59, %v2644_v38  ;;  %4288 = vmatpush3.bf16.msra.mxu0 %v4642_v11 }
 0x2b7   : > { %v3521_v36 = vrot.slane %v3213_v48, 6  ;;  %v3523_v54 = vrot.slane %v3214_v7, 6  ;;  %v2745_v43 = vmax.f32 %v2643_v62, 0.0  ;;  %v2746_v8 = vmax.f32 %v6958_v30, %v2645_v49 }
 0x2b8   : > { %4562 = vrot.lane.b32.xlu1 %v4561_v20, %s4741_s13  ;;  %v2795_v23 = vsel %vm888_vm2, %v2793_v5, %v2794_v61  ;;  %v2891_v12 = vmax.f32 %v2747_v24, %v2794_v61  ;;  %v2947_v15 = vrot.slane %v6964_v59, 3  ;;  %v3106_v58 = vrot.slane %v6958_v30, 4 }
 0x2b9   : > { %v3522_v34 = vsel %vm1405_vm5, %v3520_v4, %v3521_v36  ;;  %v3524_v26 = vsel %vm1405_vm5, %v3521_v36, %v3523_v54  ;;  %v2889_v22 = vmax.f32 %v2745_v43, %v2793_v5  ;;  %v2890_v29 = vmax.f32 %v2746_v8, %v2795_v23 }
 0x2ba   : > { %v4571_v21 = vpack.i.bf16 %v3524_v26, %v3522_v34  ;;  %v2948_v28 = vsel %vm1033_vm3, %v2946_v0, %v2947_v15  ;;  %v2949_v32 = vsel %vm1033_vm3, %v2947_v15, %v4977_v16  ;;  %v3107_v46 = vrot.slane %v6964_v59, 4 }
 0x2bb   : > { %v3049_v20 = vmax.f32 %v2889_v22, %v2946_v0  ;;  %v3050_v52 = vmax.f32 %v2890_v29, %v2948_v28  ;;  %v3051_v33 = vmax.f32 %v2891_v12, %v2949_v32  ;;  %v4576_v30 = vpack.i.bf16 %v5954_v56, %v5951_v47 }
 0x2bc   : > { %4572 = vrot.lane.b32.xlu0 %v4571_v21, %s4743_s26  ;;  %v3108_v63 = vsel %vm1195_vm4, %v3106_v58, %v3107_v46  ;;  %v3109_v13 = vsel %vm1195_vm4, %v3107_v46, %v4979_v17  ;;  %v1726_v10 = vrot.slane %v6604_v2, 1  ;;  %v1728_v40 = vrot.slane %v6606_v14, 1 }
 0x2bd   : > { %v3209_v42 = vmax.f32 %v3049_v20, %v3106_v58  ;;  %v3210_v59 = vmax.f32 %v3050_v52, %v3108_v63  ;;  %v3211_v11 = vmax.f32 %v3051_v33, %v3109_v13  ;;  %v1872_v60 = vrot.slane %v6604_v2, 2 }
 0x2be   : > { %v1727_v51 = vsel %vm726_vm1, %v4967_v9, %v1726_v10  ;;  %v1729_v47 = vsel %vm726_vm1, %v1726_v10, %v1728_v40  ;;  %v1826_v56 = vmax.f32 %v6606_v14, %v1728_v40  ;;  %v1873_v37 = vrot.slane %v6606_v14, 2 }
 0x2bf   : > { %v3515_v50 = vrot.slane %v3209_v42, 6  ;;  %v3516_v1 = vrot.slane %v3210_v59, 6  ;;  %v3518_v38 = vrot.slane %v3211_v11, 6  ;;  %v1824_v5 = vmax.f32 %v1727_v51, 0.0 }
 0x2c0   : > { %4577 = vrot.lane.b32.xlu0 %v4576_v30, %s4742_s17  ;;  %v1825_v48 = vmax.f32 %v6604_v2, %v1729_v47  ;;  %v1874_v7 = vsel %vm888_vm2, %v1872_v60, %v1873_v37  ;;  %v1970_v61 = vmax.f32 %v1826_v56, %v1873_v37  ;;  %v2030_v0 = vrot.slane %v6604_v2, 3 }
 0x2c1   : > { %v3517_v4 = vsel %vm1405_vm5, %v3515_v50, %v3516_v1  ;;  %v3519_v62 = vsel %vm1405_vm5, %v3516_v1, %v3518_v38  ;;  %v1968_v49 = vmax.f32 %v1824_v5, %v1872_v60  ;;  %v2031_v24 = vrot.slane %v6606_v14, 3 }
 0x2c2   : > { %v4566_v36 = vpack.i.bf16 %v3519_v62, %v3517_v4  ;;  %v1969_v54 = vmax.f32 %v1825_v48, %v1874_v7  ;;  %v2190_v43 = vrot.slane %v6604_v2, 4  ;;  %v2191_v8 = vrot.slane %v6606_v14, 4 }
 0x2c3   : > { %v2032_v23 = vsel %vm1033_vm3, %v2030_v0, %v2031_v24  ;;  %v2033_v12 = vsel %vm1033_vm3, %v2031_v24, %v4977_v16  ;;  %v2128_v15 = vmax.f32 %v1968_v49, %v2030_v0  ;;  %v2506_v58 = vmax.f32 %v2476_v35, %v6899_v31 }
 0x2c4   : > { %4567 = vrot.lane.b32.xlu1 %v4566_v36, %s4743_s26  ;;  %v2129_v34 = vmax.f32 %v1969_v54, %v2032_v23  ;;  %v2130_v26 = vmax.f32 %v1970_v61, %v2033_v12  ;;  %v2192_v22 = vsel %vm1195_vm4, %v2190_v43, %v2191_v8  ;;  %v2193_v2 = vsel %vm1195_vm4, %v2191_v8, %v4979_v17 }
 0x2c5   : > { %v2288_v14 = vmax.f32 %v2128_v15, %v2190_v43  ;;  %v2507_v29 = vmax.f32 %v2477_v18, %v6902_v19  ;;  %v2536_v21 = vmax.f32 %v2506_v58, %v7032_v41  ;;  %v2650_v57 = vrot.slane %v7042_v45, 1  ;;  %v7217_v15 = vpop.permute.xlu0 %4392 }
 0x2c6   : > { %v2289_v35 = vmax.f32 %v2129_v34, %v2192_v22  ;;  %v2290_v28 = vmax.f32 %v2130_v26, %v2193_v2  ;;  %v2652_v32 = vrot.slane %v7045_v55, 1  ;;  %v2799_v46 = vrot.slane %v7042_v45, 2 }
 0x2c7   : > { %v2412_v20 = vrot.slane %v2288_v14, 6  ;;  %v2537_v52 = vmax.f32 %v2507_v29, %v7035_v25  ;;  %v2651_v33 = vsel %vm726_vm1, %v4967_v9, %v2650_v57  ;;  %v2800_v30 = vrot.slane %v7045_v55, 2 }
 0x2c8   : > { %v2413_v44 = vrot.slane %v2289_v35, 6  ;;  %v2415_v18 = vrot.slane %v2290_v28, 6  ;;  %v2653_v63 = vsel %vm726_vm1, %v2650_v57, %v2652_v32  ;;  %v2751_v13 = vmax.f32 %v2651_v33, 0.0 }
 0x2c9   : > { %v2752_v10 = vmax.f32 %v7042_v45, %v2653_v63  ;;  %v2753_v40 = vmax.f32 %v7045_v55, %v2652_v32  ;;  %v2801_v42 = vsel %vm888_vm2, %v2799_v46, %v2800_v30  ;;  %v2954_v59 = vrot.slane %v7042_v45, 3  ;;  %v8086_v63 = vld [vmem:[#allocation43_spill] sm:$0xff] }
 0x2ca   : > { %v7199_v11 = vsel %vm1405_vm5, %v2412_v20, %v2413_v44  ;;  %v7202_v60 = vsel %vm1405_vm5, %v2413_v44, %v2415_v18  ;;  %v2895_v51 = vmax.f32 %v2751_v13, %v2799_v46  ;;  %v2955_v47 = vrot.slane %v7045_v55, 3 }
 0x2cb   : > { %v4581_v56 = vpack.i.bf16 %v7202_v60, %v7199_v11  ;;  %v2566_v37 = vmax.f32 %v2536_v21, %v7199_v11  ;;  %v2567_v50 = vmax.f32 %v2537_v52, %v7202_v60  ;;  %v2896_v1 = vmax.f32 %v2752_v10, %v2801_v42  ;;  %v7231_v10 = vpop.permute.xlu1 %4407 }
 0x2cc   : > { %v2897_v38 = vmax.f32 %v2753_v40, %v2800_v30  ;;  %v2956_v5 = vsel %vm1033_vm3, %v2954_v59, %v2955_v47  ;;  %v2957_v48 = vsel %vm1033_vm3, %v2955_v47, %v4977_v16  ;;  %v3055_v7 = vmax.f32 %v2895_v51, %v2954_v59  ;;  %v7238_v59 = vpop.permute.xlu0 %4397 }
 0x2cd   : > { %4582 = vrot.lane.b32.xlu1 %v4581_v56, %s4742_s17  ;;  %v2654_v61 = vrot.slane %v2566_v37, 1  ;;  %v2656_v0 = vrot.slane %v2567_v50, 1  ;;  %v2802_v4 = vrot.slane %v2566_v37, 2  ;;  %v2803_v62 = vrot.slane %v2567_v50, 2 }
 0x2ce   : > { %v2958_v49 = vrot.slane %v2566_v37, 3  ;;  %v2959_v24 = vrot.slane %v2567_v50, 3  ;;  %v3118_v36 = vrot.slane %v2566_v37, 4  ;;  %v3119_v54 = vrot.slane %v2567_v50, 4 }
 0x2cf   : > { %v2655_v43 = vsel %vm726_vm1, %v4967_v9, %v2654_v61  ;;  %v2657_v8 = vsel %vm726_vm1, %v2654_v61, %v2656_v0  ;;  %v2756_v23 = vmax.f32 %v2567_v50, %v2656_v0  ;;  %v2804_v12 = vsel %vm888_vm2, %v2802_v4, %v2803_v62  ;;  %v7241_v61 = vpop.permute.xlu1 %4417 }
 0x2d0   : > { %v2754_v58 = vmax.f32 %v2655_v43, 0.0  ;;  %v2755_v34 = vmax.f32 %v2566_v37, %v2657_v8  ;;  %v2960_v26 = vsel %vm1033_vm3, %v2958_v49, %v2959_v24  ;;  %v2961_v22 = vsel %vm1033_vm3, %v2959_v24, %v4977_v16 }
 0x2d1   : > { %v2900_v2 = vmax.f32 %v2756_v23, %v2803_v62  ;;  %v3120_v14 = vsel %vm1195_vm4, %v3118_v36, %v3119_v54  ;;  %v3121_v29 = vsel %vm1195_vm4, %v3119_v54, %v4979_v17  ;;  %v3056_v21 = vmax.f32 %v2896_v1, %v2956_v5 }
 0x2d2   : > { %v2898_v57 = vmax.f32 %v2754_v58, %v2802_v4  ;;  %v2899_v35 = vmax.f32 %v2755_v34, %v2804_v12  ;;  %v3057_v28 = vmax.f32 %v2897_v38, %v2957_v48  ;;  %v3114_v32 = vrot.slane %v7042_v45, 4  ;;  %v7252_v34 = vpop.permute.xlu0 %4402 }
 0x2d3   : > { %v3060_v46 = vmax.f32 %v2900_v2, %v2961_v22  ;;  %v3115_v20 = vrot.slane %v7045_v55, 4  ;;  %v4596_v52 = vpack.i.bf16 %v5960_v27, %v5957_v39  ;;  %v1730_v33 = vrot.slane %v6608_v3, 1 }
 0x2d4   : > { %v3058_v30 = vmax.f32 %v2898_v57, %v2958_v49  ;;  %v3059_v44 = vmax.f32 %v2899_v35, %v2960_v26  ;;  %v3215_v18 = vmax.f32 %v3055_v7, %v3114_v32  ;;  %v1732_v13 = vrot.slane %v8086_v63, 1 }
 0x2d5   : > { %v3220_v40 = vmax.f32 %v3060_v46, %v3121_v29  ;;  %v3116_v42 = vsel %vm1195_vm4, %v3114_v32, %v3115_v20  ;;  %v3117_v45 = vsel %vm1195_vm4, %v3115_v20, %v4979_v17  ;;  %v1731_v55 = vsel %vm726_vm1, %v4967_v9, %v1730_v33  ;;  %v7256_v29 = vpop.permute.xlu1 %4422 }
 0x2d6   : > { %v3218_v39 = vmax.f32 %v3058_v30, %v3118_v36  ;;  %v3219_v27 = vmax.f32 %v3059_v44, %v3120_v14  ;;  %v3216_v51 = vmax.f32 %v3056_v21, %v3116_v42  ;;  %v3217_v47 = vmax.f32 %v3057_v28, %v3117_v45 }
 0x2d7   : > { %v3533_v56 = vrot.slane %v3220_v40, 6  ;;  %v3525_v37 = vrot.slane %v3215_v18, 6  ;;  %v1733_v50 = vsel %vm726_vm1, %v1730_v33, %v1732_v13  ;;  %v1827_v1 = vmax.f32 %v1731_v55, 0.0 }
 0x2d8   : > { %v3530_v38 = vrot.slane %v3218_v39, 6  ;;  %v3531_v5 = vrot.slane %v3219_v27, 6  ;;  %v3526_v48 = vrot.slane %v3216_v51, 6  ;;  %v3528_v7 = vrot.slane %v3217_v47, 6 }
 0x2d9   : > { %v1828_v0 = vmax.f32 %v6608_v3, %v1733_v50  ;;  %v1829_v4 = vmax.f32 %v8086_v63, %v1732_v13  ;;  %v1875_v62 = vrot.slane %v6608_v3, 2  ;;  %v1876_v49 = vrot.slane %v8086_v63, 2 }
 0x2da   : > { %v3532_v24 = vsel %vm1405_vm5, %v3530_v38, %v3531_v5  ;;  %v3534_v36 = vsel %vm1405_vm5, %v3531_v5, %v3533_v56  ;;  %v3527_v54 = vsel %vm1405_vm5, %v3525_v37, %v3526_v48  ;;  %v3529_v43 = vsel %vm1405_vm5, %v3526_v48, %v3528_v7  ;;  %v7288_v56 = vpop.permute.xlu1 %4432 }
 0x2db   : > { %v4591_v8 = vpack.i.bf16 %v3534_v36, %v3532_v24  ;;  %v4586_v23 = vpack.i.bf16 %v3529_v43, %v3527_v54  ;;  %v1877_v12 = vsel %vm888_vm2, %v1875_v62, %v1876_v49  ;;  %v1971_v58 = vmax.f32 %v1827_v1, %v1875_v62 }
 0x2dc   : > { %v1972_v26 = vmax.f32 %v1828_v0, %v1877_v12  ;;  %v1973_v22 = vmax.f32 %v1829_v4, %v1876_v49  ;;  %v2034_v2 = vrot.slane %v6608_v3, 3  ;;  %v2035_v14 = vrot.slane %v8086_v63, 3 }
 0x2dd   : > { %4592 = vrot.lane.b32.xlu0 %v4591_v8, %s4743_s26  ;;  %4587 = vrot.lane.b32.xlu1 %v4586_v23, %s4743_s26  ;;  %v2194_v21 = vrot.slane %v6608_v3, 4  ;;  %v2195_v57 = vrot.slane %v8086_v63, 4  ;;  %v2478_v35 = vmax.f32 %v6926_v53, %v6899_v31  ;;  %v2479_v28 = vmax.f32 %v6929_v6, %v6902_v19  ;;  %v7274_v53 = vpop.permute.xlu0 %4412 }
 0x2de   : > { %v2036_v32 = vsel %vm1033_vm3, %v2034_v2, %v2035_v14  ;;  %v2037_v46 = vsel %vm1033_vm3, %v2035_v14, %v4977_v16  ;;  %v2131_v20 = vmax.f32 %v1971_v58, %v2034_v2  ;;  %v2480_v33 = vmax.f32 %v6899_v31, %v7032_v41  ;;  %v7313_v14 = vpop.permute.xlu1 %4437 }
 0x2df   : > { %v2132_v30 = vmax.f32 %v1972_v26, %v2036_v32  ;;  %v2133_v44 = vmax.f32 %v1973_v22, %v2037_v46  ;;  %v2196_v3 = vsel %vm1195_vm4, %v2194_v21, %v2195_v57  ;;  %v2197_v18 = vsel %vm1195_vm4, %v2195_v57, %v4979_v17 }
 0x2e0   : > { %v2291_v63 = vmax.f32 %v2131_v20, %v2194_v21  ;;  %v2481_v6 = vmax.f32 %v6902_v19, %v7035_v25  ;;  %v2482_v13 = vmax.f32 %v7032_v41, %v7199_v11  ;;  %v2483_v40 = vmax.f32 %v7035_v25, %v7202_v60  ;;  %v8087_v19 = vld [vmem:[#allocation59_spill] sm:$0xff] }
 0x2e1   : > { %4597 = vrot.lane.b32.xlu0 %v4596_v52, %s4742_s17  ;;  %v2292_v31 = vmax.f32 %v2132_v30, %v2196_v3  ;;  %v2293_v42 = vmax.f32 %v2133_v44, %v2197_v18  ;;  %v2508_v45 = vmax.f32 %v2478_v35, %v7032_v41  ;;  %v2509_v55 = vmax.f32 %v2479_v28, %v7035_v25  ;;  %v7292_v38 = vpop.permute.xlu0 %4427  ;;  %v8088_v25 = vld [vmem:[#allocation60_spill] sm:$0xff] }
 0x2e2   : > { %v2417_v39 = vrot.slane %v2291_v63, 6  ;;  %v2510_v27 = vmax.f32 %v2480_v33, %v7199_v11  ;;  %v2511_v51 = vmax.f32 %v2481_v6, %v7202_v60  ;;  %v2606_v47 = vrot.slane %v8087_v19, 1 }
 0x2e3   : > { %v2418_v37 = vrot.slane %v2292_v31, 6  ;;  %v2420_v50 = vrot.slane %v2293_v42, 6  ;;  %v2538_v1 = vmax.f32 %v2508_v45, %v7199_v11  ;;  %v2539_v52 = vmax.f32 %v2509_v55, %v7202_v60 }
 0x2e4   : > { %v2607_v41 = vsel %vm726_vm1, %v4967_v9, %v2606_v47  ;;  %v2608_v5 = vrot.slane %v8088_v25, 1  ;;  %v2766_v48 = vrot.slane %v8087_v19, 2  ;;  %v2767_v7 = vrot.slane %v8088_v25, 2 }
 0x2e5   : > { %v2419_v0 = vsel %vm1405_vm5, %v2417_v39, %v2418_v37  ;;  %v2421_v4 = vsel %vm1405_vm5, %v2418_v37, %v2420_v50  ;;  %v2718_v62 = vmax.f32 %v2607_v41, 0.0  ;;  %v2910_v11 = vrot.slane %v8087_v19, 3  ;;  %v7307_v12 = vpop.permute.xlu0 %4442  ;;  %v7340_v37 = vpop.permute.xlu1 %4452 }
 0x2e6   : > { %v4601_v49 = vpack.i.bf16 %v2421_v4, %v2419_v0  ;;  %v2512_v60 = vmax.f32 %v2482_v13, %v2419_v0  ;;  %v2513_v24 = vmax.f32 %v2483_v40, %v2421_v4  ;;  %v2540_v36 = vmax.f32 %v2510_v27, %v2419_v0 }
 0x2e7   : > { %v2541_v54 = vmax.f32 %v2511_v51, %v2421_v4  ;;  %v7302_v43 = vmax.f32 %v2538_v1, %v2419_v0  ;;  %v7304_v8 = vmax.f32 %v2539_v52, %v2421_v4  ;;  %v2609_v23 = vsel %vm726_vm1, %v2606_v47, %v2608_v5 }
 0x2e8   : > { %v2542_v58 = vmax.f32 %v2512_v60, 0.0  ;;  %v2543_v26 = vmax.f32 %v2513_v24, 0.0  ;;  %v7309_v22 = vmax.f32 %v2540_v36, 0.0  ;;  %4602 = vrot.lane.b32.xlu1 %v4601_v49, %s4742_s17  ;;  %v2719_v2 = vmax.f32 %v8087_v19, %v2609_v23 }
 0x2e9   : > { %v7315_v21 = vmax.f32 %v2541_v54, 0.0  ;;  %v2720_v57 = vmax.f32 %v8088_v25, %v2608_v5  ;;  %v2768_v35 = vsel %vm888_vm2, %v2766_v48, %v2767_v7  ;;  %v2862_v28 = vmax.f32 %v2718_v62, %v2766_v48  ;;  %v7334_v39 = vpop.permute.xlu0 %4447 }
 0x2ea   : > { %v7319_v32 = vmax.f32 %v2542_v58, 0.0  ;;  %v7321_v46 = vmax.f32 %v2543_v26, 0.0  ;;  %v2863_v20 = vmax.f32 %v2719_v2, %v2768_v35  ;;  %v2911_v33 = vrot.slane %v8088_v25, 3 }
 0x2eb   : > { %v2864_v30 = vmax.f32 %v2720_v57, %v2767_v7  ;;  %v3022_v44 = vmax.f32 %v2862_v28, %v2910_v11  ;;  %v3070_v3 = vrot.slane %v8087_v19, 4  ;;  %v3071_v18 = vrot.slane %v8088_v25, 4 }
 0x2ec   : > { %v2912_v63 = vsel %vm1033_vm3, %v2910_v11, %v2911_v33  ;;  %v2913_v6 = vsel %vm1033_vm3, %v2911_v33, %v4977_v16  ;;  %v2658_v13 = vrot.slane %v7302_v43, 1  ;;  %v2660_v40 = vrot.slane %v7304_v8, 1 }
 0x2ed   : > { %v3023_v31 = vmax.f32 %v2863_v20, %v2912_v63  ;;  %v3024_v42 = vmax.f32 %v2864_v30, %v2913_v6  ;;  %v3072_v45 = vsel %vm1195_vm4, %v3070_v3, %v3071_v18  ;;  %v3073_v55 = vsel %vm1195_vm4, %v3071_v18, %v4979_v17  ;;  %v7353_v2 = vpop.permute.xlu0 %4462  ;;  %v7358_v20 = vpop.permute.xlu1 %4457  ;;  %v8090_v63 = vld [vmem:[#allocation61_spill] sm:$0xff] }
 0x2ee   : > { %v3182_v27 = vmax.f32 %v3022_v44, %v3070_v3  ;;  %v2659_v51 = vsel %vm726_vm1, %v4967_v9, %v2658_v13  ;;  %v2661_v19 = vsel %vm726_vm1, %v2658_v13, %v2660_v40  ;;  %v2759_v47 = vmax.f32 %v7304_v8, %v2660_v40  ;;  %v8089_v44 = vld [vmem:[#allocation62_spill] sm:$0xff] }
 0x2ef   : > { %v3183_v50 = vmax.f32 %v3023_v31, %v3072_v45  ;;  %v3184_v1 = vmax.f32 %v3024_v42, %v3073_v55  ;;  %v2757_v52 = vmax.f32 %v2659_v51, 0.0  ;;  %v2758_v41 = vmax.f32 %v7302_v43, %v2661_v19 }
 0x2f0   : > { %v3470_v25 = vrot.slane %v3182_v27, 6  ;;  %v2805_v5 = vrot.slane %v7302_v43, 2  ;;  %v2806_v48 = vrot.slane %v7304_v8, 2  ;;  %v2962_v7 = vrot.slane %v7302_v43, 3 }
 0x2f1   : > { %v3471_v0 = vrot.slane %v3183_v50, 6  ;;  %v3473_v4 = vrot.slane %v3184_v1, 6  ;;  %v2963_v62 = vrot.slane %v7304_v8, 3  ;;  %v3122_v11 = vrot.slane %v7302_v43, 4 }
 0x2f2   : > { %v2807_v49 = vsel %vm888_vm2, %v2805_v5, %v2806_v48  ;;  %v2901_v60 = vmax.f32 %v2757_v52, %v2805_v5  ;;  %v2903_v24 = vmax.f32 %v2759_v47, %v2806_v48  ;;  %v3123_v36 = vrot.slane %v7304_v8, 4 }
 0x2f3   : > { %v3472_v54 = vsel %vm1405_vm5, %v3470_v25, %v3471_v0  ;;  %v3474_v23 = vsel %vm1405_vm5, %v3471_v0, %v3473_v4  ;;  %v2902_v58 = vmax.f32 %v2758_v41, %v2807_v49  ;;  %v2964_v26 = vsel %vm1033_vm3, %v2962_v7, %v2963_v62  ;;  %v7374_v25 = vpop.permute.xlu0 %4467  ;;  %v7378_v4 = vpop.permute.xlu1 %4472 }
 0x2f4   : > { %v4606_v57 = vpack.i.bf16 %v3474_v23, %v3472_v54  ;;  %v2965_v35 = vsel %vm1033_vm3, %v2963_v62, %v4977_v16  ;;  %v3061_v43 = vmax.f32 %v2901_v60, %v2962_v7  ;;  %v3124_v28 = vsel %vm1195_vm4, %v3122_v11, %v3123_v36 }
 0x2f5   : > { %v3062_v33 = vmax.f32 %v2902_v58, %v2964_v26  ;;  %v3063_v8 = vmax.f32 %v2903_v24, %v2965_v35  ;;  %v3125_v30 = vsel %vm1195_vm4, %v3123_v36, %v4979_v17  ;;  %v2610_v3 = vrot.slane %v8089_v44, 1 }
 0x2f6   : > { %4607 = vrot.lane.b32.xlu0 %v4606_v57, %s4743_s26  ;;  %v3221_v18 = vmax.f32 %v3061_v43, %v3122_v11  ;;  %v2612_v6 = vrot.slane %v8090_v63, 1  ;;  %v2769_v13 = vrot.slane %v8089_v44, 2  ;;  %v2770_v40 = vrot.slane %v8090_v63, 2 }
 0x2f7   : > { %v3222_v31 = vmax.f32 %v3062_v33, %v3124_v28  ;;  %v3223_v42 = vmax.f32 %v3063_v8, %v3125_v30  ;;  %v2611_v45 = vsel %vm726_vm1, %v4967_v9, %v2610_v3  ;;  %v2914_v55 = vrot.slane %v8089_v44, 3 }
 0x2f8   : > { %v3535_v27 = vrot.slane %v3221_v18, 6  ;;  %v2613_v51 = vsel %vm726_vm1, %v2610_v3, %v2612_v6  ;;  %v2721_v19 = vmax.f32 %v2611_v45, 0.0  ;;  %v2723_v47 = vmax.f32 %v8090_v63, %v2612_v6 }
 0x2f9   : > { %v3536_v50 = vrot.slane %v3222_v31, 6  ;;  %v3538_v1 = vrot.slane %v3223_v42, 6  ;;  %v2722_v52 = vmax.f32 %v8089_v44, %v2613_v51  ;;  %v2771_v41 = vsel %vm888_vm2, %v2769_v13, %v2770_v40  ;;  %v7401_v42 = vpop.permute.xlu1 %4477 }
 0x2fa   : > { %v2865_v5 = vmax.f32 %v2721_v19, %v2769_v13  ;;  %v2867_v48 = vmax.f32 %v2723_v47, %v2770_v40  ;;  %v2915_v7 = vrot.slane %v8090_v63, 3  ;;  %v3074_v0 = vrot.slane %v8089_v44, 4 }
 0x2fb   : > { %v3537_v62 = vsel %vm1405_vm5, %v3535_v27, %v3536_v50  ;;  %v3539_v11 = vsel %vm1405_vm5, %v3536_v50, %v3538_v1  ;;  %v2866_v49 = vmax.f32 %v2722_v52, %v2771_v41  ;;  %v3075_v60 = vrot.slane %v8090_v63, 4  ;;  %v7395_v63 = vpop.permute.xlu0 %4482 }
 0x2fc   : > { %v4611_v24 = vpack.i.bf16 %v3539_v11, %v3537_v62  ;;  %v2916_v36 = vsel %vm1033_vm3, %v2914_v55, %v2915_v7  ;;  %v2917_v54 = vsel %vm1033_vm3, %v2915_v7, %v4977_v16  ;;  %v3025_v23 = vmax.f32 %v2865_v5, %v2914_v55 }
 0x2fd   : > { %v3026_v58 = vmax.f32 %v2866_v49, %v2916_v36  ;;  %v3027_v26 = vmax.f32 %v2867_v48, %v2917_v54  ;;  %v3076_v57 = vsel %vm1195_vm4, %v3074_v0, %v3075_v60  ;;  %v3077_v35 = vsel %vm1195_vm4, %v3075_v60, %v4979_v17 }
 0x2fe   : > { %4612 = vrot.lane.b32.xlu1 %v4611_v24, %s4743_s26  ;;  %v3185_v43 = vmax.f32 %v3025_v23, %v3074_v0  ;;  %v2662_v28 = vrot.slane %v7309_v22, 1  ;;  %v2664_v33 = vrot.slane %v7315_v21, 1  ;;  %v2808_v8 = vrot.slane %v7309_v22, 2 }
 0x2ff   : > { %v3186_v30 = vmax.f32 %v3026_v58, %v3076_v57  ;;  %v3187_v44 = vmax.f32 %v3027_v26, %v3077_v35  ;;  %v2809_v3 = vrot.slane %v7315_v21, 2  ;;  %v2966_v18 = vrot.slane %v7309_v22, 3  ;;  %v7422_v57 = vpop.permute.xlu1 %4492 }
 0x300   : > { %v3475_v6 = vrot.slane %v3185_v43, 6  ;;  %v2663_v13 = vsel %vm726_vm1, %v4967_v9, %v2662_v28  ;;  %v2665_v40 = vsel %vm726_vm1, %v2662_v28, %v2664_v33  ;;  %v2762_v31 = vmax.f32 %v7315_v21, %v2664_v33 }
 0x301   : > { %v3476_v45 = vrot.slane %v3186_v30, 6  ;;  %v3478_v55 = vrot.slane %v3187_v44, 6  ;;  %v2760_v27 = vmax.f32 %v2663_v13, 0.0  ;;  %v2761_v51 = vmax.f32 %v7309_v22, %v2665_v40 }
 0x302   : > { %v2810_v19 = vsel %vm888_vm2, %v2808_v8, %v2809_v3  ;;  %v2906_v47 = vmax.f32 %v2762_v31, %v2809_v3  ;;  %v2967_v50 = vrot.slane %v7315_v21, 3  ;;  %v3126_v1 = vrot.slane %v7309_v22, 4  ;;  %v7414_v22 = vpop.permute.xlu0 %4487 }
 0x303   : > { %v3477_v52 = vsel %vm1405_vm5, %v3475_v6, %v3476_v45  ;;  %v3479_v41 = vsel %vm1405_vm5, %v3476_v45, %v3478_v55  ;;  %v2904_v5 = vmax.f32 %v2760_v27, %v2808_v8  ;;  %v2905_v48 = vmax.f32 %v2761_v51, %v2810_v19 }
 0x304   : > { %v4621_v7 = vpack.i.bf16 %v3479_v41, %v3477_v52  ;;  %v2968_v0 = vsel %vm1033_vm3, %v2966_v18, %v2967_v50  ;;  %v2969_v62 = vsel %vm1033_vm3, %v2967_v50, %v4977_v16  ;;  %v3127_v11 = vrot.slane %v7315_v21, 4 }
 0x305   : > { %v3064_v49 = vmax.f32 %v2904_v5, %v2966_v18  ;;  %v3065_v60 = vmax.f32 %v2905_v48, %v2968_v0  ;;  %v3066_v24 = vmax.f32 %v2906_v47, %v2969_v62  ;;  %v2666_v36 = vrot.slane %v7319_v32, 1  ;;  %v7439_v5 = vpop.permute.xlu1 %4497 }
 0x306   : > { %4622 = vrot.lane.b32.xlu0 %v4621_v7, %s4743_s26  ;;  %v3128_v54 = vsel %vm1195_vm4, %v3126_v1, %v3127_v11  ;;  %v3129_v23 = vsel %vm1195_vm4, %v3127_v11, %v4979_v17  ;;  %v2668_v58 = vrot.slane %v7321_v46, 1  ;;  %v2811_v26 = vrot.slane %v7319_v32, 2  ;;  %v7435_v47 = vpop.permute.xlu0 %4502 }
 0x307   : > { %v3224_v21 = vmax.f32 %v3064_v49, %v3126_v1  ;;  %v3225_v35 = vmax.f32 %v3065_v60, %v3128_v54  ;;  %v3226_v43 = vmax.f32 %v3066_v24, %v3129_v23  ;;  %v2667_v28 = vsel %vm726_vm1, %v4967_v9, %v2666_v36 }
 0x308   : > { %v2669_v33 = vsel %vm726_vm1, %v2666_v36, %v2668_v58  ;;  %v2763_v8 = vmax.f32 %v2667_v28, 0.0  ;;  %v2765_v30 = vmax.f32 %v7321_v46, %v2668_v58  ;;  %v2812_v44 = vrot.slane %v7321_v46, 2 }
 0x309   : > { %v3540_v3 = vrot.slane %v3224_v21, 6  ;;  %v3541_v18 = vrot.slane %v3225_v35, 6  ;;  %v3543_v6 = vrot.slane %v3226_v43, 6  ;;  %v2764_v13 = vmax.f32 %v7319_v32, %v2669_v33  ;;  %v7450_v58 = vpop.permute.xlu1 %4512 }
 0x30a   : > { %v2813_v40 = vsel %vm888_vm2, %v2811_v26, %v2812_v44  ;;  %v2907_v31 = vmax.f32 %v2763_v8, %v2811_v26  ;;  %v2909_v45 = vmax.f32 %v2765_v30, %v2812_v44  ;;  %v2970_v55 = vrot.slane %v7319_v32, 3  ;;  %v7448_v36 = vpop.permute.xlu0 %4507 }
 0x30b   : > { %v3542_v9 = vsel %vm1405_vm5, %v3540_v3, %v3541_v18  ;;  %v3544_v27 = vsel %vm1405_vm5, %v3541_v18, %v3543_v6  ;;  %v2908_v51 = vmax.f32 %v2764_v13, %v2813_v40  ;;  %v2971_v19 = vrot.slane %v7321_v46, 3 }
 0x30c   : > { %v4616_v50 = vpack.i.bf16 %v3544_v27, %v3542_v9  ;;  %v3067_v1 = vmax.f32 %v2907_v31, %v2970_v55  ;;  %v3130_v52 = vrot.slane %v7319_v32, 4  ;;  %v3131_v41 = vrot.slane %v7321_v46, 4  ;;  %v8093_v27 = vld [vmem:[#allocation19_spill] sm:$0xff] }
 0x30d   : > { %v2972_v48 = vsel %vm1033_vm3, %v2970_v55, %v2971_v19  ;;  %v2973_v7 = vsel %vm1033_vm3, %v2971_v19, %v4977_v16  ;;  %v4400_v43 = vunpack.i.h.bf16 %v7238_v59  ;;  %v4399_v28 = vunpack.i.l.bf16 %v7238_v59  ;;  %v8091_v59 = vld [vmem:[#allocation14_spill] sm:$0xff] }
 0x30e   : > { %4617 = vrot.lane.b32.xlu1 %v4616_v50, %s4743_s26  ;;  %v3068_v0 = vmax.f32 %v2908_v51, %v2972_v48  ;;  %v3069_v62 = vmax.f32 %v2909_v45, %v2973_v7  ;;  %v3132_v11 = vsel %vm1195_vm4, %v3130_v52, %v3131_v41  ;;  %v3133_v49 = vsel %vm1195_vm4, %v3131_v41, %v4979_v17  ;;  %v7455_v35 = vpop.permute.xlu0 %4522  ;;  %v7457_v17 = vpop.permute.xlu1 %4517  ;;  %v8097_v48 = vld [vmem:[#allocation23_spill] sm:$0xff] }
 0x30f   : > { %v3227_v60 = vmax.f32 %v3067_v1, %v3130_v52  ;;  %v4405_v33 = vunpack.i.h.bf16 %v7252_v34  ;;  %v4404_v8 = vunpack.i.l.bf16 %v7252_v34  ;;  %v4410_v30 = vunpack.i.h.bf16 %v7231_v10  ;;  %v8095_v1 = vld [vmem:[#allocation18_spill] sm:$0xff]  ;;  %v8096_v52 = vld [vmem:[#allocation16_spill] sm:$0xff] }
 0x310   : > { %v3228_v32 = vmax.f32 %v3068_v0, %v3132_v11  ;;  %v3229_v24 = vmax.f32 %v3069_v62, %v3133_v49  ;;  %v4409_v44 = vunpack.i.l.bf16 %v7231_v10  ;;  %v4415_v3 = vunpack.i.h.bf16 %v7274_v53  ;;  %v8092_v10 = vld [vmem:[#allocation13_spill] sm:$0xff]  ;;  %v8099_v49 = vld [vmem:[#allocation22_spill] sm:$0xff] }
 0x311   : > { %v3545_v46 = vrot.slane %v3227_v60, 6  ;;  %v4395_v18 = vunpack.i.h.bf16 %v7217_v15  ;;  %v4414_v6 = vunpack.i.l.bf16 %v7274_v53  ;;  %v4420_v13 = vunpack.i.h.bf16 %v7241_v61  ;;  %v8094_v53 = vld [vmem:[#allocation17_spill] sm:$0xff] }
 0x312   : > { %v3546_v54 = vrot.slane %v3228_v32, 6  ;;  %v3548_v23 = vrot.slane %v3229_v24, 6  ;;  %v4394_v40 = vunpack.i.l.bf16 %v7217_v15  ;;  %v3654_v31 = vsel %vm3646_vm6, %v8091_v59, %v4400_v43  ;;  %v7474_v55 = vpop.permute.xlu0 %4532  ;;  %v8098_v62 = vld [vmem:[#allocation21_spill] sm:$0xff] }
 0x313   : > { %v4419_v34 = vunpack.i.l.bf16 %v7241_v61  ;;  %v4430_v45 = vunpack.i.h.bf16 %v7292_v38  ;;  %v3653_v9 = vsel %vm3646_vm6, %v8092_v10, %v4399_v28  ;;  %v3656_v51 = vsel %vm3646_vm6, %v8093_v27, %v4405_v33  ;;  %v7483_v50 = vpop.permute.xlu1 %4527 }
 0x314   : > { %v3547_v16 = vsel %vm1405_vm5, %v3545_v46, %v3546_v54  ;;  %v3549_v26 = vsel %vm1405_vm5, %v3546_v54, %v3548_v23  ;;  %v3655_v19 = vsel %vm3646_vm6, %v8094_v53, %v4404_v8  ;;  %v4435_v15 = vunpack.i.h.bf16 %v7288_v56  ;;  %v8100_v46 = vld [vmem:[#allocation20_spill] sm:$0xff]  ;;  %v8101_v23 = vld [vmem:[#allocation27_spill] sm:$0xff] }
 0x315   : > { %v4626_v21 = vpack.i.bf16 %v3549_v26, %v3547_v16  ;;  %v3658_v61 = vsel %vm3646_vm6, %v8095_v1, %v4410_v30  ;;  %v3657_v41 = vsel %vm3646_vm6, %v8096_v52, %v4409_v44  ;;  %v3660_v7 = vsel %vm3646_vm6, %v8097_v48, %v4415_v3  ;;  %v8102_v3 = vld [vmem:[#allocation12_spill] sm:$0xff] }
 0x316   : > { %v4434_v0 = vunpack.i.l.bf16 %v7288_v56  ;;  %v3659_v11 = vsel %vm3646_vm6, %v8098_v62, %v4414_v6  ;;  %v7496_v60 = vsel %vm3646_vm6, %v8099_v49, %v4420_v13  ;;  %v4424_v32 = vunpack.i.l.bf16 %v7256_v29 }
 0x317   : > { %4627 = vrot.lane.b32.xlu1 %v4626_v21, %s4743_s26  ;;  %v4445_v24 = vunpack.i.h.bf16 %v7307_v12  ;;  %v7502_v54 = vsel %vm3646_vm6, %v8100_v46, %v4419_v34  ;;  %v7506_v16 = vsel %vm3646_vm6, %v8101_v23, %v4430_v45  ;;  %v4429_v56 = vunpack.i.l.bf16 %v7292_v38  ;;  %v7519_v38 = vpop.permute.xlu0 %4537  ;;  %s7697_s26 = scalar_lea.vmem [#allocation5], %s4150_s25  ;;  %s4188_s25 = sshll.u32 %s4798_s22, 12 }
 0x318   : > { %v4425_v26 = vunpack.i.h.bf16 %v7256_v29  ;;  %v3686_v21 = vsel %vm331_vm0, %v3654_v31, %v4435_v15  ;;  %v4444_v43 = vunpack.i.l.bf16 %v7307_v12  ;;  %v4485_v28 = vunpack.i.h.bf16 %v7395_v63  ;;  %v8103_v12 = vld [vmem:[#allocation15_spill] sm:$0xff]  ;;  %v4543_v31 = vpop.permute.xlu1 %4542  ;;  %s4070_s8 = sshll.u32 %s7697_s26, 4  ;;  %s7794_s9 = scalar_lea.hbm %s7848_s5, %s4188_s25  ;;  %s7796_s8 = int_to_ptr.vmem [resolvable:$true] %s4070_s8 }
 0x319   : > { %v4484_v33 = vunpack.i.l.bf16 %v7395_v63  ;;  %v3685_v8 = vsel %vm331_vm0, %v3653_v9, %v4434_v0  ;;  %v4495_v30 = vunpack.i.h.bf16 %v7422_v57  ;;  %v4494_v44 = vunpack.i.l.bf16 %v7422_v57  ;;  %s4057_s22 = scalar_lea.sflag [#allocation4], %s4874_s23  ;;  %s4671_s10 = scalar_lea.vmem %s7796_s8, 4096 }
 0x31a   : > { %v3651_v6 = vsel %vm3646_vm6, %v8102_v3, %v4394_v40  ;;  %v3688_v29 = vsel %vm331_vm0, %v3656_v51, %v4445_v24  ;;  %v4455_v13 = vunpack.i.h.bf16 %v7340_v37  ;;  %v3652_v59 = vsel %vm3646_vm6, %v8103_v12, %v4395_v18  ;;  %p4672_p11 = scmp.ne.s32.totalorder %s7796_s8, %s4671_s10  ;;  %p4678_p5 = scmp.lt.s32.totalorder %s7796_s8, %s4676_s28 }
 0x31b   : > { %v3683_v63 = vsel %vm331_vm0, %v3651_v6, %v4424_v32  ;;  %v3684_v34 = vsel %vm331_vm0, %v3652_v59, %v4425_v26  ;;  %v4505_v57 = vunpack.i.h.bf16 %v7435_v47  ;;  %v4504_v45 = vunpack.i.l.bf16 %v7435_v47  ;;  %v8104_v32 = vld [vmem:[#allocation25_spill] sm:$0xff]  ;;  %p4679_p7 = scmp.lt.s32.totalorder %s4677_s12, %s4671_s10 }
 0x31c   : > { %v4454_v40 = vunpack.i.l.bf16 %v7340_v37  ;;  %v3716_v10 = vsel %vm3711_vm7, %v3683_v63, %v4484_v33  ;;  %v3717_v9 = vsel %vm3711_vm7, %v3684_v34, %v4485_v28  ;;  %v3718_v27 = vsel %vm3711_vm7, %v3685_v8, %v4494_v44  ;;  %v8106_v8 = vld [vmem:[#allocation34_spill] sm:$0xff]  ;;  %p4673_p13 = pnand %p4672_p11, %p8123_p12 }
 0x31d   : > { %v4465_v18 = vunpack.i.h.bf16 %v7353_v2  ;;  %v4464_v51 = vunpack.i.l.bf16 %v7353_v2  ;;  %v3746_v53 = vpack.c.bf16 %v3717_v9, %v3716_v10  ;;  %v3719_v15 = vsel %vm3711_vm7, %v3686_v21, %v4495_v30  ;;  %v4553_v2 = vpop.permute.xlu0 %4552  ;;  %v8108_v10 = vld [vmem:[#allocation41_spill] sm:$0xff]  ;;  %p4680_p8 = por %p4679_p7, %p4678_p5 }
 0x31e   : > { %v3687_v1 = vsel %vm331_vm0, %v3655_v19, %v4444_v43  ;;  %v4480_v52 = vunpack.i.h.bf16 %v7401_v42  ;;  %v3747_v47 = vpack.c.bf16 %v3719_v15, %v3718_v27  ;;  %v4515_v37 = vunpack.i.h.bf16 %v7450_v58  ;;  %p4674_p4 = pneg %p4673_p13 }
 0x31f   : > { %v4479_v48 = vunpack.i.l.bf16 %v7401_v42  ;;  %4293 = vmatprep.mubr.bf16.mxu1 %v3746_v53  ;;  %v4514_v0 = vunpack.i.l.bf16 %v7450_v58  ;;  %v3720_v62 = vsel %vm3711_vm7, %v3687_v1, %v4504_v45  ;;  %v3721_v49 = vsel %vm3711_vm7, %v3688_v29, %v4505_v57  ;;  %v8107_v45 = vld [vmem:[#allocation44_spill] sm:$0xff] }
 0x320   : > { %v3663_v24 = vsel %vm3646_vm6, %v8104_v32, %v4429_v56  ;;  %v3690_v19 = vsel %vm331_vm0, %v3658_v61, %v4455_v13  ;;  %v3689_v46 = vsel %vm331_vm0, %v3657_v41, %v4454_v40  ;;  %4294 = vmatmul.mubr.bf16.vlgmr.msra.gmra.mxu1 %v3747_v47  ;;  %v3748_v23 = vpack.c.bf16 %v3721_v49, %v3720_v62  ;;  %v8105_v56 = vld [vmem:[#allocation38_spill] sm:$0xff]  ;;  %v8110_v32 = vld [vmem:[#allocation40_spill] sm:$0xff]  ;;  %p4681_p10 = pnand %p4680_p8, %p4674_p4 }
 0x321   : > { %v3692_v42 = vsel %vm331_vm0, %v3660_v7, %v4465_v18  ;;  %v3691_v21 = vsel %vm331_vm0, %v3659_v11, %v4464_v51  ;;  %v3722_v58 = vsel %vm3711_vm7, %v3689_v46, %v4514_v0  ;;  %v3723_v43 = vsel %vm3711_vm7, %v3690_v19, %v4515_v37  ;;  %v7568_v34 = vpop.permute.xlu0 %4557 }
 0x322   : > { %v4475_v28 = vunpack.i.h.bf16 %v7378_v4  ;;  %v4474_v33 = vunpack.i.l.bf16 %v7378_v4  ;;  %v3674_v61 = vsel %vm3646_vm6, %v8105_v56, %v4480_v52  ;;  %4297 = vmatprep.mubr.bf16.mxu1 %v3748_v23  ;;  %v4535_v41 = vunpack.i.h.bf16 %v7474_v55 }
 0x323   : > { %v3673_v30 = vsel %vm3646_vm6, %v8106_v8, %v4479_v48  ;;  %v4490_v7 = vunpack.i.h.bf16 %v7414_v22  ;;  %v4534_v11 = vunpack.i.l.bf16 %v7474_v55  ;;  %v4530_v44 = vunpack.i.h.bf16 %v7483_v50  ;;  %v8112_v8 = vld [vmem:[#allocation24_spill] sm:$0xff] }
 0x324   : > { %v4489_v3 = vunpack.i.l.bf16 %v7414_v22  ;;  %v3749_v6 = vpack.c.bf16 %v3723_v43, %v3722_v58  ;;  %v4529_v4 = vunpack.i.l.bf16 %v7483_v50  ;;  %v4545_v29 = vunpack.i.h.bf16 %v4543_v31 }
 0x325   : > { %v7564_v13 = vsel %vm331_vm0, %v3674_v61, %v4530_v44  ;;  %v4544_v12 = vunpack.i.l.bf16 %v4543_v31  ;;  %v3724_v59 = vsel %vm3711_vm7, %v3691_v21, %v4534_v11  ;;  %v3725_v63 = vsel %vm3711_vm7, %v3692_v42, %v4535_v41  ;;  %v8111_v61 = vld [vmem:[#allocation26_spill] sm:$0xff]  ;;  %v8114_v11 = vld [vmem:[#allocation29_spill] sm:$0xff] }
 0x326   : > { %v4548_v26 = vpop.permute.xlu1 %4547  ;;  %v4440_v55 = vunpack.i.h.bf16 %v7313_v14  ;;  %v4439_v57 = vunpack.i.l.bf16 %v7313_v14  ;;  %v7573_v22 = vsel %vm331_vm0, %v3673_v30, %v4529_v4  ;;  %v7577_v50 = vsel %vm3646_vm6, %v8107_v45, %v4545_v29 }
 0x327   : > { %v7581_v31 = vsel %vm3646_vm6, %v8108_v10, %v4544_v12  ;;  %v3750_v9 = vpack.c.bf16 %v3725_v63, %v3724_v59  ;;  %v4555_v27 = vunpack.i.h.bf16 %v4553_v2  ;;  %v4554_v18 = vunpack.i.l.bf16 %v4553_v2  ;;  %v8109_v2 = vld [vmem:[#allocation42_spill] sm:$0xff] }
 0x328   : > { %v3694_v51 = vsel %vm331_vm0, %v7496_v60, %v4475_v28  ;;  %v3693_v14 = vsel %vm331_vm0, %v7502_v54, %v4474_v33  ;;  %4298 = vmatmul.mubr.bf16.gmra.mxu1 %v3749_v6  ;;  %v4550_v53 = vunpack.i.h.bf16 %v4548_v26  ;;  %v4549_v15 = vunpack.i.l.bf16 %v4548_v26 }
 0x329   : > { %v3696_v1 = vsel %vm331_vm0, %v7506_v16, %v4490_v7  ;;  %v3695_v52 = vsel %vm331_vm0, %v3663_v24, %v4489_v3  ;;  %4301 = vmatprep.mubr.bf16.mxu1 %v3750_v9  ;;  %v4450_v54 = vunpack.i.h.bf16 %v7334_v39  ;;  %v4449_v49 = vunpack.i.l.bf16 %v7334_v39  ;;  %v8113_v7 = vld [vmem:[#allocation31_spill] sm:$0xff] }
 0x32a   : > { %v4563_v40 = vpop.permute.xlu1 %4562  ;;  %v3726_v48 = vsel %vm3711_vm7, %v3693_v14, %v4549_v15  ;;  %v3727_v0 = vsel %vm3711_vm7, %v3694_v51, %v4550_v53  ;;  %v3728_v60 = vsel %vm3711_vm7, %v3695_v52, %v4554_v18  ;;  %v3729_v62 = vsel %vm3711_vm7, %v3696_v1, %v4555_v27  ;;  %v8115_v1 = vld [vmem:[#allocation30_spill] sm:$0xff] }
 0x32b   : > { %v4565_v47 = vunpack.i.h.bf16 %v4563_v40  ;;  %v4564_v37 = vunpack.i.l.bf16 %v4563_v40  ;;  %v4500_v46 = vunpack.i.h.bf16 %v7439_v5  ;;  %v4499_v23 = vunpack.i.l.bf16 %v7439_v5 }
 0x32c   : > { %v4510_v26 = vunpack.i.h.bf16 %v7448_v36  ;;  %v3751_v42 = vpack.c.bf16 %v3727_v0, %v3726_v48  ;;  %v4509_v58 = vunpack.i.l.bf16 %v7448_v36  ;;  %v3752_v39 = vpack.c.bf16 %v3729_v62, %v3728_v60  ;;  %v8117_v48 = vld [vmem:[#allocation39_spill] sm:$0xff]  ;;  %v8118_v0 = vld [vmem:[#allocation37_spill] sm:$0xff] }
 0x32d   : > { %v7598_v16 = vsel %vm3646_vm6, %v8109_v2, %v4565_v47  ;;  %v7602_v24 = vsel %vm3646_vm6, %v8110_v32, %v4564_v37  ;;  %v3666_v41 = vsel %vm3646_vm6, %v8111_v61, %v4440_v55  ;;  %v3665_v30 = vsel %vm3646_vm6, %v8112_v8, %v4439_v57  ;;  %v8116_v47 = vld [vmem:[#allocation28_spill] sm:$0xff]  ;;  %v8119_v8 = vld [vmem:[#allocation9_spill] sm:$0xff] }
 0x32e   : > { %v4573_v19 = vpop.permute.xlu0 %4572  ;;  %v3668_v5 = vsel %vm3646_vm6, %v8113_v7, %v4450_v54  ;;  %v3667_v44 = vsel %vm3646_vm6, %v8114_v11, %v4449_v49  ;;  %v3698_v3 = vsel %vm331_vm0, %v3666_v41, %v4500_v46  ;;  %v3697_v36 = vsel %vm331_vm0, %v3665_v30, %v4499_v23  ;;  %v8120_v7 = vld [vmem:[#allocation8_spill] sm:$0xff] }
 0x32f   : > { %v4575_v33 = vunpack.i.h.bf16 %v4573_v19  ;;  %v4574_v56 = vunpack.i.l.bf16 %v4573_v19  ;;  %v3700_v6 = vsel %vm331_vm0, %v3668_v5, %v4510_v26  ;;  %v3699_v4 = vsel %vm331_vm0, %v3667_v44, %v4509_v58 }
 0x330   : > { %4302 = vmatmul.mubr.bf16.gmra.mxu1 %v3751_v42  ;;  %v4460_v10 = vunpack.i.h.bf16 %v7358_v20  ;;  %v4459_v9 = vunpack.i.l.bf16 %v7358_v20  ;;  %v4470_v27 = vunpack.i.h.bf16 %v7374_v25  ;;  %v4469_v18 = vunpack.i.l.bf16 %v7374_v25 }
 0x331   : > { %4305 = vmatprep.mubr.bf16.mxu1 %v3752_v39  ;;  %v3732_v59 = vsel %vm3711_vm7, %v3699_v4, %v4574_v56  ;;  %v3733_v63 = vsel %vm3711_vm7, %v3700_v6, %v4575_v33  ;;  %v4525_v51 = vunpack.i.h.bf16 %v7455_v35  ;;  %v4524_v14 = vunpack.i.l.bf16 %v7455_v35 }
 0x332   : > { %v3754_v57 = vpack.c.bf16 %v3733_v63, %v3732_v59  ;;  %v4578_v45 = vpop.permute.xlu0 %4577  ;;  %v4520_v53 = vunpack.i.h.bf16 %v7457_v17  ;;  %v4519_v15 = vunpack.i.l.bf16 %v7457_v17  ;;  %v3670_v52 = vsel %vm3646_vm6, %v8115_v1, %v4460_v10 }
 0x333   : > { %v3669_v37 = vsel %vm3646_vm6, %v8116_v47, %v4459_v9  ;;  %v3672_v20 = vsel %vm3646_vm6, %v8117_v48, %v4470_v27  ;;  %v3671_v25 = vsel %vm3646_vm6, %v8118_v0, %v4469_v18  ;;  %v4539_v33 = vunpack.i.l.bf16 %v7519_v38 }
 0x334   : > { %v3704_v17 = vsel %vm331_vm0, %v3672_v20, %v4525_v51  ;;  %v3703_v32 = vsel %vm331_vm0, %v3671_v25, %v4524_v14  ;;  %v3702_v19 = vsel %vm331_vm0, %v3670_v52, %v4520_v53  ;;  %v3701_v46 = vsel %vm331_vm0, %v3669_v37, %v4519_v15  ;;  %v8121_v14 = vld [vmem:[#allocation11_spill] sm:$0xff]  ;;  %v8122_v15 = vld [vmem:[#allocation10_spill] sm:$0xff] }
 0x335   : > { %v4580_v56 = vunpack.i.h.bf16 %v4578_v45  ;;  %v4579_v61 = vunpack.i.l.bf16 %v4578_v45  ;;  %v3647_v5 = vsel %vm3646_vm6, %v8120_v7, %v4539_v33  ;;  %v4560_v10 = vunpack.i.h.bf16 %v7568_v34 }
 0x336   : > { %v4568_v21 = vpop.permute.xlu1 %4567  ;;  %v4559_v9 = vunpack.i.l.bf16 %v7568_v34 }
 0x337   : > { %v4570_v43 = vunpack.i.h.bf16 %v4568_v21  ;;  %v4569_v28 = vunpack.i.l.bf16 %v4568_v21  ;;  %v3650_v53 = vsel %vm3646_vm6, %v8121_v14, %v4560_v10 }
 0x338   : > { %v3649_v1 = vsel %vm3646_vm6, %v8122_v15, %v4559_v9 }
 0x339   : > { %v3730_v29 = vsel %vm3711_vm7, %v3697_v36, %v4569_v28  ;;  %v3731_v12 = vsel %vm3711_vm7, %v3698_v3, %v4570_v43  ;;  %v4540_v28 = vunpack.i.h.bf16 %v7519_v38  ;;  %v3679_v3 = vsel %vm331_vm0, %v3647_v5, %v4579_v61 }
 0x33a   : > { %v3753_v55 = vpack.c.bf16 %v3731_v12, %v3730_v29 }
 0x33b   : > { %v3648_v30 = vsel %vm3646_vm6, %v8119_v8, %v4540_v28 }
 0x33c   : > { %4306 = vmatmul.mubr.bf16.gmra.mxu1 %v3753_v55  ;;  %v3680_v36 = vsel %vm331_vm0, %v3648_v30, %v4580_v56 }
 0x33d   : > { %4309 = vmatprep.mubr.bf16.mxu1 %v3754_v57 }
 0x33f   : > { %v7624_v40 = vpop.permute.xlu1 %4582 }
 0x340   : > { %v4585_v20 = vunpack.i.h.bf16 %v7624_v40  ;;  %v4584_v0 = vunpack.i.l.bf16 %v7624_v40 }
 0x34f   : > { %v4593_v60 = vpop.permute.xlu0 %4592  ;;  %v4588_v62 = vpop.permute.xlu1 %4587 }
 0x350   : > { %v4595_v54 = vunpack.i.h.bf16 %v4593_v60  ;;  %v4594_v35 = vunpack.i.l.bf16 %v4593_v60  ;;  %v4590_v49 = vunpack.i.h.bf16 %v4588_v62  ;;  %v4589_v2 = vunpack.i.l.bf16 %v4588_v62 }
 0x352   : > { %v3734_v23 = vsel %vm3711_vm7, %v3701_v46, %v4589_v2  ;;  %v3735_v26 = vsel %vm3711_vm7, %v3702_v19, %v4590_v49  ;;  %v3736_v42 = vsel %vm3711_vm7, %v3703_v32, %v4594_v35  ;;  %v3737_v21 = vsel %vm3711_vm7, %v3704_v17, %v4595_v54 }
 0x353   : > { %v3755_v58 = vpack.c.bf16 %v3735_v26, %v3734_v23  ;;  %v3756_v39 = vpack.c.bf16 %v3737_v21, %v3736_v42  ;;  %v4598_v43 = vpop.permute.xlu0 %4597  ;;  %v3707_v54 = vsel %vm331_vm0, %v7581_v31, %v4584_v0  ;;  %v3708_v35 = vsel %vm331_vm0, %v7577_v50, %v4585_v20 }
 0x354   : > { %v4600_v27 = vunpack.i.h.bf16 %v4598_v43  ;;  %v4599_v18 = vunpack.i.l.bf16 %v4598_v43 }
 0x355   : > { %4310 = vmatmul.mubr.bf16.gmra.mxu1 %v3755_v58  ;;  %v7691_v58 = vld [vmem:[%s7847_s4] ss:$0 sm:$0xff] }
 0x356   : > { %4313 = vmatprep.mubr.bf16.mxu1 %v3756_v39  ;;  %v3681_v47 = vsel %vm331_vm0, %v3649_v1, %v4599_v18 }
 0x35a   : > { %v4603_v6 = vpop.permute.xlu1 %4602 }
 0x35b   : > { %v4605_v32 = vunpack.i.h.bf16 %v4603_v6  ;;  %v4604_v19 = vunpack.i.l.bf16 %v4603_v6 }
 0x35d   : > { %v3709_v26 = vsel %vm331_vm0, %v7602_v24, %v4604_v19  ;;  %v3710_v31 = vsel %vm331_vm0, %v7598_v16, %v4605_v32 }
 0x368   : > { %v4608_v41 = vpop.permute.xlu0 %4607 }
 0x369   : > { %v4610_v11 = vunpack.i.h.bf16 %v4608_v41  ;;  %v4609_v44 = vunpack.i.l.bf16 %v4608_v41 }
 0x36b   : > { %v3712_v4 = vsel %vm3711_vm7, %v3679_v3, %v4609_v44  ;;  %v3713_v38 = vsel %vm3711_vm7, %v3680_v36, %v4610_v11 }
 0x36c   : > { %v3744_v29 = vpack.c.bf16 %v3713_v38, %v3712_v4 }
 0x36e   : > { %4289 = vmatprep.mubr.bf16.mxu0 %v3744_v29 }
 0x370   : > { %v4613_v12 = vpop.permute.xlu1 %4612 }
 0x371   : > { %v4615_v59 = vunpack.i.h.bf16 %v4613_v12  ;;  %v4614_v63 = vunpack.i.l.bf16 %v4613_v12 }
 0x373   : > { %v3738_v55 = vsel %vm3711_vm7, %v7573_v22, %v4614_v63  ;;  %v3739_v57 = vsel %vm3711_vm7, %v7564_v13, %v4615_v59  ;;  %v3682_v13 = vsel %vm331_vm0, %v3650_v53, %v4600_v27 }
 0x374   : > { %v3757_v45 = vpack.c.bf16 %v3739_v57, %v3738_v55 }
 0x376   : > { %4314 = vmatmul.mubr.bf16.gmra.mxu1 %v3757_v45 }
 0x378   : > { %v4623_v51 = vpop.permute.xlu0 %4622 }
 0x379   : > { %v4625_v52 = vunpack.i.h.bf16 %v4623_v51  ;;  %v4624_v22 = vunpack.i.l.bf16 %v4623_v51 }
 0x37b   : > { %v3714_v37 = vsel %vm3711_vm7, %v3681_v47, %v4624_v22  ;;  %v3715_v34 = vsel %vm3711_vm7, %v3682_v13, %v4625_v52 }
 0x37c   : > { %v3745_v48 = vpack.c.bf16 %v3715_v34, %v3714_v37 }
 0x37e   : > { %4290 = vmatmul.mubr.bf16.vlgmr.msra.gmra.mxu0 %v3745_v48 }
 0x380   : > { %v4618_v25 = vpop.permute.xlu1 %4617 }
 0x381   : > { %v4620_v60 = vunpack.i.h.bf16 %v4618_v25  ;;  %v4619_v62 = vunpack.i.l.bf16 %v4618_v25 }
 0x383   : > { %v3740_v49 = vsel %vm3711_vm7, %v3707_v54, %v4619_v62  ;;  %v3741_v2 = vsel %vm3711_vm7, %v3708_v35, %v4620_v60 }
 0x384   : > { %v3758_v17 = vpack.c.bf16 %v3741_v2, %v3740_v49 }
 0x386   : > { %4317 = vmatprep.mubr.bf16.mxu1 %v3758_v17 }
 0x389   : > { %v4628_v46 = vpop.permute.xlu1 %4627 }
 0x38a   : > { %v4630_v40 = vunpack.i.h.bf16 %v4628_v46  ;;  %v4629_v23 = vunpack.i.l.bf16 %v4628_v46 }
 0x38c   : > { %v3742_v50 = vsel %vm3711_vm7, %v3709_v26, %v4629_v23  ;;  %v3743_v42 = vsel %vm3711_vm7, %v3710_v31, %v4630_v40 }
 0x38d   : > { %v3759_v21 = vpack.c.bf16 %v3743_v42, %v3742_v50 }
 0x38f   : > { %4318 = vmatmul.mubr.bf16.gmra.mxu1 %v3759_v21 }
 0x3e0   : > { %v4295_v39 = vpop.f32.mrf.mxu1 }
 0x3e1   : > { %v3890_v43 = vadd.f32 %v4295_v39, %v7691_v58 }
 0x3e2   : > { %v3881_v28 = vpop.f32.mrf.mxu1 }
 0x3e3   : > { %v3998_v33 = vmax.f32 %v3890_v43, 0.0  ;;  %v3882_v24 = vadd.f32 %v7691_v58, %v3881_v28 }
 0x3e4   : > { %v4296_v56 = vpop.f32.mrf.mxu1 }
 0x3e5   : > { %4030 = vst.msk [vmem:[%s7697_s26 + $0x30] sm:$0xff] %vm331_vm0, %v3998_v33  ;;  %v3996_v16 = vmax.f32 %v3882_v24, 0.0  ;;  %v3893_v61 = vadd.f32 %v4296_v56, %v7691_v58 }
 0x3e6   : > { %v3884_v41 = vpop.f32.mrf.mxu1 }
 0x3e7   : > { %4028 = vst.msk [vmem:[%s7697_s26 + $0x20] sm:$0xff] %vm331_vm0, %v3996_v16  ;;  %v3999_v8 = vmax.f32 %v3893_v61, 0.0  ;;  %v3885_v30 = vadd.f32 %v7691_v58, %v3884_v41 }
 0x3e8   : > { %v4299_v7 = vpop.f32.mrf.mxu1 }
 0x3e9   : > { %4031 = vst.msk [vmem:[%s7697_s26 + $0x38] sm:$0xff] %vm331_vm0, %v3999_v8  ;;  %v3997_v5 = vmax.f32 %v3885_v30, 0.0  ;;  %v3906_v11 = vadd.f32 %v4299_v7, %v7691_v58 }
 0x3ea   : > { %v3897_v44 = vpop.f32.mrf.mxu1 }
 0x3eb   : > { %4029 = vst.msk [vmem:[%s7697_s26 + $0x28] sm:$0xff] %vm331_vm0, %v3997_v5  ;;  %v4002_v3 = vmax.f32 %v3906_v11, 0.0  ;;  %v3898_v36 = vadd.f32 %v7691_v58, %v3897_v44 }
 0x3ec   : > { %v4300_v6 = vpop.f32.mrf.mxu1 }
 0x3ed   : > { %4034 = vst.msk [vmem:[%s7697_s26 + $0x50] sm:$0xff] %vm331_vm0, %v4002_v3  ;;  %v4000_v4 = vmax.f32 %v3898_v36, 0.0  ;;  %v3909_v38 = vadd.f32 %v4300_v6, %v7691_v58 }
 0x3ee   : > { %v3900_v29 = vpop.f32.mrf.mxu1 }
 0x3ef   : > { %4032 = vst.msk [vmem:[%s7697_s26 + $0x40] sm:$0xff] %vm331_vm0, %v4000_v4  ;;  %v4003_v12 = vmax.f32 %v3909_v38, 0.0  ;;  %v3901_v59 = vadd.f32 %v7691_v58, %v3900_v29 }
 0x3f0   : > { %v4303_v63 = vpop.f32.mrf.mxu1 }
 0x3f1   : > { %4035 = vst.msk [vmem:[%s7697_s26 + $0x58] sm:$0xff] %vm331_vm0, %v4003_v12  ;;  %v4001_v55 = vmax.f32 %v3901_v59, 0.0  ;;  %v3922_v57 = vadd.f32 %v4303_v63, %v7691_v58 }
 0x3f2   : > { %v3913_v45 = vpop.f32.mrf.mxu1 }
 0x3f3   : > { %4033 = vst.msk [vmem:[%s7697_s26 + $0x48] sm:$0xff] %vm331_vm0, %v4001_v55  ;;  %v4006_v10 = vmax.f32 %v3922_v57, 0.0  ;;  %v3914_v9 = vadd.f32 %v7691_v58, %v3913_v45 }
 0x3f4   : > { %v4304_v27 = vpop.f32.mrf.mxu1 }
 0x3f5   : > { %4038 = vst.msk [vmem:[%s7697_s26 + $0x70] sm:$0xff] %vm331_vm0, %v4006_v10  ;;  %v4004_v18 = vmax.f32 %v3914_v9, 0.0  ;;  %v3925_v51 = vadd.f32 %v4304_v27, %v7691_v58 }
 0x3f6   : > { %v3916_v14 = vpop.f32.mrf.mxu1 }
 0x3f7   : > { %4036 = vst.msk [vmem:[%s7697_s26 + $0x60] sm:$0xff] %vm331_vm0, %v4004_v18  ;;  %v4007_v53 = vmax.f32 %v3925_v51, 0.0  ;;  %v3917_v15 = vadd.f32 %v7691_v58, %v3916_v14 }
 0x3f9   : > { %4039 = vst.msk [vmem:[%s7697_s26 + $0x78] sm:$0xff] %vm331_vm0, %v4007_v53  ;;  %v4005_v52 = vmax.f32 %v3917_v15, 0.0 }
 0x3fb   : > { %4037 = vst.msk [vmem:[%s7697_s26 + $0x68] sm:$0xff] %vm331_vm0, %v4005_v52 }
 0x3fc   : > { %v4307_v1 = vpop.f32.mrf.mxu1 }
 0x3fd   : > { %v3938_v22 = vadd.f32 %v4307_v1, %v7691_v58 }
 0x3fe   : > { %v3929_v47 = vpop.f32.mrf.mxu1 }
 0x3ff   : > { %v4010_v13 = vmax.f32 %v3938_v22, 0.0  ;;  %v3930_v37 = vadd.f32 %v7691_v58, %v3929_v47 }
 0x400   : > { %v4308_v34 = vpop.f32.mrf.mxu1 }
 0x401   : > { %4042 = vst.msk [vmem:[%s7697_s26 + $0x90] sm:$0xff] %vm331_vm0, %v4010_v13  ;;  %v4008_v48 = vmax.f32 %v3930_v37, 0.0  ;;  %v3941_v20 = vadd.f32 %v4308_v34, %v7691_v58 }
 0x402   : > { %v3932_v0 = vpop.f32.mrf.mxu1 }
 0x403   : > { %4040 = vst.msk [vmem:[%s7697_s26 + $0x80] sm:$0xff] %vm331_vm0, %v4008_v48  ;;  %v4011_v25 = vmax.f32 %v3941_v20, 0.0  ;;  %v3933_v60 = vadd.f32 %v7691_v58, %v3932_v0 }
 0x405   : > { %4043 = vst.msk [vmem:[%s7697_s26 + $0x98] sm:$0xff] %vm331_vm0, %v4011_v25  ;;  %v4009_v62 = vmax.f32 %v3933_v60, 0.0 }
 0x407   : > { %4041 = vst.msk [vmem:[%s7697_s26 + $0x88] sm:$0xff] %vm331_vm0, %v4009_v62 }
 0x415   : > { %v4311_v54 = vpop.f32.mrf.mxu1 }
 0x416   : > { %v3954_v35 = vadd.f32 %v4311_v54, %v7691_v58 }
 0x417   : > { %v3945_v49 = vpop.f32.mrf.mxu1 }
 0x418   : > { %v4014_v2 = vmax.f32 %v3954_v35, 0.0  ;;  %v3946_v17 = vadd.f32 %v7691_v58, %v3945_v49 }
 0x419   : > { %v4312_v32 = vpop.f32.mrf.mxu1 }
 0x41a   : > { %4046 = vst.msk [vmem:[%s7697_s26 + $0xb0] sm:$0xff] %vm331_vm0, %v4014_v2  ;;  %v4012_v19 = vmax.f32 %v3946_v17, 0.0  ;;  %v3957_v46 = vadd.f32 %v4312_v32, %v7691_v58 }
 0x41b   : > { %v3948_v40 = vpop.f32.mrf.mxu1 }
 0x41c   : > { %4044 = vst.msk [vmem:[%s7697_s26 + $0xa0] sm:$0xff] %vm331_vm0, %v4012_v19  ;;  %v4015_v23 = vmax.f32 %v3957_v46, 0.0  ;;  %v3949_v26 = vadd.f32 %v7691_v58, %v3948_v40 }
 0x41e   : > { %4047 = vst.msk [vmem:[%s7697_s26 + $0xb8] sm:$0xff] %vm331_vm0, %v4015_v23  ;;  %v4013_v31 = vmax.f32 %v3949_v26, 0.0 }
 0x420   : > { %4045 = vst.msk [vmem:[%s7697_s26 + $0xa8] sm:$0xff] %vm331_vm0, %v4013_v31 }
 0x436   : > { %v4315_v50 = vpop.f32.mrf.mxu1 }
 0x437   : > { %v3970_v42 = vadd.f32 %v4315_v50, %v7691_v58 }
 0x438   : > { %v3961_v21 = vpop.f32.mrf.mxu1 }
 0x439   : > { %v4018_v39 = vmax.f32 %v3970_v42, 0.0  ;;  %v3962_v43 = vadd.f32 %v7691_v58, %v3961_v21 }
 0x43a   : > { %v4316_v28 = vpop.f32.mrf.mxu1 }
 0x43b   : > { %4050 = vst.msk [vmem:[%s7697_s26 + $0xd0] sm:$0xff] %vm331_vm0, %v4018_v39  ;;  %v4016_v33 = vmax.f32 %v3962_v43, 0.0  ;;  %v3973_v24 = vadd.f32 %v4316_v28, %v7691_v58 }
 0x43c   : > { %v3964_v56 = vpop.f32.mrf.mxu1 }
 0x43d   : > { %4048 = vst.msk [vmem:[%s7697_s26 + $0xc0] sm:$0xff] %vm331_vm0, %v4016_v33  ;;  %v4019_v16 = vmax.f32 %v3973_v24, 0.0  ;;  %v3965_v61 = vadd.f32 %v7691_v58, %v3964_v56 }
 0x43e   : > { %v4291_v41 = vpop.f32.mrf.mxu0 }
 0x43f   : > { %v3874_v8 = vadd.f32 %v4291_v41, %v7691_v58  ;;  %4051 = vst.msk [vmem:[%s7697_s26 + $0xd8] sm:$0xff] %vm331_vm0, %v4019_v16  ;;  %v4017_v30 = vmax.f32 %v3965_v61, 0.0 }
 0x440   : > { %v3865_v7 = vpop.f32.mrf.mxu0 }
 0x441   : > { %v3994_v5 = vmax.f32 %v3874_v8, 0.0  ;;  %v3866_v11 = vadd.f32 %v7691_v58, %v3865_v7  ;;  %4049 = vst.msk [vmem:[%s7697_s26 + $0xc8] sm:$0xff] %vm331_vm0, %v4017_v30 }
 0x442   : > { %v4292_v44 = vpop.f32.mrf.mxu0 }
 0x443   : > { %4026 = vst.msk [vmem:[%s7697_s26 + $0x10] sm:$0xff] %vm331_vm0, %v3994_v5  ;;  %v3992_v3 = vmax.f32 %v3866_v11, 0.0  ;;  %v3877_v36 = vadd.f32 %v4292_v44, %v7691_v58 }
 0x444   : > { %v3868_v6 = vpop.f32.mrf.mxu0 }
 0x445   : > { %4024 = vst.msk [vmem:[%s7697_s26] sm:$0xff] %vm331_vm0, %v3992_v3  ;;  %v3995_v4 = vmax.f32 %v3877_v36, 0.0  ;;  %v3869_v38 = vadd.f32 %v7691_v58, %v3868_v6 }
 0x447   : > { %4027 = vst.msk [vmem:[%s7697_s26 + $0x18] sm:$0xff] %vm331_vm0, %v3995_v4  ;;  %v3993_v29 = vmax.f32 %v3869_v38, 0.0 }
 0x449   : > { %4025 = vst.msk [vmem:[%s7697_s26 + $0x8] sm:$0xff] %vm331_vm0, %v3993_v29 }
 0x44f   : > { %v4319_v12 = vpop.f32.mrf.mxu1 }
 0x450   : > { %v3986_v59 = vadd.f32 %v4319_v12, %v7691_v58 }
 0x451   : > { %v3977_v63 = vpop.f32.mrf.mxu1 }
 0x452   : > { %v4022_v55 = vmax.f32 %v3986_v59, 0.0  ;;  %v3978_v57 = vadd.f32 %v7691_v58, %v3977_v63 }
 0x453   : > { %v4320_v45 = vpop.f32.mrf.mxu1 }
 0x454   : > { %4054 = vst.msk [vmem:[%s7697_s26 + $0xf0] sm:$0xff] %vm331_vm0, %v4022_v55  ;;  %v4020_v10 = vmax.f32 %v3978_v57, 0.0  ;;  %v3989_v9 = vadd.f32 %v4320_v45, %v7691_v58 }
 0x455   : > { %v3980_v27 = vpop.f32.mrf.mxu1 }
 0x456   : > { %4052 = vst.msk [vmem:[%s7697_s26 + $0xe0] sm:$0xff] %vm331_vm0, %v4020_v10  ;;  %v4023_v18 = vmax.f32 %v3989_v9, 0.0  ;;  %v3981_v51 = vadd.f32 %v7691_v58, %v3980_v27 }
 0x458   : > { %4055 = vst.msk [vmem:[%s7697_s26 + $0xf8] sm:$0xff] %vm331_vm0, %v4023_v18  ;;  %v4021_v14 = vmax.f32 %v3981_v51, 0.0 }
 0x45a   : > { %4053 = vst.msk [vmem:[%s7697_s26 + $0xe8] sm:$0xff] %vm331_vm0, %v4021_v14 }
 0x45b   : > { %4684 = shalt.err (!%p4681_p10)
}
 0x45c   : > { %s4685_s14 = scalar_lea.hbm %s7794_s9, 4096  ;;  %s4689_s13 = scalar_lea.hbm %s7848_s5, 8192 }
 0x45d   : > { %p4686_p0 = scmp.ne.s32.totalorder %s7794_s9, %s4685_s14  ;;  %p4690_p1 = scmp.lt.s32.totalorder %s7794_s9, %s7848_s5 }
 0x45e   : > { %p4691_p3 = scmp.lt.s32.totalorder %s4689_s13, %s4685_s14 }
 0x45f   : > { %p4687_p2 = pnand %p4686_p0, %p8123_p12 }
 0x460   : > { %p4692_p6 = por %p4691_p3, %p4690_p1 }
 0x461   : > { %p4688_p9 = pneg %p4687_p2 }
 0x463   : > { %p4693_p11 = pnand %p4692_p6, %p4688_p9 }
 0x465   : > { %4696 = shalt.err (!%p4693_p11)
}
 0x466   : > { %s4745_s25 = smov 128   ;;  %s4746_s29 = smov 8  }
 0x467   : > { %4339 = dma.vmem_to_hbm [thread:$0]  (%p8123_p12), %s7796_s8, 4096, %s7794_s9, %s4057_s22, %s4745_s25, %s4745_s25, %s4746_s29  }
 0x468 PF: > { %s4085_s7 = sand.u32 1, %s4723_s18   ;;  %p8124_p13 = scmp.ne.s32.totalorder %s7920_s6, 0 }
 0x469   : > { %p8125_p4 = scmp.ge.s32.totalorder %s4735_s21, 2  ;;  %s4086_s10 = scalar_lea.sflag [#allocation4], %s4085_s7 }
 0x46b   : > { %p4346_p5 = pnand %p8125_p4, %p8124_p13 }
 0x46d   : > { %p4347_p7 = pneg %p4346_p5 }
 0x46f   : > { %4718 = dma.done.wait (%p4347_p7), %s4086_s10, 4096  }
 0x470   : > { %4720 = vsyncadd (%p4347_p7), %s4086_s10, 4294963200  ;;  %p18_p8 = scmp.ge.s32.totalorder %s4802_s24, 4   ;;  %s8126_s18 = smov %s4727_s19 }
 0x471   : > { %s8127_s19 = smov %s4731_s20  ;;  %s8128_s20 = smov %s4814_s27 }
 0x472   : > { %s8129_s21 = smov %s4802_s24  ;;  %20 = sbr.rel (!%p18_p8) target bundleno = 5 (0x5), region = 85 }
 0x477   :  { %4091 = vsyncpa [#allocation3], 1 }
 0x478   :  { %4093 = vsyncpa [#allocation3 + $0x1], 1 }
 0x479   :  { %4094 = vsyncpa [#allocation4], 1 }
 0x47a   :  { %4096 = vsyncpa [#allocation4 + $0x1], 1 }

</bundles_post_ra>
